<compile_context>
chip_gen: v6e
topology: v6e:2x2x1
jax: 0.10.0
libtpu: 0.0.40
codegen_flags: <defaults>
</compile_context>

<pallas_src>
import functools

import jax
import jax.numpy as jnp
from jax.experimental import pallas as pl
from jax.experimental.pallas import tpu as pltpu


def _rpe_attention_kernel(x_ref, wqkv_ref, wout_ref, bias_ref, o_ref,
                          *, num_windows, seq_len, heads, dim_head):
    """One grid step: attention for a block of `num_windows` windows.

    x_ref:    (W*N, d)        activations, window-major token rows (N padded, N % 8 == 0)
    wqkv_ref: (d, 3*d)        fused q/k/v projection, columns ordered (head, {q,k,v}, dh);
                              softmax scale is pre-folded into the q columns
    wout_ref: (d, d)          output projection (to_out[0].weight, transposed)
    bias_ref: (heads, N, N)   relative position bias (f32), padded key columns = -1e30
    o_ref:    (W*N, d)        output
    """
    x = x_ref[...]
    cdt = x.dtype                                   # MXU operand dtype (bf16 or f32)
    W, N, dh = num_windows, seq_len, dim_head
    M = W * N

    # One wide projection for all heads and q/k/v: (M, d) @ (d, 3*d), f32 accumulation.
    qkv = jnp.dot(x, wqkv_ref[...], preferred_element_type=jnp.float32).astype(cdt)

    head_outs = []
    for h in range(heads):                          # heads = d // dh is small; unrolled
        base = 3 * dh * h
        q = qkv[:, base:base + dh].reshape(W, N, dh)
        k = qkv[:, base + dh:base + 2 * dh].reshape(W, N, dh)
        v = qkv[:, base + 2 * dh:base + 3 * dh].reshape(W, N, dh)

        # Batched per-window logits; the k-transpose is absorbed in the contraction.
        sim = jnp.einsum("wid,wjd->wij", q, k,
                         preferred_element_type=jnp.float32)      # (W, N, N) f32
        sim = sim + bias_ref[h][None, :, :]

        # Softmax over keys, strictly in f32 (matches torch.softmax). Padded key
        # columns carry bias = -1e30, so exp() zeroes them out.
        sim = sim - jnp.max(sim, axis=-1, keepdims=True)
        p = jnp.exp(sim)
        inv = pl.reciprocal(jnp.sum(p, axis=-1, keepdims=True), approx=True)
        attn = (p * inv).astype(cdt)
        # TODO(synk): nn.Dropout in `attend`/`to_out` is identity in eval mode (p=0.0);
        # not implemented as a stochastic op here.

        out_h = jnp.einsum("wij,wjd->wid", attn, v,
                           preferred_element_type=jnp.float32)    # (W, N, dh)
        head_outs.append(out_h.astype(cdt).reshape(M, dh))

    # Head concat + single output projection: (M, d) @ (d, d), contraction depth K = d.
    out_all = jnp.concatenate(head_outs, axis=-1)
    o_ref[...] = jnp.dot(out_all, wout_ref[...],
                         preferred_element_type=jnp.float32).astype(o_ref.dtype)


def make_rel_pos_indices(window_size):
    """Reproduce the buffer computed in RPEAttention.__init__ (torch meshgrid 'ij')."""
    w = window_size
    pos = jnp.arange(w)
    gi, gj = jnp.meshgrid(pos, pos, indexing="ij")
    grid = jnp.stack([gi, gj]).reshape(2, -1).T                     # (w*w, 2)
    rel = grid[:, None, :] - grid[None, :, :] + (w - 1)             # (N, N, 2)
    idx = (rel * jnp.array([2 * w - 1, 1])).sum(-1)                 # (N, N)
    return idx


def _vmem_capacity_bytes():
    try:
        return int(pltpu.get_tpu_info().vmem_capacity_bytes)
    except Exception:
        return 64 * 1024 * 1024          # conservative fallback (v7x per-TC figure)


def _choose_block_windows(num_win, max_windows):
    """Windows per grid step. Prefers >= 2 and an even number of grid steps so the
    single 'parallel' axis load-balances across the two TensorCores on v7x (harmless
    on single-TC v5e/v6e beyond a couple of cheap extra grid steps)."""
    w = max(1, min(num_win, max_windows))
    nb = -(-num_win // w)
    if num_win >= 2 and (nb < 2 or nb % 2 == 1):
        nb = max(2, nb + (nb % 2))
        w = -(-num_win // nb)
    return w


def rpe_attention(x, w_qkv, w_out, emb_table, *, dim_head, window_size,
                  max_windows_per_block=None):
    """MaxViT RPE window attention. x: (b, x, y, w1, w2, d) -> same shape.

    w_qkv:     (3*d, d)              to_qkv.weight   (nn.Linear, bias=False)
    w_out:     (d, d)                to_out[0].weight
    emb_table: ((2*ws-1)**2, heads)  rel_pos_bias.weight
    """
    b, xh, yw, w1, w2, d = x.shape
    assert w1 == window_size and w2 == window_size
    assert d % dim_head == 0
    heads = d // dim_head
    seq = w1 * w2
    seq_pad = -(-seq // 8) * 8                  # sublane-align the token axis (49 -> 56)
    num_win = b * xh * yw
    scale = dim_head ** -0.5

    # ---- generation-aware block sizing (v5e/v6e: 128 MiB VMEM; v7x: 64 MiB/TC) ----
    big_vmem = _vmem_capacity_bytes() >= 100 * 1024 * 1024
    if max_windows_per_block is None:
        max_windows_per_block = 128 if big_vmem else 64
    vmem_limit = (64 if big_vmem else 40) * 1024 * 1024

    # ---- one-time parameter prep (plain XLA ops, outside the kernel) ----
    # Fused qkv weight (d, 3*d), columns ordered (head, {q,k,v}, dh); the softmax scale
    # is folded into the q columns so the kernel needs no per-head q * scale multiply.
    wt = w_qkv.T.reshape(d, 3, heads, dim_head).astype(jnp.float32)
    wt = wt * jnp.array([scale, 1.0, 1.0], jnp.float32).reshape(1, 3, 1, 1)
    wqkv = wt.transpose(0, 2, 1, 3).reshape(d, 3 * d).astype(x.dtype)
    # Output projection (d, d); head-major columns match the kernel's head concat.
    wout = w_out.T.astype(x.dtype)
    # Relative-position bias (heads, N, N) padded to (heads, Np, Np). Padded key
    # columns (and padded query rows, which are dropped anyway) are masked with -1e30.
    rel_idx = make_rel_pos_indices(window_size)
    bias = emb_table[rel_idx].astype(jnp.float32).transpose(2, 0, 1)
    bias = jnp.pad(bias, ((0, 0), (0, seq_pad - seq), (0, seq_pad - seq)),
                   constant_values=-1e30)

    # ---- window batching: W windows per grid step, token axis padded to seq_pad ----
    W = _choose_block_windows(num_win, max_windows_per_block)
    num_blocks = pl.cdiv(num_win, W)
    padded_win = num_blocks * W
    assert (W * seq_pad) % 8 == 0               # sublane alignment of the row block

    x_win = x.reshape(num_win, seq, d)
    x_win = jnp.pad(x_win, ((0, padded_win - num_win), (0, seq_pad - seq), (0, 0)))
    x2d = x_win.reshape(padded_win * seq_pad, d)

    kernel = functools.partial(
        _rpe_attention_kernel, num_windows=W, seq_len=seq_pad,
        heads=heads, dim_head=dim_head)

    out2d = pl.pallas_call(
        kernel,
        out_shape=jax.ShapeDtypeStruct((padded_win * seq_pad, d), x.dtype),
        grid=(num_blocks,),
        in_specs=[
            pl.BlockSpec((W * seq_pad, d), lambda i: (i, 0)),             # activations
            pl.BlockSpec((d, 3 * d), lambda i: (0, 0)),                   # fused qkv W
            pl.BlockSpec((d, d), lambda i: (0, 0)),                       # out-proj W
            pl.BlockSpec((heads, seq_pad, seq_pad), lambda i: (0, 0, 0)), # rel-pos bias
        ],
        out_specs=pl.BlockSpec((W * seq_pad, d), lambda i: (i, 0)),
        compiler_params=pltpu.CompilerParams(
            dimension_semantics=("parallel",),   # window-block axis (megacore on v7x)
            vmem_limit_bytes=vmem_limit),
    )(x2d, wqkv, wout, bias)

    out = out2d.reshape(padded_win, seq_pad, d)[:num_win, :seq]
    return out.reshape(b, xh, yw, w1, w2, d)


def reference_rpe_attention(x, w_qkv, w_out, emb_table, *, dim_head, window_size):
    """Pure-JAX reference mirroring the PyTorch forward (eval mode), in f32."""
    b, xh, yw, w1, w2, d = x.shape
    heads = d // dim_head
    B, N = b * xh * yw, w1 * w2
    scale = dim_head ** -0.5
    xf = x.reshape(B, N, d).astype(jnp.float32)
    qkv = xf @ w_qkv.T.astype(jnp.float32)                          # (B, N, 3d)
    q, k, v = jnp.split(qkv, 3, axis=-1)
    split = lambda t: t.reshape(B, N, heads, dim_head).transpose(0, 2, 1, 3)
    q, k, v = map(split, (q, k, v))
    q = q * scale
    rel_idx = make_rel_pos_indices(window_size)
    bias = emb_table[rel_idx].astype(jnp.float32).transpose(2, 0, 1)  # (h, N, N)
    sim = jnp.einsum("bhid,bhjd->bhij", q, k) + bias[None]
    attn = jax.nn.softmax(sim, axis=-1)
    out = jnp.einsum("bhij,bhjd->bhid", attn, v)
    out = out.transpose(0, 2, 1, 3).reshape(B, N, d)
    out = out @ w_out.T.astype(jnp.float32)
    return out.reshape(b, xh, yw, w1, w2, d)


if __name__ == "__main__":
    dim = 64
    dim_head = 32
    heads = dim // dim_head                 # 2
    window_size = 7

    key = jax.random.PRNGKey(0)
    k_x1, k_x2, k_qkv, k_out, k_emb = jax.random.split(key, 5)

    # Module parameters (shapes match the PyTorch module).
    w_qkv = jax.random.normal(k_qkv, (3 * dim, dim), jnp.float32) * dim ** -0.5
    w_out = jax.random.normal(k_out, (dim, dim), jnp.float32) * dim ** -0.5
    emb_table = jax.random.normal(
        k_emb, ((2 * window_size - 1) ** 2, heads), jnp.float32) * 0.02

    # Case 1: small input; block sizing auto-picks >= 2 even grid steps (megacore).
    x1 = jax.random.normal(
        k_x1, (2, 2, 2, window_size, window_size, dim), jnp.float32)
    o1 = jax.block_until_ready(
        rpe_attention(x1, w_qkv, w_out, emb_table,
                      dim_head=dim_head, window_size=window_size))
    r1 = reference_rpe_attention(x1, w_qkv, w_out, emb_table,
                                 dim_head=dim_head, window_size=window_size)
    assert o1.shape == x1.shape
    err1 = float(jnp.max(jnp.abs(o1 - r1)))
    # approx reciprocal in the softmax denominator adds a small relative error.
    assert err1 < 1e-2, err1

    # Case 2: more windows than the block size -> multi-step grid + zero-padded tail.
    x2 = jax.random.normal(
        k_x2, (2, 3, 3, window_size, window_size, dim), jnp.float32)
    o2 = jax.block_until_ready(
        rpe_attention(x2, w_qkv, w_out, emb_table, dim_head=dim_head,
                      window_size=window_size, max_windows_per_block=16))
    r2 = reference_rpe_attention(x2, w_qkv, w_out, emb_table,
                                 dim_head=dim_head, window_size=window_size)
    err2 = float(jnp.max(jnp.abs(o2 - r2)))
    assert err2 < 1e-2, err2

    # Case 3: bf16 activations/weights (deployment dtype on v6e/v7x); f32 softmax/accum.
    o3 = jax.block_until_ready(
        rpe_attention(x2.astype(jnp.bfloat16), w_qkv, w_out, emb_table,
                      dim_head=dim_head, window_size=window_size,
                      max_windows_per_block=16))
    err3 = float(jnp.max(jnp.abs(o3.astype(jnp.float32) - r2)))
    assert err3 < 0.3, err3

    print("KERNEL_OK")
</pallas_src>

<mosaic_0001>
module attributes {stable_mosaic.version = 11 : i64} {
  func.func @_rpe_attention_kernel(%arg0: i32, %arg1: memref<224x64xf32, #tpu.memory_space<vmem>>, %arg2: memref<64x192xf32, #tpu.memory_space<vmem>>, %arg3: memref<64x64xf32, #tpu.memory_space<vmem>>, %arg4: memref<2x56x56xf32, #tpu.memory_space<vmem>>, %arg5: memref<224x64xf32, #tpu.memory_space<vmem>>) attributes {dimension_semantics = [#tpu.dimension_semantics<parallel>], iteration_bounds = array<i64: 2>, scalar_prefetch = 0 : i64, scratch_operands = 0 : i64, tpu.core_type = #tpu.core_type<tc>, window_params = [{transform_indices = @transform_0, window_bounds = array<i64: 224, 64>}, {pipeline_mode = #tpu.pipeline_mode<synchronous>, transform_indices = @transform_1, window_bounds = array<i64: 64, 192>}, {pipeline_mode = #tpu.pipeline_mode<synchronous>, transform_indices = @transform_2, window_bounds = array<i64: 64, 64>}, {pipeline_mode = #tpu.pipeline_mode<synchronous>, transform_indices = @transform_3, window_bounds = array<i64: 2, 56, 56>}, {transform_indices = @transform_4, window_bounds = array<i64: 224, 64>}]} {
    %c0 = arith.constant 0 : index
    %c0_0 = arith.constant 0 : index
    %0 = vector.load %arg1[%c0, %c0_0] : memref<224x64xf32, #tpu.memory_space<vmem>>, vector<224x64xf32>
    %c0_1 = arith.constant 0 : index
    %c0_2 = arith.constant 0 : index
    %1 = vector.load %arg2[%c0_1, %c0_2] : memref<64x192xf32, #tpu.memory_space<vmem>>, vector<64x192xf32>
    %cst = arith.constant dense<0.000000e+00> : vector<224x192xf32>
    %2 = tpu.matmul %0, %1, %cst {dimension_numbers = #tpu.dot_dimension_numbers<[1], [0], [0], [1], [0, 0, 1, 1], [], []>} : vector<224x64xf32>, vector<64x192xf32>, vector<224x192xf32> -> vector<224x192xf32>
    %3 = vector.extract_strided_slice %2 {offsets = [0, 0], sizes = [224, 32], strides = [1, 1]} : vector<224x192xf32> to vector<224x32xf32>
    %4 = vector.shape_cast %3 : vector<224x32xf32> to vector<4x56x32xf32>
    %5 = vector.extract_strided_slice %2 {offsets = [0, 32], sizes = [224, 32], strides = [1, 1]} : vector<224x192xf32> to vector<224x32xf32>
    %6 = vector.shape_cast %5 : vector<224x32xf32> to vector<4x56x32xf32>
    %7 = vector.extract_strided_slice %2 {offsets = [0, 64], sizes = [224, 32], strides = [1, 1]} : vector<224x192xf32> to vector<224x32xf32>
    %8 = vector.shape_cast %7 : vector<224x32xf32> to vector<4x56x32xf32>
    "tpu.trace_start"() <{level = 10 : i32, message = "wid,wjd->wij"}> : () -> ()
    %cst_3 = arith.constant dense<0.000000e+00> : vector<4x56x56xf32>
    %9 = tpu.matmul %4, %6, %cst_3 {dimension_numbers = #tpu.dot_dimension_numbers<[2], [2], [1], [1], [0, 0, 0, 1, 1, 1], [0], [0]>} : vector<4x56x32xf32>, vector<4x56x32xf32>, vector<4x56x56xf32> -> vector<4x56x56xf32>
    "tpu.trace_stop"() : () -> ()
    %c0_4 = arith.constant 0 : index
    %c0_5 = arith.constant 0 : index
    %c0_6 = arith.constant 0 : index
    %10 = vector.load %arg4[%c0_4, %c0_5, %c0_6] : memref<2x56x56xf32, #tpu.memory_space<vmem>>, vector<1x56x56xf32>
    %11 = vector.shape_cast %10 : vector<1x56x56xf32> to vector<56x56xf32>
    %12 = vector.shape_cast %11 : vector<56x56xf32> to vector<1x56x56xf32>
    %13 = vector.broadcast %12 : vector<1x56x56xf32> to vector<4x56x56xf32>
    %14 = arith.addf %9, %13 : vector<4x56x56xf32>
    %cst_7 = arith.constant dense<0xFF800000> : vector<4x56xf32>
    %15 = vector.multi_reduction <maximumf>, %14, %cst_7 [2] : vector<4x56x56xf32> to vector<4x56xf32>
    %16 = vector.shape_cast %15 : vector<4x56xf32> to vector<4x56x1xf32>
    %17 = vector.broadcast %16 : vector<4x56x1xf32> to vector<4x56x56xf32>
    %18 = arith.subf %14, %17 : vector<4x56x56xf32>
    %19 = math.exp %18 : vector<4x56x56xf32>
    %cst_8 = arith.constant dense<0.000000e+00> : vector<4x56xf32>
    %20 = vector.multi_reduction <add>, %19, %cst_8 [2] : vector<4x56x56xf32> to vector<4x56xf32>
    %21 = vector.shape_cast %20 : vector<4x56xf32> to vector<4x56x1xf32>
    %22 = tpu.reciprocal %21 {approx = true} : vector<4x56x1xf32> -> vector<4x56x1xf32>
    %23 = vector.broadcast %22 : vector<4x56x1xf32> to vector<4x56x56xf32>
    %24 = arith.mulf %19, %23 : vector<4x56x56xf32>
    "tpu.trace_start"() <{level = 10 : i32, message = "wij,wjd->wid"}> : () -> ()
    %cst_9 = arith.constant dense<0.000000e+00> : vector<4x56x32xf32>
    %25 = tpu.matmul %24, %8, %cst_9 {dimension_numbers = #tpu.dot_dimension_numbers<[2], [1], [1], [2], [0, 0, 0, 1, 1, 2], [0], [0]>} : vector<4x56x56xf32>, vector<4x56x32xf32>, vector<4x56x32xf32> -> vector<4x56x32xf32>
    "tpu.trace_stop"() : () -> ()
    %26 = vector.shape_cast %25 : vector<4x56x32xf32> to vector<224x32xf32>
    %27 = vector.extract_strided_slice %2 {offsets = [0, 96], sizes = [224, 32], strides = [1, 1]} : vector<224x192xf32> to vector<224x32xf32>
    %28 = vector.shape_cast %27 : vector<224x32xf32> to vector<4x56x32xf32>
    %29 = vector.extract_strided_slice %2 {offsets = [0, 128], sizes = [224, 32], strides = [1, 1]} : vector<224x192xf32> to vector<224x32xf32>
    %30 = vector.shape_cast %29 : vector<224x32xf32> to vector<4x56x32xf32>
    %31 = vector.extract_strided_slice %2 {offsets = [0, 160], sizes = [224, 32], strides = [1, 1]} : vector<224x192xf32> to vector<224x32xf32>
    %32 = vector.shape_cast %31 : vector<224x32xf32> to vector<4x56x32xf32>
    "tpu.trace_start"() <{level = 10 : i32, message = "wid,wjd->wij"}> : () -> ()
    %cst_10 = arith.constant dense<0.000000e+00> : vector<4x56x56xf32>
    %33 = tpu.matmul %28, %30, %cst_10 {dimension_numbers = #tpu.dot_dimension_numbers<[2], [2], [1], [1], [0, 0, 0, 1, 1, 1], [0], [0]>} : vector<4x56x32xf32>, vector<4x56x32xf32>, vector<4x56x56xf32> -> vector<4x56x56xf32>
    "tpu.trace_stop"() : () -> ()
    %c1 = arith.constant 1 : index
    %c0_11 = arith.constant 0 : index
    %c0_12 = arith.constant 0 : index
    %34 = vector.load %arg4[%c1, %c0_11, %c0_12] : memref<2x56x56xf32, #tpu.memory_space<vmem>>, vector<1x56x56xf32>
    %35 = vector.shape_cast %34 : vector<1x56x56xf32> to vector<56x56xf32>
    %36 = vector.shape_cast %35 : vector<56x56xf32> to vector<1x56x56xf32>
    %37 = vector.broadcast %36 : vector<1x56x56xf32> to vector<4x56x56xf32>
    %38 = arith.addf %33, %37 : vector<4x56x56xf32>
    %cst_13 = arith.constant dense<0xFF800000> : vector<4x56xf32>
    %39 = vector.multi_reduction <maximumf>, %38, %cst_13 [2] : vector<4x56x56xf32> to vector<4x56xf32>
    %40 = vector.shape_cast %39 : vector<4x56xf32> to vector<4x56x1xf32>
    %41 = vector.broadcast %40 : vector<4x56x1xf32> to vector<4x56x56xf32>
    %42 = arith.subf %38, %41 : vector<4x56x56xf32>
    %43 = math.exp %42 : vector<4x56x56xf32>
    %cst_14 = arith.constant dense<0.000000e+00> : vector<4x56xf32>
    %44 = vector.multi_reduction <add>, %43, %cst_14 [2] : vector<4x56x56xf32> to vector<4x56xf32>
    %45 = vector.shape_cast %44 : vector<4x56xf32> to vector<4x56x1xf32>
    %46 = tpu.reciprocal %45 {approx = true} : vector<4x56x1xf32> -> vector<4x56x1xf32>
    %47 = vector.broadcast %46 : vector<4x56x1xf32> to vector<4x56x56xf32>
    %48 = arith.mulf %43, %47 : vector<4x56x56xf32>
    "tpu.trace_start"() <{level = 10 : i32, message = "wij,wjd->wid"}> : () -> ()
    %cst_15 = arith.constant dense<0.000000e+00> : vector<4x56x32xf32>
    %49 = tpu.matmul %48, %32, %cst_15 {dimension_numbers = #tpu.dot_dimension_numbers<[2], [1], [1], [2], [0, 0, 0, 1, 1, 2], [0], [0]>} : vector<4x56x56xf32>, vector<4x56x32xf32>, vector<4x56x32xf32> -> vector<4x56x32xf32>
    "tpu.trace_stop"() : () -> ()
    %50 = vector.shape_cast %49 : vector<4x56x32xf32> to vector<224x32xf32>
    %51 = tpu.concatenate %26, %50 in 1 : vector<224x32xf32>, vector<224x32xf32> -> vector<224x64xf32>
    %c0_16 = arith.constant 0 : index
    %c0_17 = arith.constant 0 : index
    %52 = vector.load %arg3[%c0_16, %c0_17] : memref<64x64xf32, #tpu.memory_space<vmem>>, vector<64x64xf32>
    %cst_18 = arith.constant dense<0.000000e+00> : vector<224x64xf32>
    %53 = tpu.matmul %51, %52, %cst_18 {dimension_numbers = #tpu.dot_dimension_numbers<[1], [0], [0], [1], [0, 0, 1, 1], [], []>} : vector<224x64xf32>, vector<64x64xf32>, vector<224x64xf32> -> vector<224x64xf32>
    %c0_19 = arith.constant 0 : index
    %c0_20 = arith.constant 0 : index
    %54 = vector.load %arg5[%c0_19, %c0_20] : memref<224x64xf32, #tpu.memory_space<vmem>>, vector<224x64xf32>
    tpu.vector_store %arg5[%c0_19, %c0_20], %53 {strides = array<i32>} : memref<224x64xf32, #tpu.memory_space<vmem>>, vector<224x64xf32>,
    return
  }
  func.func @transform_0(%arg0: i32) -> (i32, i32) {
    %c0_i32 = arith.constant 0 : i32
    %c0_i32_0 = arith.constant 0 : i32
    return %arg0, %c0_i32 : i32, i32
  }
  func.func @transform_1(%arg0: i32) -> (i32, i32) {
    %c0_i32 = arith.constant 0 : i32
    %c0_i32_0 = arith.constant 0 : i32
    %c0_i32_1 = arith.constant 0 : i32
    return %c0_i32, %c0_i32_0 : i32, i32
  }
  func.func @transform_2(%arg0: i32) -> (i32, i32) {
    %c0_i32 = arith.constant 0 : i32
    %c0_i32_0 = arith.constant 0 : i32
    %c0_i32_1 = arith.constant 0 : i32
    return %c0_i32, %c0_i32_0 : i32, i32
  }
  func.func @transform_3(%arg0: i32) -> (i32, i32, i32) {
    %c0_i32 = arith.constant 0 : i32
    %c0_i32_0 = arith.constant 0 : i32
    %c0_i32_1 = arith.constant 0 : i32
    %c0_i32_2 = arith.constant 0 : i32
    return %c0_i32, %c0_i32_0, %c0_i32_1 : i32, i32, i32
  }
  func.func @transform_4(%arg0: i32) -> (i32, i32) {
    %c0_i32 = arith.constant 0 : i32
    %c0_i32_0 = arith.constant 0 : i32
    return %arg0, %c0_i32 : i32, i32
  }
}

</mosaic_0001>

<bundles_post_ra>
// kernel: tpu_custom_call.1
= control target key start
LH: loop header
LB: loop body
LE: loop exit
PB: predicated region body
PF: predicated region fallthrough
CT: control target
= control target key end

     0   :  { %s5454_s15 = smov 0   ;;  %s7552_s0 = inlined_call_operand.vmem [shape: f32[448,64], index: 0, kind: input, shape index: {}]   ;;  %s7553_s1 = inlined_call_operand.vmem [shape: f32[64,192], index: 1, kind: input, shape index: {}]   ;;  %s7554_s2 = inlined_call_operand.vmem [shape: f32[64,64], index: 2, kind: input, shape index: {}]   ;;  %s7555_s3 = inlined_call_operand.vmem [shape: f32[2,56,56], index: 3, kind: input, shape index: {}]   ;;  %s7556_s4 = inlined_call_operand.vmem [shape: f32[448,64], index: 4, kind: output, shape index: {}]  }
   0x1 LB: > { %s4045_s16 = sadd.s32 4294967295, %s5422_s15   ;;  %p4049_p0 = scmp.ge.s32.totalorder %s5422_s15, 1  ;;  %s5422_s15 = sphi %s5454_s15, %s14_s15  }
   0x2   : > { %p163_p1 = scmp.lt.s32.totalorder %s5422_s15, 3 }
   0x4   : > { %p164_p2 = pnand %p4049_p0, %p163_p1 }
   0x6   : > { %167 = sbr.rel (%p164_p2) target bundleno = 2169 (0x879), region = 36 }
   0xb   : > { %v244_v0 = vld [vmem:[%s7553_s1 + $0x78] sm:$0xff]  ;;  %v243_v1 = vld [vmem:[%s7553_s1 + $0x70] sm:$0xff]  ;;  %v242_v2 = vld [vmem:[%s7553_s1 + $0x68] sm:$0xff]  ;;  %s189_s23 = smul.u32 28, %s4045_s16  ;;  %v7559_v4 = vmov 0.0   ;;  %vm245_vm0 = vcmask 523264  }
   0xc   : > { %346 = vmatprep.subr.mxu0 %v244_v0  ;;  %v241_v3 = vld [vmem:[%s7553_s1 + $0x60] sm:$0xff]  ;;  %394 = vmatprep.mubr.f32.mxu0 %v7559_v4  ;;  %v240_v5 = vld [vmem:[%s7553_s1 + $0x58] sm:$0xff]  ;;  %v239_v6 = vld [vmem:[%s7553_s1 + $0x50] sm:$0xff]  ;;  %s5425_s30 = smov 96   ;;  %vm5426_vm1 = vmmov 0   ;;  %s5427_s5 = smov 64  }
   0xd   : > { %347 = vmatpush1.msra.mxu0 %v243_v1  ;;  %p190_p3 = scmp.lt.s32.totalorder %s189_s23, 55  ;;  %5163 = vmatprep.subr.mxu1 %v244_v0  ;;  %v238_v7 = vld [vmem:[%s7553_s1 + $0x48] sm:$0xff]  ;;  %v237_v8 = vld [vmem:[%s7553_s1 + $0x40] sm:$0xff]  ;;  %v236_v9 = vld [vmem:[%s7553_s1 + $0x38] sm:$0xff]  ;;  %vm591_vm2 = vcmask 261120   ;;  %vm1167_vm3 = vcmask 457728  }
   0xe   : > { %348 = vmatprep.subr.mxu0 %v242_v2  ;;  %5171 = vmatpush1.msra.mxu1 %v243_v1  ;;  %v235_v10 = vld [vmem:[%s7553_s1 + $0x30] sm:$0xff]  ;;  %v234_v11 = vld [vmem:[%s7553_s1 + $0x28] sm:$0xff]  ;;  %v233_v12 = vld [vmem:[%s7553_s1 + $0x20] sm:$0xff]  ;;  %s5428_s22 = smov 32  }
   0xf   : > { %349 = vmatpush1.msra.mxu0 %v241_v3  ;;  %s7737_s23 = smov (!%p190_p3, %s189_s23), 55  ;;  %5164 = vmatprep.subr.mxu1 %v242_v2  ;;  %v232_v13 = vld [vmem:[%s7553_s1 + $0x18] sm:$0xff]  ;;  %v231_v14 = vld [vmem:[%s7553_s1 + $0x10] sm:$0xff]  ;;  %v230_v15 = vld [vmem:[%s7553_s1 + $0x8] sm:$0xff] }
  0x10   : > { %350 = vmatprep.subr.mxu0 %v240_v5  ;;  %5172 = vmatpush1.msra.mxu1 %v241_v3  ;;  %s4050_s14 = sshll.u32 %s7737_s23, 3  ;;  %v229_v16 = vld [vmem:[%s7553_s1] sm:$0xff] }
  0x11   : > { %351 = vmatpush1.msra.mxu0 %v239_v6  ;;  %5165 = vmatprep.subr.mxu1 %v240_v5  ;;  %s5513_s25 = scalar_lea.vmem %s7552_s0, %s4050_s14  ;;  %s7491_s8 = scalar_lea.vmem %s7556_s4, %s4050_s14 }
  0x12   : > { %352 = vmatprep.subr.mxu0 %v238_v7  ;;  %5173 = vmatpush1.msra.mxu1 %v239_v6  ;;  %v201_v17 = vld [vmem:[%s5513_s25] sm:$0xff]  ;;  %v222_v18 = vld [vmem:[%s5513_s25 + $0xa8] sm:$0xff]  ;;  %v223_v20 = vld [vmem:[%s5513_s25 + $0xb0] sm:$0xff] }
  0x13   : > { %353 = vmatpush1.msra.mxu0 %v237_v8  ;;  %5166 = vmatprep.subr.mxu1 %v238_v7  ;;  %v202_v19 = vld [vmem:[%s5513_s25 + $0x8] sm:$0xff]  ;;  %v203_v21 = vld [vmem:[%s5513_s25 + $0x10] sm:$0xff]  ;;  %v224_v22 = vld [vmem:[%s5513_s25 + $0xb8] sm:$0xff] }
  0x14   : > { %354 = vmatprep.subr.mxu0 %v236_v9  ;;  %5174 = vmatpush1.msra.mxu1 %v237_v8  ;;  %v204_v23 = vld [vmem:[%s5513_s25 + $0x18] sm:$0xff]  ;;  %v225_v24 = vld [vmem:[%s5513_s25 + $0xc0] sm:$0xff]  ;;  %v226_v26 = vld [vmem:[%s5513_s25 + $0xc8] sm:$0xff] }
  0x15   : > { %355 = vmatpush1.msra.mxu0 %v235_v10  ;;  %5167 = vmatprep.subr.mxu1 %v236_v9  ;;  %v205_v25 = vld [vmem:[%s5513_s25 + $0x20] sm:$0xff]  ;;  %v206_v27 = vld [vmem:[%s5513_s25 + $0x28] sm:$0xff]  ;;  %v227_v28 = vld [vmem:[%s5513_s25 + $0xd0] sm:$0xff] }
  0x16   : > { %356 = vmatprep.subr.mxu0 %v234_v11  ;;  %5175 = vmatpush1.msra.mxu1 %v235_v10  ;;  %v207_v29 = vld [vmem:[%s5513_s25 + $0x30] sm:$0xff]  ;;  %v228_v30 = vld [vmem:[%s5513_s25 + $0xd8] sm:$0xff]  ;;  %v209_v32 = vld [vmem:[%s5513_s25 + $0x40] sm:$0xff] }
  0x17   : > { %357 = vmatpush1.msra.mxu0 %v233_v12  ;;  %5168 = vmatprep.subr.mxu1 %v234_v11  ;;  %v208_v31 = vld [vmem:[%s5513_s25 + $0x38] sm:$0xff]  ;;  %v210_v33 = vld [vmem:[%s5513_s25 + $0x48] sm:$0xff]  ;;  %v211_v34 = vld [vmem:[%s5513_s25 + $0x50] sm:$0xff] }
  0x18   : > { %358 = vmatprep.subr.mxu0 %v232_v13  ;;  %5176 = vmatpush1.msra.mxu1 %v233_v12  ;;  %v212_v35 = vld [vmem:[%s5513_s25 + $0x58] sm:$0xff]  ;;  %v213_v36 = vld [vmem:[%s5513_s25 + $0x60] sm:$0xff]  ;;  %v214_v37 = vld [vmem:[%s5513_s25 + $0x68] sm:$0xff] }
  0x19   : > { %359 = vmatpush1.msra.mxu0 %v231_v14  ;;  %5169 = vmatprep.subr.mxu1 %v232_v13  ;;  %v215_v38 = vld [vmem:[%s5513_s25 + $0x70] sm:$0xff]  ;;  %v216_v39 = vld [vmem:[%s5513_s25 + $0x78] sm:$0xff]  ;;  %v217_v40 = vld [vmem:[%s5513_s25 + $0x80] sm:$0xff] }
  0x1a   : > { %360 = vmatprep.subr.mxu0 %v230_v15  ;;  %5177 = vmatpush1.msra.mxu1 %v231_v14  ;;  %v218_v41 = vld [vmem:[%s5513_s25 + $0x88] sm:$0xff]  ;;  %v219_v42 = vld [vmem:[%s5513_s25 + $0x90] sm:$0xff]  ;;  %v220_v43 = vld [vmem:[%s5513_s25 + $0x98] sm:$0xff] }
  0x1b   : > { %361 = vmatpush1.msra.mxu0 %v229_v16  ;;  %5170 = vmatprep.subr.mxu1 %v230_v15  ;;  %v221_v44 = vld [vmem:[%s5513_s25 + $0xa0] sm:$0xff] }
  0x1c   : > { %4052 = vmatmul.mubr.msk.f32.vlgmr.msra.gmra.mxu0 %vm245_vm0, %v201_v17  ;;  %5178 = vmatpush1.msra.mxu1 %v229_v16 }
  0x1d   : > { %400 = vmatprep.mubr.f32.mxu0 %v7559_v4  ;;  %520 = vmatprep.mubr.f32.mxu1 %v7559_v4 }
  0x1e   : > { %4073 = vmatmul.mubr.msk.f32.vlgmr.msra.gmra.mxu1 %vm245_vm0, %v222_v18  ;;  %4545 = vmatprep.subr.mxu1 %v7559_v4 }
  0x1f   : > { %526 = vmatprep.mubr.f32.mxu1 %v7559_v4  ;;  %4685 = vmatprep.subr.mxu0 %v7559_v4 }
  0x20   : > { %4053 = vmatmul.mubr.msk.f32.gmra.mxu0 %vm245_vm0, %v202_v19 }
  0x21   : > { %406 = vmatprep.mubr.f32.mxu0 %v7559_v4 }
  0x22   : > { %4074 = vmatmul.mubr.msk.f32.gmra.mxu1 %vm245_vm0, %v223_v20 }
  0x23   : > { %532 = vmatprep.mubr.f32.mxu1 %v7559_v4 }
  0x24   : > { %4054 = vmatmul.mubr.msk.f32.gmra.mxu0 %vm245_vm0, %v203_v21 }
  0x25   : > { %412 = vmatprep.mubr.f32.mxu0 %v7559_v4 }
  0x26   : > { %4075 = vmatmul.mubr.msk.f32.gmra.mxu1 %vm245_vm0, %v224_v22 }
  0x27   : > { %538 = vmatprep.mubr.f32.mxu1 %v7559_v4 }
  0x28   : > { %4055 = vmatmul.mubr.msk.f32.gmra.mxu0 %vm245_vm0, %v204_v23 }
  0x29   : > { %418 = vmatprep.mubr.f32.mxu0 %v7559_v4 }
  0x2a   : > { %4076 = vmatmul.mubr.msk.f32.gmra.mxu1 %vm245_vm0, %v225_v24 }
  0x2b   : > { %544 = vmatprep.mubr.f32.mxu1 %v7559_v4 }
  0x2c   : > { %4056 = vmatmul.mubr.msk.f32.gmra.mxu0 %vm245_vm0, %v205_v25 }
  0x2d   : > { %424 = vmatprep.mubr.f32.mxu0 %v7559_v4 }
  0x2e   : > { %4077 = vmatmul.mubr.msk.f32.gmra.mxu1 %vm245_vm0, %v226_v26 }
  0x2f   : > { %550 = vmatprep.mubr.f32.mxu1 %v7559_v4 }
  0x30   : > { %4057 = vmatmul.mubr.msk.f32.gmra.mxu0 %vm245_vm0, %v206_v27 }
  0x31   : > { %430 = vmatprep.mubr.f32.mxu0 %v7559_v4 }
  0x32   : > { %4078 = vmatmul.mubr.msk.f32.gmra.mxu1 %vm245_vm0, %v227_v28 }
  0x33   : > { %556 = vmatprep.mubr.f32.mxu1 %v7559_v4 }
  0x34   : > { %4058 = vmatmul.mubr.msk.f32.gmra.mxu0 %vm245_vm0, %v207_v29 }
  0x35   : > { %436 = vmatprep.mubr.f32.mxu0 %v7559_v4 }
  0x36   : > { %4079 = vmatmul.mubr.msk.f32.gmra.mxu1 %vm245_vm0, %v228_v30 }
  0x37   : > { %4559 = vmatprep.mubr.msk.f32.mxu1 %vm5426_vm1, %v7559_v4 }
  0x38   : > { %4059 = vmatmul.mubr.msk.f32.gmra.mxu0 %vm245_vm0, %v208_v31 }
  0x39   : > { %442 = vmatprep.mubr.f32.mxu0 %v7559_v4 }
  0x3c   : > { %4060 = vmatmul.mubr.msk.f32.gmra.mxu0 %vm245_vm0, %v209_v32 }
  0x3d   : > { %448 = vmatprep.mubr.f32.mxu0 %v7559_v4 }
  0x40   : > { %4061 = vmatmul.mubr.msk.f32.gmra.mxu0 %vm245_vm0, %v210_v33 }
  0x41   : > { %454 = vmatprep.mubr.f32.mxu0 %v7559_v4 }
  0x44   : > { %4062 = vmatmul.mubr.msk.f32.gmra.mxu0 %vm245_vm0, %v211_v34 }
  0x45   : > { %460 = vmatprep.mubr.f32.mxu0 %v7559_v4 }
  0x48   : > { %4063 = vmatmul.mubr.msk.f32.gmra.mxu0 %vm245_vm0, %v212_v35 }
  0x49   : > { %466 = vmatprep.mubr.f32.mxu0 %v7559_v4 }
  0x4c   : > { %4064 = vmatmul.mubr.msk.f32.gmra.mxu0 %vm245_vm0, %v213_v36 }
  0x4d   : > { %472 = vmatprep.mubr.f32.mxu0 %v7559_v4 }
  0x50   : > { %4065 = vmatmul.mubr.msk.f32.gmra.mxu0 %vm245_vm0, %v214_v37 }
  0x51   : > { %478 = vmatprep.mubr.f32.mxu0 %v7559_v4 }
  0x54   : > { %4066 = vmatmul.mubr.msk.f32.gmra.mxu0 %vm245_vm0, %v215_v38 }
  0x55   : > { %484 = vmatprep.mubr.f32.mxu0 %v7559_v4 }
  0x58   : > { %4067 = vmatmul.mubr.msk.f32.gmra.mxu0 %vm245_vm0, %v216_v39 }
  0x59   : > { %490 = vmatprep.mubr.f32.mxu0 %v7559_v4 }
  0x5c   : > { %4068 = vmatmul.mubr.msk.f32.gmra.mxu0 %vm245_vm0, %v217_v40 }
  0x5d   : > { %496 = vmatprep.mubr.f32.mxu0 %v7559_v4 }
  0x60   : > { %4069 = vmatmul.mubr.msk.f32.gmra.mxu0 %vm245_vm0, %v218_v41 }
  0x61   : > { %502 = vmatprep.mubr.f32.mxu0 %v7559_v4 }
  0x64   : > { %4070 = vmatmul.mubr.msk.f32.gmra.mxu0 %vm245_vm0, %v219_v42 }
  0x65   : > { %508 = vmatprep.mubr.f32.mxu0 %v7559_v4 }
  0x68   : > { %4071 = vmatmul.mubr.msk.f32.gmra.mxu0 %vm245_vm0, %v220_v43 }
  0x69   : > { %514 = vmatprep.mubr.f32.mxu0 %v7559_v4 }
  0x6c   : > { %4072 = vmatmul.mubr.msk.f32.gmra.mxu0 %vm245_vm0, %v221_v44 }
  0x6d   : > { %4699 = vmatprep.mubr.msk.f32.mxu0 %vm5426_vm1, %v7559_v4 }
  0xdc   : > { %v5606_v45 = vpop.f32.mrf.mxu0 }
  0xde   : > { %v5608_v46 = vpop.f32.mrf.mxu0  ;;  %v5662_v1 = vpop.f32.mrf.mxu1 }
  0xdf   : > { %7603 = vst [vmem:[#allocation2_spill] sm:$0xff] %v5608_v46 }
  0xe0   : > { %v5610_v47 = vpop.f32.mrf.mxu0  ;;  %v5670_v5 = vpop.f32.mrf.mxu1 }
  0xe1   : > { %7615 = vst [vmem:[#allocation14_spill] sm:$0xff] %v5670_v5 }
  0xe2   : > { %v5612_v48 = vpop.f32.mrf.mxu0  ;;  %v5676_v8 = vpop.f32.mrf.mxu1 }
  0xe3   : > { %7604 = vst [vmem:[#allocation3_spill] sm:$0xff] %v5612_v48 }
  0xe4   : > { %v5614_v49 = vpop.f32.mrf.mxu0  ;;  %v5684_v11 = vpop.f32.mrf.mxu1 }
  0xe5   : > { %7618 = vst [vmem:[#allocation17_spill] sm:$0xff] %v5684_v11 }
  0xe6   : > { %v5616_v50 = vpop.f32.mrf.mxu0  ;;  %v5694_v14 = vpop.f32.mrf.mxu1 }
  0xe7   : > { %7605 = vst [vmem:[#allocation4_spill] sm:$0xff] %v5616_v50 }
  0xe8   : > { %v5618_v51 = vpop.f32.mrf.mxu0  ;;  %v5704_v17 = vpop.f32.mrf.mxu1 }
  0xe9   : > { %7622 = vst [vmem:[#allocation21_spill] sm:$0xff] %v5704_v17 }
  0xea   : > { %v5620_v52 = vpop.f32.mrf.mxu0  ;;  %v5712_v20 = vpop.f32.mrf.mxu1 }
  0xeb   : > { %7606 = vst [vmem:[#allocation5_spill] sm:$0xff] %v5620_v52  ;;  %7625 = vst [vmem:[#allocation24_spill] sm:$0xff] %v5712_v20 }
  0xec   : > { %v5622_v53 = vpop.f32.mrf.mxu0  ;;  %v5720_v23 = vpop.f32.mrf.mxu1 }
  0xed   : > { %585 = vrot.lane.b32.xlu1 %v5622_v53, %s5425_s30  ;;  %7628 = vst [vmem:[#allocation27_spill] sm:$0xff] %v5720_v23 }
  0xee   : > { %v5626_v54 = vpop.f32.mrf.mxu0  ;;  %v5726_v26 = vpop.f32.mrf.mxu1 }
  0xef   : > { %7607 = vst [vmem:[#allocation6_spill] sm:$0xff] %v5626_v54  ;;  %7631 = vst [vmem:[#allocation30_spill] sm:$0xff] %v5726_v26 }
  0xf0   : > { %v5628_v55 = vpop.f32.mrf.mxu0  ;;  %v5732_v29 = vpop.f32.mrf.mxu1 }
  0xf1   : > { %583 = vrot.lane.b32.xlu1 %v5618_v51, %s5425_s30  ;;  %7634 = vst [vmem:[#allocation33_spill] sm:$0xff] %v5732_v29 }
  0xf2   : > { %v5632_v56 = vpop.f32.mrf.mxu0  ;;  %v5740_v32 = vpop.f32.mrf.mxu1 }
  0xf3   : > { %7608 = vst [vmem:[#allocation7_spill] sm:$0xff] %v5632_v56  ;;  %7637 = vst [vmem:[#allocation36_spill] sm:$0xff] %v5740_v32 }
  0xf4   : > { %v5634_v57 = vpop.f32.mrf.mxu0  ;;  %v5748_v34 = vpop.f32.mrf.mxu1 }
  0xf5   : > { %7609 = vst [vmem:[#allocation8_spill] sm:$0xff] %v5634_v57  ;;  %579 = vrot.lane.b32.xlu1 %v5610_v47, %s5425_s30  ;;  %589 = vrot.lane.b32.xlu0 %v5634_v57, %s5425_s30  ;;  %7639 = vst [vmem:[#allocation38_spill] sm:$0xff] %v5748_v34 }
  0xf6   : > { %v5640_v58 = vpop.f32.mrf.mxu0  ;;  %v5754_v35 = vpop.f32.mrf.mxu1 }
  0xf7   : > { %7610 = vst [vmem:[#allocation9_spill] sm:$0xff] %v5640_v58  ;;  %7640 = vst [vmem:[#allocation39_spill] sm:$0xff] %v5754_v35 }
  0xf8   : > { %v5642_v59 = vpop.f32.mrf.mxu0 }
  0xf9   : > { %587 = vrot.lane.b32.xlu0 %v5628_v55, %s5425_s30 }
  0xfa   : > { %v5646_v60 = vpop.f32.mrf.mxu0 }
  0xfb   : > { %7611 = vst [vmem:[#allocation10_spill] sm:$0xff] %v5646_v60 }
  0xfc   : > { %v5648_v61 = vpop.f32.mrf.mxu0 }
  0xfd   : > { %581 = vrot.lane.b32.xlu0 %v5614_v49, %s5425_s30 }
  0xfe   : > { %v5652_v62 = vpop.f32.mrf.mxu0 }
  0xff   : > { %7612 = vst [vmem:[#allocation11_spill] sm:$0xff] %v5652_v62 }
 0x100   : > { %v5654_v63 = vpop.f32.mrf.mxu0 }
 0x101   : > { %577 = vrot.lane.b32.xlu0 %v5606_v45, %s5425_s30 }
 0x102   : > { %v5660_v0 = vpop.f32.mrf.mxu0 }
 0x103   : > { %7613 = vst [vmem:[#allocation12_spill] sm:$0xff] %v5660_v0 }
 0x104   : > { %v5666_v2 = vpop.f32.mrf.mxu0 }
 0x106   : > { %v5668_v3 = vpop.f32.mrf.mxu0 }
 0x107   : > { %7614 = vst [vmem:[#allocation13_spill] sm:$0xff] %v5668_v3 }
 0x108   : > { %v5672_v6 = vpop.f32.mrf.mxu0 }
 0x10a   : > { %v5674_v7 = vpop.f32.mrf.mxu0 }
 0x10b   : > { %7616 = vst [vmem:[#allocation15_spill] sm:$0xff] %v5674_v7 }
 0x10c   : > { %v5678_v9 = vpop.f32.mrf.mxu0 }
 0x10d   : > { %737 = vrot.lane.b32.xlu0 %v5678_v9, %s5425_s30 }
 0x10e   : > { %v5682_v10 = vpop.f32.mrf.mxu0 }
 0x10f   : > { %7617 = vst [vmem:[#allocation16_spill] sm:$0xff] %v5682_v10 }
 0x110   : > { %v5686_v12 = vpop.f32.mrf.mxu0 }
 0x111   : > { %733 = vrot.lane.b32.xlu0 %v5666_v2, %s5425_s30  ;;  %739 = vrot.lane.b32.xlu1 %v5686_v12, %s5425_s30 }
 0x112   : > { %v5692_v13 = vpop.f32.mrf.mxu0 }
 0x113   : > { %7619 = vst [vmem:[#allocation18_spill] sm:$0xff] %v5692_v13 }
 0x114   : > { %v5696_v15 = vpop.f32.mrf.mxu0 }
 0x115   : > { %7620 = vst [vmem:[#allocation19_spill] sm:$0xff] %v5696_v15  ;;  %729 = vrot.lane.b32.xlu0 %v5648_v61, %s5425_s30  ;;  %735 = vrot.lane.b32.xlu1 %v5672_v6, %s5425_s30 }
 0x116   : > { %v5702_v16 = vpop.f32.mrf.mxu0 }
 0x117   : > { %7621 = vst [vmem:[#allocation20_spill] sm:$0xff] %v5702_v16 }
 0x118   : > { %v5706_v18 = vpop.f32.mrf.mxu0 }
 0x119   : > { %7623 = vst [vmem:[#allocation22_spill] sm:$0xff] %v5706_v18  ;;  %731 = vrot.lane.b32.xlu1 %v5654_v63, %s5425_s30 }
 0x11a   : > { %v5710_v19 = vpop.f32.mrf.mxu0 }
 0x11b   : > { %7624 = vst [vmem:[#allocation23_spill] sm:$0xff] %v5710_v19 }
 0x11c   : > { %v5714_v21 = vpop.f32.mrf.mxu0 }
 0x11d   : > { %7626 = vst [vmem:[#allocation25_spill] sm:$0xff] %v5714_v21  ;;  %727 = vrot.lane.b32.xlu1 %v5642_v59, %s5425_s30 }
 0x11e   : > { %v5718_v22 = vpop.f32.mrf.mxu0 }
 0x11f   : > { %7627 = vst [vmem:[#allocation26_spill] sm:$0xff] %v5718_v22 }
 0x120   : > { %v5722_v24 = vpop.f32.mrf.mxu0 }
 0x121   : > { %7629 = vst [vmem:[#allocation28_spill] sm:$0xff] %v5722_v24 }
 0x122   : > { %v5724_v25 = vpop.f32.mrf.mxu0 }
 0x123   : > { %7630 = vst [vmem:[#allocation29_spill] sm:$0xff] %v5724_v25 }
 0x124   : > { %v5728_v27 = vpop.f32.mrf.mxu0 }
 0x125   : > { %7632 = vst [vmem:[#allocation31_spill] sm:$0xff] %v5728_v27 }
 0x126   : > { %v5730_v28 = vpop.f32.mrf.mxu0 }
 0x127   : > { %7633 = vst [vmem:[#allocation32_spill] sm:$0xff] %v5730_v28 }
 0x128   : > { %v5734_v30 = vpop.f32.mrf.mxu0 }
 0x129   : > { %7635 = vst [vmem:[#allocation34_spill] sm:$0xff] %v5734_v30  ;;  %886 = vrot.lane.b32.xlu1 %v5734_v30, %s5425_s30 }
 0x12a   : > { %v5738_v31 = vpop.f32.mrf.mxu0 }
 0x12b   : > { %7636 = vst [vmem:[#allocation35_spill] sm:$0xff] %v5738_v31 }
 0x12c   : > { %v5742_v33 = vpop.f32.mrf.mxu0 }
 0x12d   : > { %7638 = vst [vmem:[#allocation37_spill] sm:$0xff] %v5742_v33  ;;  %882 = vrot.lane.b32.xlu1 %v5722_v24, %s5425_s30  ;;  %888 = vrot.lane.b32.xlu0 %v5742_v33, %s5425_s30 }
 0x131   : > { %878 = vrot.lane.b32.xlu1 %v5706_v18, %s5425_s30  ;;  %884 = vrot.lane.b32.xlu0 %v5728_v27, %s5425_s30 }
 0x135   : > { %1037 = vrot.lane.b32.xlu1 %v5754_v35, %s5425_s30  ;;  %880 = vrot.lane.b32.xlu0 %v5714_v21, %s5425_s30 }
 0x139   : > { %1033 = vrot.lane.b32.xlu1 %v5726_v26, %s5425_s30  ;;  %876 = vrot.lane.b32.xlu0 %v5696_v15, %s5425_s30 }
 0x13d   : > { %1029 = vrot.lane.b32.xlu1 %v5694_v14, %s5425_s30  ;;  %1035 = vrot.lane.b32.xlu0 %v5740_v32, %s5425_s30 }
 0x141   : > { %1025 = vrot.lane.b32.xlu1 %v5662_v1, %s5425_s30  ;;  %1031 = vrot.lane.b32.xlu0 %v5712_v20, %s5425_s30 }
 0x145   : > { %1486 = vrot.lane.b32.xlu1 %v5628_v55, %s5427_s5  ;;  %1027 = vrot.lane.b32.xlu0 %v5676_v8, %s5425_s30 }
 0x149   : > { %1480 = vrot.lane.b32.xlu1 %v5614_v49, %s5427_s5  ;;  %1488 = vrot.lane.b32.xlu0 %v5634_v57, %s5427_s5 }
 0x14d   : > { %1476 = vrot.lane.b32.xlu1 %v5606_v45, %s5427_s5  ;;  %1484 = vrot.lane.b32.xlu0 %v5622_v53, %s5427_s5 }
 0x151   : > { %1630 = vrot.lane.b32.xlu1 %v5686_v12, %s5427_s5  ;;  %1482 = vrot.lane.b32.xlu0 %v5618_v51, %s5427_s5 }
 0x155   : > { %1626 = vrot.lane.b32.xlu1 %v5672_v6, %s5427_s5  ;;  %1478 = vrot.lane.b32.xlu0 %v5610_v47, %s5427_s5 }
 0x159   : > { %1624 = vrot.lane.b32.xlu1 %v5666_v2, %s5427_s5  ;;  %1628 = vrot.lane.b32.xlu0 %v5678_v9, %s5427_s5 }
 0x15d   : > { %1620 = vrot.lane.b32.xlu1 %v5648_v61, %s5427_s5  ;;  %1622 = vrot.lane.b32.xlu0 %v5654_v63, %s5427_s5 }
 0x15f   : > { %v586_v38 = vpop.permute.xlu1 %585 }
 0x161   : > { %1618 = vrot.lane.b32.xlu1 %v5642_v59, %s5427_s5  ;;  %1766 = vrot.lane.b32.xlu0 %v5722_v24, %s5427_s5 }
 0x163   : > { %v584_v39 = vpop.permute.xlu1 %583 }
 0x165   : > { %1770 = vrot.lane.b32.xlu1 %v5734_v30, %s5427_s5  ;;  %1764 = vrot.lane.b32.xlu0 %v5714_v21, %s5427_s5 }
 0x167   : > { %v590_v36 = vpop.permute.xlu0 %589  ;;  %v580_v41 = vpop.permute.xlu1 %579 }
 0x168   : > { %4546 = vmatpush3.xpose.msk.msra.mxu1 %vm591_vm2, %v590_v36 }
 0x169   : > { %1768 = vrot.lane.b32.xlu1 %v5728_v27, %s5427_s5  ;;  %1910 = vrot.lane.b32.xlu0 %v5726_v26, %s5427_s5 }
 0x16a   : > { %4547 = vmatprep.subr.mxu1 %v7559_v4 }
 0x16b   : > { %v588_v37 = vpop.permute.xlu0 %587 }
 0x16c   : > { %4548 = vmatpush3.xpose.msk.msra.mxu1 %vm591_vm2, %v588_v37 }
 0x16d   : > { %1762 = vrot.lane.b32.xlu1 %v5706_v18, %s5427_s5  ;;  %1908 = vrot.lane.b32.xlu0 %v5712_v20, %s5427_s5 }
 0x16e   : > { %4549 = vmatprep.subr.mxu1 %v7559_v4 }
 0x16f   : > { %v582_v40 = vpop.permute.xlu0 %581 }
 0x170   : > { %4550 = vmatpush3.xpose.msk.msra.mxu1 %vm591_vm2, %v586_v38 }
 0x171   : > { %1760 = vrot.lane.b32.xlu1 %v5696_v15, %s5427_s5  ;;  %1772 = vrot.lane.b32.xlu0 %v5742_v33, %s5427_s5 }
 0x172   : > { %4551 = vmatprep.subr.mxu1 %v7559_v4 }
 0x173   : > { %v578_v42 = vpop.permute.xlu0 %577 }
 0x174   : > { %4552 = vmatpush3.xpose.msk.msra.mxu1 %vm591_vm2, %v584_v39 }
 0x175   : > { %1914 = vrot.lane.b32.xlu1 %v5754_v35, %s5427_s5  ;;  %4553 = vmatprep.subr.mxu1 %v7559_v4 }
 0x178   : > { %4554 = vmatpush3.xpose.msk.msra.mxu1 %vm591_vm2, %v582_v40 }
 0x179   : > { %1912 = vrot.lane.b32.xlu1 %v5740_v32, %s5427_s5  ;;  %4555 = vmatprep.subr.mxu1 %v7559_v4 }
 0x17c   : > { %4556 = vmatpush3.xpose.msk.msra.mxu1 %vm591_vm2, %v580_v41 }
 0x17d   : > { %4557 = vmatprep.subr.mxu1 %v7559_v4 }
 0x17f   : > { %v738_v44 = vpop.permute.xlu0 %737 }
 0x180   : > { %4558 = vmatpush3.xpose.msk.msra.mxu1 %vm591_vm2, %v578_v42 }
 0x181   : > { %4580 = vmatprep.subr.mxu1 %v7559_v4 }
 0x183   : > { %4560 = vmatmul.mubr.msk.f32.vlgmr.msra.gmra.mxu1 %vm591_vm2, %v5606_v45  ;;  %v740_v43 = vpop.permute.xlu1 %739  ;;  %v734_v37 = vpop.permute.xlu0 %733 }
 0x184   : > { %4581 = vmatpush3.xpose.msk.msra.mxu1 %vm591_vm2, %v740_v43  ;;  %4562 = vmatprep.mubr.msk.f32.mxu1 %vm5426_vm1, %v7559_v4 }
 0x185   : > { %4582 = vmatprep.subr.mxu1 %v7559_v4 }
 0x187   : > { %4563 = vmatmul.mubr.msk.f32.gmra.mxu1 %vm591_vm2, %v5610_v47  ;;  %v736_v36 = vpop.permute.xlu1 %735  ;;  %v730_v39 = vpop.permute.xlu0 %729 }
 0x188   : > { %4583 = vmatpush3.xpose.msk.msra.mxu1 %vm591_vm2, %v738_v44  ;;  %4565 = vmatprep.mubr.msk.f32.mxu1 %vm5426_vm1, %v7559_v4 }
 0x189   : > { %4584 = vmatprep.subr.mxu1 %v7559_v4 }
 0x18b   : > { %4566 = vmatmul.mubr.msk.f32.gmra.mxu1 %vm591_vm2, %v5614_v49  ;;  %v732_v38 = vpop.permute.xlu1 %731 }
 0x18c   : > { %4585 = vmatpush3.xpose.msk.msra.mxu1 %vm591_vm2, %v736_v36  ;;  %4568 = vmatprep.mubr.msk.f32.mxu1 %vm5426_vm1, %v7559_v4 }
 0x18d   : > { %4586 = vmatprep.subr.mxu1 %v7559_v4 }
 0x18f   : > { %4569 = vmatmul.mubr.msk.f32.gmra.mxu1 %vm591_vm2, %v5618_v51  ;;  %v728_v40 = vpop.permute.xlu1 %727 }
 0x190   : > { %4587 = vmatpush3.xpose.msk.msra.mxu1 %vm591_vm2, %v734_v37  ;;  %4571 = vmatprep.mubr.msk.f32.mxu1 %vm5426_vm1, %v7559_v4 }
 0x191   : > { %4588 = vmatprep.subr.mxu1 %v7559_v4 }
 0x193   : > { %4572 = vmatmul.mubr.msk.f32.gmra.mxu1 %vm591_vm2, %v5622_v53 }
 0x194   : > { %4589 = vmatpush3.xpose.msk.msra.mxu1 %vm591_vm2, %v732_v38  ;;  %4574 = vmatprep.mubr.msk.f32.mxu1 %vm5426_vm1, %v7559_v4 }
 0x195   : > { %4590 = vmatprep.subr.mxu1 %v7559_v4 }
 0x197   : > { %4575 = vmatmul.mubr.msk.f32.gmra.mxu1 %vm591_vm2, %v5628_v55 }
 0x198   : > { %4591 = vmatpush3.xpose.msk.msra.mxu1 %vm591_vm2, %v730_v39  ;;  %4577 = vmatprep.mubr.msk.f32.mxu1 %vm5426_vm1, %v7559_v4 }
 0x199   : > { %4592 = vmatprep.subr.mxu1 %v7559_v4 }
 0x19b   : > { %4578 = vmatmul.mubr.msk.f32.gmra.mxu1 %vm591_vm2, %v5634_v57  ;;  %v887_v41 = vpop.permute.xlu1 %886 }
 0x19c   : > { %4593 = vmatpush3.xpose.msk.msra.mxu1 %vm591_vm2, %v728_v40  ;;  %4594 = vmatprep.mubr.msk.f32.mxu1 %vm5426_vm1, %v7559_v4 }
 0x19d   : > { %4615 = vmatprep.subr.mxu1 %v7559_v4 }
 0x19f   : > { %4595 = vmatmul.mubr.msk.f32.vlgmr.msra.gmra.mxu1 %vm591_vm2, %v5642_v59  ;;  %v883_v42 = vpop.permute.xlu1 %882  ;;  %v889_v43 = vpop.permute.xlu0 %888 }
 0x1a0   : > { %4616 = vmatpush3.xpose.msk.msra.mxu1 %vm591_vm2, %v889_v43  ;;  %4597 = vmatprep.mubr.msk.f32.mxu1 %vm5426_vm1, %v7559_v4 }
 0x1a1   : > { %4617 = vmatprep.subr.mxu1 %v7559_v4 }
 0x1a3   : > { %4598 = vmatmul.mubr.msk.f32.gmra.mxu1 %vm591_vm2, %v5648_v61  ;;  %v879_v44 = vpop.permute.xlu1 %878  ;;  %v885_v36 = vpop.permute.xlu0 %884 }
 0x1a4   : > { %4618 = vmatpush3.xpose.msk.msra.mxu1 %vm591_vm2, %v887_v41  ;;  %4600 = vmatprep.mubr.msk.f32.mxu1 %vm5426_vm1, %v7559_v4 }
 0x1a5   : > { %4619 = vmatprep.subr.mxu1 %v7559_v4 }
 0x1a7   : > { %4601 = vmatmul.mubr.msk.f32.gmra.mxu1 %vm591_vm2, %v5654_v63  ;;  %v1038_v37 = vpop.permute.xlu1 %1037  ;;  %v881_v38 = vpop.permute.xlu0 %880 }
 0x1a8   : > { %4620 = vmatpush3.xpose.msk.msra.mxu1 %vm591_vm2, %v885_v36  ;;  %4603 = vmatprep.mubr.msk.f32.mxu1 %vm5426_vm1, %v7559_v4 }
 0x1a9   : > { %4621 = vmatprep.subr.mxu1 %v7559_v4 }
 0x1ab   : > { %4604 = vmatmul.mubr.msk.f32.gmra.mxu1 %vm591_vm2, %v5666_v2  ;;  %v1034_v39 = vpop.permute.xlu1 %1033  ;;  %v877_v40 = vpop.permute.xlu0 %876 }
 0x1ac   : > { %4622 = vmatpush3.xpose.msk.msra.mxu1 %vm591_vm2, %v883_v42  ;;  %4606 = vmatprep.mubr.msk.f32.mxu1 %vm5426_vm1, %v7559_v4 }
 0x1ad   : > { %4623 = vmatprep.subr.mxu1 %v7559_v4 }
 0x1af   : > { %4607 = vmatmul.mubr.msk.f32.gmra.mxu1 %vm591_vm2, %v5672_v6  ;;  %v1030_v41 = vpop.permute.xlu1 %1029  ;;  %v1036_v43 = vpop.permute.xlu0 %1035 }
 0x1b0   : > { %4624 = vmatpush3.xpose.msk.msra.mxu1 %vm591_vm2, %v881_v38  ;;  %4609 = vmatprep.mubr.msk.f32.mxu1 %vm5426_vm1, %v7559_v4 }
 0x1b1   : > { %4625 = vmatprep.subr.mxu1 %v7559_v4 }
 0x1b3   : > { %4610 = vmatmul.mubr.msk.f32.gmra.mxu1 %vm591_vm2, %v5678_v9  ;;  %v1026_v42 = vpop.permute.xlu1 %1025  ;;  %v1032_v36 = vpop.permute.xlu0 %1031 }
 0x1b4   : > { %4626 = vmatpush3.xpose.msk.msra.mxu1 %vm591_vm2, %v879_v44  ;;  %4612 = vmatprep.mubr.msk.f32.mxu1 %vm5426_vm1, %v7559_v4 }
 0x1b5   : > { %4627 = vmatprep.subr.mxu1 %v7559_v4 }
 0x1b7   : > { %4613 = vmatmul.mubr.msk.f32.gmra.mxu1 %vm591_vm2, %v5686_v12  ;;  %v1028_v38 = vpop.permute.xlu0 %1027  ;;  %v1487_v5 = vpop.permute.xlu1 %1486 }
 0x1b8   : > { %4628 = vmatpush3.xpose.msk.msra.mxu1 %vm591_vm2, %v877_v40  ;;  %4629 = vmatprep.mubr.msk.f32.mxu1 %vm5426_vm1, %v7559_v4 }
 0x1b9   : > { %4650 = vmatprep.subr.mxu1 %v7559_v4 }
 0x1bb   : > { %4630 = vmatmul.mubr.msk.f32.vlgmr.msra.gmra.mxu1 %vm591_vm2, %v5696_v15  ;;  %v1489_v44 = vpop.permute.xlu0 %1488  ;;  %v1481_v40 = vpop.permute.xlu1 %1480 }
 0x1bc   : > { %4651 = vmatpush3.xpose.msk.msra.mxu1 %vm591_vm2, %v1038_v37  ;;  %4686 = vmatpush3.msra.mxu0 %v1489_v44 }
 0x1bd   : > { %4687 = vmatprep.subr.mxu0 %v7559_v4  ;;  %4632 = vmatprep.mubr.msk.f32.mxu1 %vm5426_vm1, %v7559_v4 }
 0x1be   : > { %4688 = vmatpush3.msra.mxu0 %v1487_v5  ;;  %4652 = vmatprep.subr.mxu1 %v7559_v4 }
 0x1bf   : > { %4633 = vmatmul.mubr.msk.f32.gmra.mxu1 %vm591_vm2, %v5706_v18  ;;  %4689 = vmatprep.subr.mxu0 %v7559_v4  ;;  %v1485_v11 = vpop.permute.xlu0 %1484  ;;  %v1477_v37 = vpop.permute.xlu1 %1476 }
 0x1c0   : > { %4653 = vmatpush3.xpose.msk.msra.mxu1 %vm591_vm2, %v1036_v43  ;;  %4690 = vmatpush3.msra.mxu0 %v1485_v11 }
 0x1c1   : > { %4635 = vmatprep.mubr.msk.f32.mxu1 %vm5426_vm1, %v7559_v4  ;;  %4654 = vmatprep.subr.mxu1 %v7559_v4 }
 0x1c2   : > { %4691 = vmatprep.subr.mxu0 %v7559_v4 }
 0x1c3   : > { %4636 = vmatmul.mubr.msk.f32.gmra.mxu1 %vm591_vm2, %v5714_v21  ;;  %v1483_v5 = vpop.permute.xlu0 %1482 }
 0x1c4   : > { %4655 = vmatpush3.xpose.msk.msra.mxu1 %vm591_vm2, %v1034_v39  ;;  %4692 = vmatpush3.msra.mxu0 %v1483_v5  ;;  %v1631_v39 = vpop.permute.xlu1 %1630  ;;  %v6011_v5 = vld [vmem:[%s7555_s3] sm:$0xff] }
 0x1c5   : > { %4693 = vmatprep.subr.mxu0 %v7559_v4  ;;  %4638 = vmatprep.mubr.msk.f32.mxu1 %vm5426_vm1, %v7559_v4 }
 0x1c6   : > { %4694 = vmatpush3.msra.mxu0 %v1481_v40  ;;  %4656 = vmatprep.subr.mxu1 %v7559_v4  ;;  %v6006_v40 = vpop.f32.mrf.mxu1 }
 0x1c7   : > { %4639 = vmatmul.mubr.msk.f32.gmra.mxu1 %vm591_vm2, %v5722_v24  ;;  %4695 = vmatprep.subr.mxu0 %v7559_v4  ;;  %v1479_v11 = vpop.permute.xlu0 %1478  ;;  %7641 = vst [vmem:[#allocation40_spill] sm:$0xff] %v6006_v40 }
 0x1c8   : > { %4657 = vmatpush3.xpose.msk.msra.mxu1 %vm591_vm2, %v1032_v36  ;;  %4696 = vmatpush3.msra.mxu0 %v1479_v11  ;;  %v1627_v43 = vpop.permute.xlu1 %1626 }
 0x1c9   : > { %4697 = vmatprep.subr.mxu0 %v7559_v4  ;;  %4641 = vmatprep.mubr.msk.f32.mxu1 %vm5426_vm1, %v7559_v4 }
 0x1ca   : > { %4698 = vmatpush3.msra.mxu0 %v1477_v37  ;;  %4658 = vmatprep.subr.mxu1 %v7559_v4 }
 0x1cb   : > { %4642 = vmatmul.mubr.msk.f32.gmra.mxu1 %vm591_vm2, %v5728_v27  ;;  %4755 = vmatprep.subr.mxu0 %v7559_v4  ;;  %v1629_v36 = vpop.permute.xlu0 %1628 }
 0x1cc   : > { %4659 = vmatpush3.xpose.msk.msra.mxu1 %vm591_vm2, %v1030_v41  ;;  %4644 = vmatprep.mubr.msk.f32.mxu1 %vm5426_vm1, %v7559_v4  ;;  %v1625_v41 = vpop.permute.xlu1 %1624 }
 0x1cd   : > { %4660 = vmatprep.subr.mxu1 %v7559_v4 }
 0x1cf   : > { %4645 = vmatmul.mubr.msk.f32.gmra.mxu1 %vm591_vm2, %v5734_v30 }
 0x1d0   : > { %4661 = vmatpush3.xpose.msk.msra.mxu1 %vm591_vm2, %v1028_v38  ;;  %4647 = vmatprep.mubr.msk.f32.mxu1 %vm5426_vm1, %v7559_v4  ;;  %v1623_v38 = vpop.permute.xlu0 %1622 }
 0x1d1   : > { %4662 = vmatprep.subr.mxu1 %v7559_v4 }
 0x1d3   : > { %4648 = vmatmul.mubr.msk.f32.gmra.mxu1 %vm591_vm2, %v5742_v33 }
 0x1d4   : > { %4663 = vmatpush3.xpose.msk.msra.mxu1 %vm591_vm2, %v1026_v42  ;;  %4664 = vmatprep.mubr.msk.f32.mxu1 %vm5426_vm1, %v7559_v4  ;;  %v1621_v42 = vpop.permute.xlu1 %1620 }
 0x1d5   : > { %4720 = vmatprep.subr.mxu1 %v7559_v4 }
 0x1d7   : > { %4665 = vmatmul.mubr.msk.f32.vlgmr.msra.gmra.mxu1 %vm591_vm2, %v5662_v1 }
 0x1d8   : > { %4721 = vmatpush3.msra.mxu1 %v1631_v39  ;;  %4667 = vmatprep.mubr.msk.f32.mxu1 %vm5426_vm1, %v7559_v4  ;;  %v1619_v44 = vpop.permute.xlu1 %1618 }
 0x1d9   : > { %4722 = vmatprep.subr.mxu1 %v7559_v4 }
 0x1da   : > { %4723 = vmatpush3.msra.mxu1 %v1629_v36 }
 0x1db   : > { %4668 = vmatmul.mubr.msk.f32.gmra.mxu1 %vm591_vm2, %v5676_v8  ;;  %4724 = vmatprep.subr.mxu1 %v7559_v4 }
 0x1dc   : > { %4725 = vmatpush3.msra.mxu1 %v1627_v43  ;;  %4670 = vmatprep.mubr.msk.f32.mxu1 %vm5426_vm1, %v7559_v4  ;;  %v6019_v43 = vld [vmem:[%s7555_s3 + $0x8] sm:$0xff] }
 0x1dd   : > { %4726 = vmatprep.subr.mxu1 %v7559_v4 }
 0x1de   : > { %4727 = vmatpush3.msra.mxu1 %v1625_v41 }
 0x1df   : > { %4671 = vmatmul.mubr.msk.f32.gmra.mxu1 %vm591_vm2, %v5694_v14  ;;  %4728 = vmatprep.subr.mxu1 %v7559_v4 }
 0x1e0   : > { %4729 = vmatpush3.msra.mxu1 %v1623_v38  ;;  %4673 = vmatprep.mubr.msk.f32.mxu1 %vm5426_vm1, %v7559_v4 }
 0x1e1   : > { %4730 = vmatprep.subr.mxu1 %v7559_v4 }
 0x1e2   : > { %4731 = vmatpush3.msra.mxu1 %v1621_v42 }
 0x1e3   : > { %4674 = vmatmul.mubr.msk.f32.gmra.mxu1 %vm591_vm2, %v5712_v20  ;;  %4732 = vmatprep.subr.mxu1 %v7559_v4 }
 0x1e4   : > { %4733 = vmatpush3.msra.mxu1 %v1619_v44  ;;  %4676 = vmatprep.mubr.msk.f32.mxu1 %vm5426_vm1, %v7559_v4  ;;  %v6029_v44 = vld [vmem:[%s7555_s3 + $0x10] sm:$0xff] }
 0x1e5   : > { %4790 = vmatprep.subr.mxu1 %v7559_v4 }
 0x1e7   : > { %4677 = vmatmul.mubr.msk.f32.gmra.mxu1 %vm591_vm2, %v5726_v26 }
 0x1e8   : > { %4679 = vmatprep.mubr.msk.f32.mxu1 %vm5426_vm1, %v7559_v4 }
 0x1eb   : > { %4680 = vmatmul.mubr.msk.f32.gmra.mxu1 %vm591_vm2, %v5740_v32 }
 0x1ec   : > { %4682 = vmatprep.mubr.msk.f32.mxu1 %vm5426_vm1, %v7559_v4 }
 0x1ef   : > { %4683 = vmatmul.mubr.msk.f32.gmra.mxu1 %vm591_vm2, %v5754_v35 }
 0x1f0   : > { %4734 = vmatprep.mubr.msk.f32.mxu1 %vm5426_vm1, %v7559_v4 }
 0x243   : > { %v686_v37 = vpop.f32.mrf.mxu1 }
 0x244   : > { %v6014_v11 = vadd.f32 %v686_v37, %v6011_v5 }
 0x245   : > { %v4561_v39 = vpop.f32.mrf.mxu1 }
 0x246   : > { %v1168_v41 = vsel %vm1167_vm3, %v6014_v11, -inf }
 0x247   : > { %v691_v36 = vpop.f32.mrf.mxu1  ;;  %1169 = vmax.xlane.f32.xlu0 %v1168_v41  ;;  %v6039_v41 = vld [vmem:[%s7555_s3 + $0x18] sm:$0xff] }
 0x248   : > { %v6024_v42 = vadd.f32 %v691_v36, %v6019_v43 }
 0x249   : > { %v4564_v38 = vpop.f32.mrf.mxu1 }
 0x24a   : > { %v1171_v37 = vsel %vm1167_vm3, %v6024_v42, -inf }
 0x24b   : > { %v696_v39 = vpop.f32.mrf.mxu1  ;;  %1172 = vmax.xlane.f32.xlu1 %v1171_v37  ;;  %v6049_v37 = vld [vmem:[%s7555_s3 + $0x20] sm:$0xff] }
 0x24c   : > { %v6034_v4 = vadd.f32 %v696_v39, %v6029_v44 }
 0x24d   : > { %v4567_v17 = vpop.f32.mrf.mxu1 }
 0x24e   : > { %v1174_v36 = vsel %vm1167_vm3, %v6034_v4, -inf }
 0x24f   : > { %v701_v38 = vpop.f32.mrf.mxu1  ;;  %1175 = vmax.xlane.f32.xlu0 %v1174_v36  ;;  %v6059_v36 = vld [vmem:[%s7555_s3 + $0x28] sm:$0xff] }
 0x250   : > { %v6044_v23 = vadd.f32 %v701_v38, %v6039_v41 }
 0x251   : > { %v4570_v29 = vpop.f32.mrf.mxu1 }
 0x252   : > { %v1177_v17 = vsel %vm1167_vm3, %v6044_v23, -inf }
 0x253   : > { %v706_v39 = vpop.f32.mrf.mxu1  ;;  %1178 = vmax.xlane.f32.xlu0 %v1177_v17  ;;  %v6069_v17 = vld [vmem:[%s7555_s3 + $0x30] sm:$0xff] }
 0x254   : > { %v6054_v40 = vadd.f32 %v706_v39, %v6049_v37 }
 0x255   : > { %v4573_v19 = vpop.f32.mrf.mxu1 }
 0x256   : > { %v1180_v29 = vsel %vm1167_vm3, %v6054_v40, -inf }
 0x257   : > { %v711_v38 = vpop.f32.mrf.mxu1  ;;  %1181 = vmax.xlane.f32.xlu0 %v1180_v29 }
 0x258   : > { %v6064_v25 = vadd.f32 %v711_v38, %v6059_v36 }
 0x259   : > { %v4576_v31 = vpop.f32.mrf.mxu1 }
 0x25a   : > { %v1183_v19 = vsel %vm1167_vm3, %v6064_v25, -inf }
 0x25b   : > { %v716_v39 = vpop.f32.mrf.mxu1  ;;  %1184 = vmax.xlane.f32.xlu0 %v1183_v19 }
 0x25c   : > { %v6074_v60 = vadd.f32 %v716_v39, %v6069_v17 }
 0x25d   : > { %v4579_v34 = vpop.f32.mrf.mxu1 }
 0x25e   : > { %v1186_v29 = vsel %vm1167_vm3, %v6074_v60, -inf }
 0x25f   : > { %v835_v38 = vpop.f32.mrf.mxu1  ;;  %1187 = vmax.xlane.f32.xlu0 %v1186_v29 }
 0x260   : > { %v6079_v31 = vadd.f32 %v835_v38, %v6011_v5 }
 0x261   : > { %v4596_v0 = vpop.f32.mrf.mxu1 }
 0x262   : > { %v1189_v16 = vsel %vm1167_vm3, %v6079_v31, -inf }
 0x263   : > { %v840_v10 = vpop.f32.mrf.mxu1  ;;  %1190 = vmax.xlane.f32.xlu1 %v1189_v16 }
 0x264   : > { %v6084_v19 = vadd.f32 %v840_v10, %v6019_v43 }
 0x265   : > { %v4599_v39 = vpop.f32.mrf.mxu1 }
 0x266   : > { %v1192_v34 = vsel %vm1167_vm3, %v6084_v19, -inf }
 0x267   : > { %v845_v22 = vpop.f32.mrf.mxu1  ;;  %1193 = vmax.xlane.f32.xlu1 %v1192_v34 }
 0x268   : > { %v6089_v29 = vadd.f32 %v845_v22, %v6029_v44 }
 0x269   : > { %v4602_v38 = vpop.f32.mrf.mxu1 }
 0x26a   : > { %v1195_v0 = vsel %vm1167_vm3, %v6089_v29, -inf }
 0x26b   : > { %v850_v48 = vpop.f32.mrf.mxu1  ;;  %1196 = vmax.xlane.f32.xlu1 %v1195_v0 }
 0x26c   : > { %v6094_v16 = vadd.f32 %v850_v48, %v6039_v41 }
 0x26d   : > { %v4605_v10 = vpop.f32.mrf.mxu1 }
 0x26e   : > { %v1198_v39 = vsel %vm1167_vm3, %v6094_v16, -inf }
 0x26f   : > { %v855_v28 = vpop.f32.mrf.mxu1  ;;  %1199 = vmax.xlane.f32.xlu1 %v1198_v39 }
 0x270   : > { %v6099_v34 = vadd.f32 %v855_v28, %v6049_v37 }
 0x271   : > { %v4608_v22 = vpop.f32.mrf.mxu1 }
 0x272   : > { %v1201_v38 = vsel %vm1167_vm3, %v6099_v34, -inf }
 0x273   : > { %v860_v52 = vpop.f32.mrf.mxu1  ;;  %1202 = vmax.xlane.f32.xlu1 %v1201_v38 }
 0x274   : > { %v6104_v0 = vadd.f32 %v860_v52, %v6059_v36 }
 0x275   : > { %v4611_v48 = vpop.f32.mrf.mxu1 }
 0x276   : > { %v1204_v10 = vsel %vm1167_vm3, %v6104_v0, -inf }
 0x277   : > { %v865_v62 = vpop.f32.mrf.mxu1  ;;  %1205 = vmax.xlane.f32.xlu1 %v1204_v10 }
 0x278   : > { %v6109_v39 = vadd.f32 %v865_v62, %v6069_v17 }
 0x279   : > { %v4614_v28 = vpop.f32.mrf.mxu1 }
 0x27a   : > { %v1207_v22 = vsel %vm1167_vm3, %v6109_v39, -inf }
 0x27b   : > { %1208 = vmax.xlane.f32.xlu1 %v1207_v22  ;;  %v984_v54 = vpop.f32.mrf.mxu1 }
 0x27c   : > { %v6114_v38 = vadd.f32 %v984_v54, %v6011_v5 }
 0x27d   : > { %v4631_v52 = vpop.f32.mrf.mxu1 }
 0x27e   : > { %v1210_v48 = vsel %vm1167_vm3, %v6114_v38, -inf }
 0x27f   : > { %1211 = vmax.xlane.f32.xlu0 %v1210_v48  ;;  %v989_v3 = vpop.f32.mrf.mxu1 }
 0x280   : > { %v6119_v10 = vadd.f32 %v989_v3, %v6019_v43 }
 0x281   : > { %v4634_v62 = vpop.f32.mrf.mxu1 }
 0x282   : > { %v1213_v28 = vsel %vm1167_vm3, %v6119_v10, -inf }
 0x283   : > { %1214 = vmax.xlane.f32.xlu0 %v1213_v28  ;;  %v994_v35 = vpop.f32.mrf.mxu1 }
 0x284   : > { %v6124_v22 = vadd.f32 %v994_v35, %v6029_v44 }
 0x285   : > { %v4637_v54 = vpop.f32.mrf.mxu1 }
 0x286   : > { %v1216_v52 = vsel %vm1167_vm3, %v6124_v22, -inf }
 0x287   : > { %1217 = vmax.xlane.f32.xlu0 %v1216_v52  ;;  %v999_v7 = vpop.f32.mrf.mxu1 }
 0x288   : > { %v6129_v48 = vadd.f32 %v999_v7, %v6039_v41 }
 0x289   : > { %v4640_v3 = vpop.f32.mrf.mxu1 }
 0x28a   : > { %v1219_v62 = vsel %vm1167_vm3, %v6129_v48, -inf }
 0x28b   : > { %1220 = vmax.xlane.f32.xlu0 %v1219_v62  ;;  %v1004_v58 = vpop.f32.mrf.mxu1 }
 0x28c   : > { %v6134_v28 = vadd.f32 %v1004_v58, %v6049_v37 }
 0x28d   : > { %v4643_v35 = vpop.f32.mrf.mxu1 }
 0x28e   : > { %v1222_v54 = vsel %vm1167_vm3, %v6134_v28, -inf }
 0x28f   : > { %1223 = vmax.xlane.f32.xlu0 %v1222_v54  ;;  %v1009_v26 = vpop.f32.mrf.mxu1 }
 0x290   : > { %v6139_v52 = vadd.f32 %v1009_v26, %v6059_v36 }
 0x291   : > { %v4646_v7 = vpop.f32.mrf.mxu1 }
 0x292   : > { %v1225_v3 = vsel %vm1167_vm3, %v6139_v52, -inf }
 0x293   : > { %1226 = vmax.xlane.f32.xlu0 %v1225_v3  ;;  %v1014_v13 = vpop.f32.mrf.mxu1 }
 0x294   : > { %v6144_v62 = vadd.f32 %v1014_v13, %v6069_v17 }
 0x295   : > { %v4649_v58 = vpop.f32.mrf.mxu1 }
 0x296   : > { %v1228_v35 = vsel %vm1167_vm3, %v6144_v62, -inf }
 0x297   : > { %1229 = vmax.xlane.f32.xlu0 %v1228_v35  ;;  %v1133_v33 = vpop.f32.mrf.mxu1 }
 0x298   : > { %v6149_v54 = vadd.f32 %v1133_v33, %v6011_v5 }
 0x299   : > { %v4666_v26 = vpop.f32.mrf.mxu1 }
 0x29a   : > { %v1231_v7 = vsel %vm1167_vm3, %v6149_v54, -inf }
 0x29b   : > { %1232 = vmax.xlane.f32.xlu1 %v1231_v7  ;;  %v1138_v46 = vpop.f32.mrf.mxu1 }
 0x29c   : > { %v6154_v3 = vadd.f32 %v1138_v46, %v6019_v43 }
 0x29d   : > { %v4669_v13 = vpop.f32.mrf.mxu1 }
 0x29e   : > { %v1234_v58 = vsel %vm1167_vm3, %v6154_v3, -inf }
 0x29f   : > { %1235 = vmax.xlane.f32.xlu1 %v1234_v58  ;;  %v1143_v30 = vpop.f32.mrf.mxu1 }
 0x2a0   : > { %v6159_v35 = vadd.f32 %v1143_v30, %v6029_v44 }
 0x2a1   : > { %v4672_v33 = vpop.f32.mrf.mxu1 }
 0x2a2   : > { %v1237_v5 = vsel %vm1167_vm3, %v6159_v35, -inf }
 0x2a3   : > { %1238 = vmax.xlane.f32.xlu1 %v1237_v5  ;;  %v1148_v26 = vpop.f32.mrf.mxu1 }
 0x2a4   : > { %v6164_v7 = vadd.f32 %v1148_v26, %v6039_v41 }
 0x2a5   : > { %v4675_v46 = vpop.f32.mrf.mxu1 }
 0x2a6   : > { %v1240_v43 = vsel %vm1167_vm3, %v6164_v7, -inf }
 0x2a7   : > { %1241 = vmax.xlane.f32.xlu1 %v1240_v43  ;;  %v1153_v13 = vpop.f32.mrf.mxu1 }
 0x2a8   : > { %v6169_v58 = vadd.f32 %v1153_v13, %v6049_v37  ;;  %v6181_v13 = vpop.permute.xlu1 %1770 }
 0x2a9   : > { %v4678_v30 = vpop.f32.mrf.mxu1 }
 0x2aa   : > { %v1243_v44 = vsel %vm1167_vm3, %v6169_v58, -inf }
 0x2ab   : > { %1244 = vmax.xlane.f32.xlu0 %v1243_v44  ;;  %v1158_v33 = vpop.f32.mrf.mxu1  ;;  %v6185_v44 = vpop.permute.xlu0 %1766 }
 0x2ac   : > { %v6174_v5 = vadd.f32 %v1158_v33, %v6059_v36  ;;  %v6187_v36 = vpop.permute.xlu1 %1768 }
 0x2ad   : > { %v4681_v41 = vpop.f32.mrf.mxu1 }
 0x2ae   : > { %v1246_v26 = vsel %vm1167_vm3, %v6174_v5, -inf }
 0x2af   : > { %1247 = vmax.xlane.f32.xlu1 %v1246_v26  ;;  %v1163_v46 = vpop.f32.mrf.mxu1  ;;  %v6189_v33 = vpop.permute.xlu0 %1764 }
 0x2b0   : > { %v6179_v43 = vadd.f32 %v1163_v46, %v6069_v17  ;;  %v6191_v41 = vpop.permute.xlu1 %1762 }
 0x2b1   : > { %v4684_v37 = vpop.f32.mrf.mxu1 }
 0x2b2   : > { %v1249_v30 = vsel %vm1167_vm3, %v6179_v43, -inf }
 0x2b3   : > { %1250 = vmax.xlane.f32.xlu0 %v1249_v30  ;;  %v6193_v26 = vpop.permute.xlu0 %1910 }
 0x2b4   : > { %7642 = vst [vmem:[#allocation41_spill] sm:$0xff] %v6193_v26  ;;  %v6195_v50 = vpop.permute.xlu1 %1760 }
 0x2b7   : > { %v6197_v17 = vpop.permute.xlu0 %1908 }
 0x2b8   : > { %7643 = vst [vmem:[#allocation42_spill] sm:$0xff] %v6197_v17  ;;  %v6199_v46 = vpop.permute.xlu1 %1914 }
 0x2b9   : > { %7644 = vst [vmem:[#allocation43_spill] sm:$0xff] %v6199_v46 }
 0x2bb   : > { %v6201_v37 = vpop.permute.xlu0 %1772 }
 0x2bc   : > { %v6203_v27 = vpop.permute.xlu1 %1912 }
 0x2bd   : > { %7645 = vst [vmem:[#allocation44_spill] sm:$0xff] %v6203_v27 }
 0x2d0   : > { %v1170_v30 = vpop.xlane.xlu0 %1169 }
 0x2d1   : > { %v1252_v56 = vsub.f32 %v6014_v11, %v1170_v30 }
 0x2d3   : > { %v1280_v24 = vmul.f32 1.442695, %v1252_v56 }
 0x2d4   : > { %v1173_v32 = vpop.xlane.xlu1 %1172 }
 0x2d5   : > { %5192 = vpow2.f32 %v1280_v24  ;;  %v1253_v21 = vsub.f32 %v6024_v42, %v1173_v32 }
 0x2d7   : > { %v1282_v20 = vmul.f32 1.442695, %v1253_v21 }
 0x2d8   : > { %v1176_v18 = vpop.xlane.xlu0 %1175 }
 0x2d9   : > { %5194 = vpow2.f32 %v1282_v20  ;;  %v1254_v26 = vsub.f32 %v6034_v4, %v1176_v18 }
 0x2db   : > { %v1284_v17 = vmul.f32 1.442695, %v1254_v26 }
 0x2dc   : > { %v1179_v15 = vpop.xlane.xlu0 %1178 }
 0x2dd   : > { %5196 = vpow2.f32 %v1284_v17  ;;  %v1255_v46 = vsub.f32 %v6044_v23, %v1179_v15 }
 0x2df   : > { %v1286_v57 = vmul.f32 1.442695, %v1255_v46 }
 0x2e0   : > { %v1182_v27 = vpop.xlane.xlu0 %1181 }
 0x2e1   : > { %5198 = vpow2.f32 %v1286_v57  ;;  %v1256_v11 = vsub.f32 %v6054_v40, %v1182_v27 }
 0x2e2   : > { %v6210_v56 = vpop.eup %5192 }
 0x2e3   : > { %v1288_v24 = vmul.f32 1.442695, %v1256_v11  ;;  %v1336_v21 = vsel %vm1167_vm3, %v6210_v56, 0.0 }
 0x2e4   : > { %1337 = vadd.xlane.f32.xlu1 %v1336_v21  ;;  %v1185_v20 = vpop.xlane.xlu0 %1184 }
 0x2e5   : > { %5200 = vpow2.f32 %v1288_v24  ;;  %v1257_v4 = vsub.f32 %v6064_v25, %v1185_v20 }
 0x2e6   : > { %v6215_v18 = vpop.eup %5194 }
 0x2e7   : > { %v1290_v32 = vmul.f32 1.442695, %v1257_v4  ;;  %v1339_v15 = vsel %vm1167_vm3, %v6215_v18, 0.0 }
 0x2e8   : > { %1340 = vadd.xlane.f32.xlu0 %v1339_v15  ;;  %v1188_v57 = vpop.xlane.xlu0 %1187 }
 0x2e9   : > { %5202 = vpow2.f32 %v1290_v32  ;;  %v1258_v23 = vsub.f32 %v6074_v60, %v1188_v57 }
 0x2ea   : > { %v6220_v27 = vpop.eup %5196 }
 0x2eb   : > { %v1292_v40 = vmul.f32 1.442695, %v1258_v23  ;;  %v1342_v42 = vsel %vm1167_vm3, %v6220_v27, 0.0 }
 0x2ec   : > { %v1191_v26 = vpop.xlane.xlu1 %1190  ;;  %1343 = vadd.xlane.f32.xlu1 %v1342_v42 }
 0x2ed   : > { %5204 = vpow2.f32 %v1292_v40  ;;  %v1259_v25 = vsub.f32 %v6079_v31, %v1191_v26 }
 0x2ee   : > { %v6225_v17 = vpop.eup %5198 }
 0x2ef   : > { %v1294_v46 = vmul.f32 1.442695, %v1259_v25  ;;  %v1345_v30 = vsel %vm1167_vm3, %v6225_v17, 0.0 }
 0x2f0   : > { %v1194_v11 = vpop.xlane.xlu1 %1193  ;;  %1346 = vadd.xlane.f32.xlu0 %v1345_v30 }
 0x2f1   : > { %5206 = vpow2.f32 %v1294_v46  ;;  %v1260_v60 = vsub.f32 %v6084_v19, %v1194_v11 }
 0x2f2   : > { %v6230_v24 = vpop.eup %5200 }
 0x2f3   : > { %v1296_v21 = vmul.f32 1.442695, %v1260_v60  ;;  %v1348_v20 = vsel %vm1167_vm3, %v6230_v24, 0.0 }
 0x2f4   : > { %v1197_v4 = vpop.xlane.xlu1 %1196  ;;  %1349 = vadd.xlane.f32.xlu1 %v1348_v20 }
 0x2f5   : > { %5208 = vpow2.f32 %v1296_v21  ;;  %v1261_v31 = vsub.f32 %v6089_v29, %v1197_v4 }
 0x2f6   : > { %v6235_v32 = vpop.eup %5202 }
 0x2f7   : > { %v1298_v15 = vmul.f32 1.442695, %v1261_v31  ;;  %v1351_v57 = vsel %vm1167_vm3, %v6235_v32, 0.0 }
 0x2f8   : > { %v1200_v23 = vpop.xlane.xlu1 %1199  ;;  %1352 = vadd.xlane.f32.xlu0 %v1351_v57 }
 0x2f9   : > { %5210 = vpow2.f32 %v1298_v15  ;;  %v1262_v19 = vsub.f32 %v6094_v16, %v1200_v23 }
 0x2fa   : > { %v6240_v40 = vpop.eup %5204 }
 0x2fb   : > { %v1300_v42 = vmul.f32 1.442695, %v1262_v19  ;;  %v1354_v26 = vsel %vm1167_vm3, %v6240_v40, 0.0 }
 0x2fc   : > { %v1203_v25 = vpop.xlane.xlu1 %1202  ;;  %1355 = vadd.xlane.f32.xlu0 %v1354_v26 }
 0x2fd   : > { %5212 = vpow2.f32 %v1300_v42  ;;  %v1263_v29 = vsub.f32 %v6099_v34, %v1203_v25 }
 0x2fe   : > { %v6245_v46 = vpop.eup %5206 }
 0x2ff   : > { %v1302_v30 = vmul.f32 1.442695, %v1263_v29  ;;  %v1357_v11 = vsel %vm1167_vm3, %v6245_v46, 0.0 }
 0x300   : > { %v1206_v60 = vpop.xlane.xlu1 %1205  ;;  %1358 = vadd.xlane.f32.xlu1 %v1357_v11 }
 0x301   : > { %5214 = vpow2.f32 %v1302_v30  ;;  %v1264_v16 = vsub.f32 %v6104_v0, %v1206_v60 }
 0x302   : > { %v6250_v21 = vpop.eup %5208 }
 0x303   : > { %v1304_v20 = vmul.f32 1.442695, %v1264_v16  ;;  %v1360_v4 = vsel %vm1167_vm3, %v6250_v21, 0.0 }
 0x304   : > { %v1209_v31 = vpop.xlane.xlu1 %1208  ;;  %1361 = vadd.xlane.f32.xlu1 %v1360_v4 }
 0x305   : > { %5216 = vpow2.f32 %v1304_v20  ;;  %v1265_v34 = vsub.f32 %v6109_v39, %v1209_v31 }
 0x306   : > { %v6255_v15 = vpop.eup %5210 }
 0x307   : > { %v1306_v57 = vmul.f32 1.442695, %v1265_v34  ;;  %v1363_v23 = vsel %vm1167_vm3, %v6255_v15, 0.0 }
 0x308   : > { %1364 = vadd.xlane.f32.xlu1 %v1363_v23  ;;  %v1212_v19 = vpop.xlane.xlu0 %1211 }
 0x309   : > { %5218 = vpow2.f32 %v1306_v57  ;;  %v1266_v0 = vsub.f32 %v6114_v38, %v1212_v19 }
 0x30a   : > { %v6260_v42 = vpop.eup %5212 }
 0x30b   : > { %7646 = vst [vmem:[#allocation45_spill] sm:$0xff] %v6260_v42  ;;  %v1308_v26 = vmul.f32 1.442695, %v1266_v0  ;;  %v1366_v25 = vsel %vm1167_vm3, %v6260_v42, 0.0 }
 0x30c   : > { %1367 = vadd.xlane.f32.xlu1 %v1366_v25  ;;  %v1215_v4 = vpop.xlane.xlu0 %1214 }
 0x30d   : > { %5220 = vpow2.f32 %v1308_v26  ;;  %v1267_v26 = vsub.f32 %v6119_v10, %v1215_v4 }
 0x30e   : > { %v6264_v39 = vpop.eup %5214 }
 0x30f   : > { %7647 = vst [vmem:[#allocation46_spill] sm:$0xff] %v6264_v39  ;;  %v1369_v29 = vsel %vm1167_vm3, %v6264_v39, 0.0 }
 0x310   : > { %1370 = vadd.xlane.f32.xlu1 %v1369_v29  ;;  %v1218_v31 = vpop.xlane.xlu0 %1217 }
 0x312   : > { %v6268_v30 = vpop.eup %5216 }
 0x313   : > { %7648 = vst [vmem:[#allocation47_spill] sm:$0xff] %v6268_v30  ;;  %v1372_v11 = vsel %vm1167_vm3, %v6268_v30, 0.0 }
 0x314   : > { %1373 = vadd.xlane.f32.xlu0 %v1372_v11  ;;  %v1221_v34 = vpop.xlane.xlu0 %1220 }
 0x315   : > { %v1269_v0 = vsub.f32 %v6129_v48, %v1221_v34 }
 0x316   : > { %v6272_v38 = vpop.eup %5218 }
 0x317   : > { %7649 = vst [vmem:[#allocation48_spill] sm:$0xff] %v6272_v38  ;;  %v1375_v60 = vsel %vm1167_vm3, %v6272_v38, 0.0  ;;  %v1314_v29 = vmul.f32 1.442695, %v1269_v0 }
 0x318   : > { %1376 = vadd.xlane.f32.xlu1 %v1375_v60  ;;  %v1224_v57 = vpop.xlane.xlu0 %1223 }
 0x319   : > { %v1270_v11 = vsub.f32 %v6134_v28, %v1224_v57  ;;  %5222 = vpow2.f32 %v1314_v29 }
 0x31a   : > { %v6276_v16 = vpop.eup %5220 }
 0x31b   : > { %7650 = vst [vmem:[#allocation49_spill] sm:$0xff] %v6276_v16  ;;  %v1378_v20 = vsel %vm1167_vm3, %v6276_v16, 0.0  ;;  %v1268_v16 = vsub.f32 %v6124_v22, %v1218_v31  ;;  %v1316_v38 = vmul.f32 1.442695, %v1270_v11 }
 0x31c   : > { %1379 = vadd.xlane.f32.xlu0 %v1378_v20  ;;  %v1227_v19 = vpop.xlane.xlu0 %1226  ;;  %v1310_v20 = vmul.f32 1.442695, %v1267_v26 }
 0x31d   : > { %v1312_v39 = vmul.f32 1.442695, %v1268_v16  ;;  %v1271_v42 = vsub.f32 %v6139_v52, %v1227_v19 }
 0x31e   : > { %5224 = vpow2.f32 %v1310_v20 }
 0x31f   : > { %5226 = vpow2.f32 %v1316_v38  ;;  %v1318_v28 = vmul.f32 1.442695, %v1271_v42 }
 0x320   : > { %v1230_v60 = vpop.xlane.xlu0 %1229  ;;  %5228 = vpow2.f32 %v1312_v39 }
 0x324   : > { %v1233_v23 = vpop.xlane.xlu1 %1232 }
 0x325   : > { %v1273_v34 = vsub.f32 %v6149_v54, %v1233_v23 }
 0x326   : > { %v6299_v19 = vpop.eup %5222 }
 0x328   : > { %v1236_v25 = vpop.xlane.xlu1 %1235 }
 0x329   : > { %1904 = vrot.lane.b32.xlu1 %v5676_v8, %s5427_s5  ;;  %v1274_v16 = vsub.f32 %v6154_v3, %v1236_v25 }
 0x32b   : > { %v1324_v42 = vmul.f32 1.442695, %v1274_v16  ;;  %v6301_v39 = vpop.eup %5224 }
 0x32c   : > { %v1239_v30 = vpop.xlane.xlu1 %1238  ;;  %v6306_v23 = vpop.eup %5226 }
 0x32d   : > { %1902 = vrot.lane.b32.xlu1 %v5662_v1, %s5427_s5  ;;  %v1275_v10 = vsub.f32 %v6159_v35, %v1239_v30  ;;  %v1387_v30 = vsel %vm1167_vm3, %v6299_v19, 0.0  ;;  %v6310_v0 = vpop.eup %5228 }
 0x32e   : > { %v1384_v20 = vsel %vm1167_vm3, %v6310_v0, 0.0 }
 0x32f   : > { %v1326_v22 = vmul.f32 1.442695, %v1275_v10 }
 0x330   : > { %v1242_v35 = vpop.xlane.xlu1 %1241 }
 0x331   : > { %2052 = vrot.lane.b32.xlu1 %v5606_v45, %s5428_s22  ;;  %v1272_v45 = vsub.f32 %v6144_v62, %v1230_v60  ;;  %v1322_v62 = vmul.f32 1.442695, %v1273_v34  ;;  %v1276_v54 = vsub.f32 %v6164_v7, %v1242_v35  ;;  %v1390_v7 = vsel %vm1167_vm3, %v6306_v23, 0.0 }
 0x332   : > { %1906 = vrot.lane.b32.xlu0 %v5694_v14, %s5427_s5 }
 0x333   : > { %v1320_v48 = vmul.f32 1.442695, %v1272_v45  ;;  %v1328_v26 = vmul.f32 1.442695, %v1276_v54 }
 0x334   : > { %v1245_v4 = vpop.xlane.xlu0 %1244 }
 0x335   : > { %5230 = vpow2.f32 %v1320_v48  ;;  %v1277_v31 = vsub.f32 %v6169_v58, %v1245_v4 }
 0x336   : > { %5232 = vpow2.f32 %v1318_v28 }
 0x337   : > { %5234 = vpow2.f32 %v1326_v22  ;;  %v1330_v52 = vmul.f32 1.442695, %v1277_v31 }
 0x338   : > { %5236 = vpow2.f32 %v1322_v62  ;;  %v1248_v3 = vpop.xlane.xlu1 %1247 }
 0x339   : > { %5238 = vpow2.f32 %v1330_v52  ;;  %v1278_v25 = vsub.f32 %v6174_v5, %v1248_v3 }
 0x33a   : > { %5240 = vpow2.f32 %v1324_v42 }
 0x33b   : > { %v1332_v60 = vmul.f32 1.442695, %v1278_v25 }
 0x33c   : > { %v1251_v57 = vpop.xlane.xlu0 %1250 }
 0x33d   : > { %v1279_v38 = vsub.f32 %v6179_v43, %v1251_v57  ;;  %v1381_v43 = vsel %vm1167_vm3, %v6301_v39, 0.0 }
 0x33f   : > { %v1334_v58 = vmul.f32 1.442695, %v1279_v38 }
 0x341   : > { %5242 = vpow2.f32 %v1334_v58 }
 0x342   : > { %v6315_v29 = vpop.eup %5230  ;;  %5244 = vpow2.f32 %v1328_v26 }
 0x343   : > { %v6317_v11 = vpop.eup %5232  ;;  %v1396_v45 = vsel %vm1167_vm3, %v6315_v29, 0.0  ;;  %5246 = vpow2.f32 %v1332_v60  ;;  %v7651_v60 = vmov 0.0  }
 0x344   : > { %v6323_v48 = vpop.eup %5234  ;;  %v1393_v10 = vsel %vm1167_vm3, %v6317_v11, 0.0 }
 0x345   : > { %v6325_v5 = vpop.eup %5236  ;;  %v1405_v4 = vsel %vm1167_vm3, %v6323_v48, 0.0 }
 0x346   : > { %v6331_v28 = vpop.eup %5238  ;;  %v1399_v22 = vsel %vm1167_vm3, %v6325_v5, 0.0 }
 0x347   : > { %v6333_v34 = vpop.eup %5240  ;;  %v1411_v31 = vsel %vm1167_vm3, %v6331_v28, 0.0 }
 0x348   : > { %v1402_v62 = vsel %vm1167_vm3, %v6333_v34, 0.0 }
 0x34e   : > { %v6339_v57 = vpop.eup %5242 }
 0x34f   : > { %v1417_v16 = vsel %vm1167_vm3, %v6339_v57, 0.0  ;;  %v6345_v52 = vpop.eup %5244 }
 0x350   : > { %v1408_v38 = vsel %vm1167_vm3, %v6345_v52, 0.0  ;;  %v6349_v35 = vpop.eup %5246 }
 0x351   : > { %1388 = vadd.xlane.f32.xlu0 %v1387_v30  ;;  %v1414_v42 = vsel %vm1167_vm3, %v6349_v35, 0.0 }
 0x355   : > { %1382 = vadd.xlane.f32.xlu1 %v1381_v43  ;;  %1391 = vadd.xlane.f32.xlu0 %v1390_v7 }
 0x359   : > { %1385 = vadd.xlane.f32.xlu1 %v1384_v20  ;;  %1397 = vadd.xlane.f32.xlu0 %v1396_v45  ;;  %v7658_v20 = vld [vmem:[#allocation24_spill] sm:$0xff]  ;;  %v7659_v45 = vld [vmem:[#allocation42_spill] sm:$0xff] }
 0x35d   : > { %1394 = vadd.xlane.f32.xlu1 %v1393_v10  ;;  %1406 = vadd.xlane.f32.xlu0 %v1405_v4 }
 0x361   : > { %1400 = vadd.xlane.f32.xlu1 %v1399_v22  ;;  %1412 = vadd.xlane.f32.xlu0 %v1411_v31  ;;  %v7660_v22 = vld [vmem:[#allocation25_spill] sm:$0xff] }
 0x362   : > { %v7662_v31 = vld [vmem:[#allocation45_spill] sm:$0xff] }
 0x365   : > { %1403 = vadd.xlane.f32.xlu1 %v1402_v62  ;;  %1418 = vadd.xlane.f32.xlu0 %v1417_v16 }
 0x369   : > { %1409 = vadd.xlane.f32.xlu1 %v1408_v38 }
 0x36d   : > { %v1338_v54 = vpop.xlane.xlu1 %1337  ;;  %1415 = vadd.xlane.f32.xlu1 %v1414_v42  ;;  %v7663_v42 = vld [vmem:[#allocation28_spill] sm:$0xff] }
 0x36e   : > { %5248 = vrcp.f32 %v1338_v54 }
 0x371   : > { %v1341_v58 = vpop.xlane.xlu0 %1340 }
 0x372   : > { %5250 = vrcp.f32 %v1341_v58  ;;  %v7664_v58 = vld [vmem:[#allocation7_spill] sm:$0xff] }
 0x375   : > { %v1344_v30 = vpop.xlane.xlu1 %1343 }
 0x376   : > { %5252 = vrcp.f32 %v1344_v30  ;;  %v7665_v30 = vld [vmem:[#allocation46_spill] sm:$0xff] }
 0x379   : > { %v1347_v3 = vpop.xlane.xlu0 %1346 }
 0x37a   : > { %5254 = vrcp.f32 %v1347_v3 }
 0x37b   : > { %v5249_v43 = vpop.eup %5248  ;;  %2054 = vrot.lane.b32.xlu0 %v5610_v47, %s5428_s22 }
 0x37c   : > { %v1448_v26 = vmul.f32 %v5249_v43, %v6210_v56 }
 0x37d   : > { %v1350_v25 = vpop.xlane.xlu1 %1349 }
 0x37e   : > { %5256 = vrcp.f32 %v1350_v25  ;;  %4700 = vmatmul.mubr.msk.f32.vlgmr.msra.gmra.mxu0 %vm1167_vm3, %v1448_v26  ;;  %2056 = vrot.lane.b32.xlu1 %v5614_v49, %s5428_s22  ;;  %v7666_v25 = vld [vmem:[#allocation31_spill] sm:$0xff] }
 0x37f   : > { %v5251_v7 = vpop.eup %5250  ;;  %4756 = vmatpush3.msra.mxu0 %v6201_v37  ;;  %2205 = vrot.lane.b32.xlu0 %v5654_v63, %s5428_s22 }
 0x380   : > { %4757 = vmatprep.subr.mxu0 %v7651_v60  ;;  %4702 = vmatprep.mubr.msk.f32.mxu0 %vm5426_vm1, %v7651_v60  ;;  %v1449_v47 = vmul.f32 %v5251_v7, %v6215_v18  ;;  %v7653_v18 = vld [vmem:[#allocation19_spill] sm:$0xff]  ;;  %v7667_v7 = vld [vmem:[#allocation4_spill] sm:$0xff] }
 0x381   : > { %4758 = vmatpush3.msra.mxu0 %v6181_v13  ;;  %v1353_v56 = vpop.xlane.xlu0 %1352 }
 0x382   : > { %4759 = vmatprep.subr.mxu0 %v7651_v60  ;;  %5258 = vrcp.f32 %v1353_v56  ;;  %2058 = vrot.lane.b32.xlu1 %v5618_v51, %s5428_s22 }
 0x383   : > { %v5253_v49 = vpop.eup %5252  ;;  %4760 = vmatpush3.msra.mxu0 %v6187_v36  ;;  %2207 = vrot.lane.b32.xlu0 %v5666_v2, %s5428_s22 }
 0x384   : > { %4703 = vmatmul.mubr.msk.f32.gmra.mxu0 %vm1167_vm3, %v1449_v47  ;;  %4761 = vmatprep.subr.mxu0 %v7651_v60  ;;  %v1450_v63 = vmul.f32 %v5253_v49, %v6220_v27  ;;  %v7668_v47 = vld [vmem:[#allocation47_spill] sm:$0xff] }
 0x385   : > { %4762 = vmatpush3.msra.mxu0 %v6185_v44  ;;  %4705 = vmatprep.mubr.msk.f32.mxu0 %vm5426_vm1, %v7651_v60  ;;  %v1356_v13 = vpop.xlane.xlu0 %1355 }
 0x386   : > { %4763 = vmatprep.subr.mxu0 %v7651_v60  ;;  %5260 = vrcp.f32 %v1356_v13  ;;  %2201 = vrot.lane.b32.xlu1 %v5642_v59, %s5428_s22  ;;  %v7669_v13 = vld [vmem:[#allocation34_spill] sm:$0xff] }
 0x387   : > { %v5255_v51 = vpop.eup %5254  ;;  %4764 = vmatpush3.msra.mxu0 %v6189_v33  ;;  %2209 = vrot.lane.b32.xlu0 %v5672_v6, %s5428_s22 }
 0x388   : > { %4706 = vmatmul.mubr.msk.f32.gmra.mxu0 %vm1167_vm3, %v1450_v63  ;;  %4765 = vmatprep.subr.mxu0 %v7651_v60  ;;  %v1451_v2 = vmul.f32 %v5255_v51, %v6225_v17  ;;  %v7654_v17 = vld [vmem:[#allocation43_spill] sm:$0xff]  ;;  %v7670_v51 = vld [vmem:[#allocation2_spill] sm:$0xff] }
 0x389   : > { %4766 = vmatpush3.msra.mxu0 %v6191_v41  ;;  %v1359_v44 = vpop.xlane.xlu1 %1358  ;;  %4708 = vmatprep.mubr.msk.f32.mxu0 %vm5426_vm1, %v7651_v60  ;;  %v7652_v41 = vld [vmem:[#allocation8_spill] sm:$0xff] }
 0x38a   : > { %4767 = vmatprep.subr.mxu0 %v7651_v60  ;;  %5262 = vrcp.f32 %v1359_v44  ;;  %2060 = vrot.lane.b32.xlu1 %v5622_v53, %s5428_s22 }
 0x38b   : > { %v5257_v59 = vpop.eup %5256  ;;  %4768 = vmatpush3.msra.mxu0 %v6195_v50  ;;  %2211 = vrot.lane.b32.xlu0 %v5678_v9, %s5428_s22 }
 0x38c   : > { %4709 = vmatmul.mubr.msk.f32.gmra.mxu0 %vm1167_vm3, %v1451_v2  ;;  %v1452_v6 = vmul.f32 %v5257_v59, %v6230_v24  ;;  %4825 = vmatprep.subr.mxu0 %v7651_v60  ;;  %v7655_v24 = vld [vmem:[#allocation44_spill] sm:$0xff] }
 0x38d   : > { %v1362_v36 = vpop.xlane.xlu1 %1361  ;;  %4711 = vmatprep.mubr.msk.f32.mxu0 %vm5426_vm1, %v7651_v60  ;;  %v7671_v2 = vld [vmem:[#allocation48_spill] sm:$0xff] }
 0x38e   : > { %5264 = vrcp.f32 %v1362_v36  ;;  %2203 = vrot.lane.b32.xlu1 %v5648_v61, %s5428_s22  ;;  %v7673_v36 = vld [vmem:[#allocation49_spill] sm:$0xff] }
 0x38f   : > { %v5259_v53 = vpop.eup %5258  ;;  %2213 = vrot.lane.b32.xlu0 %v5686_v12, %s5428_s22 }
 0x390   : > { %4712 = vmatmul.mubr.msk.f32.gmra.mxu0 %vm1167_vm3, %v1452_v6  ;;  %v1453_v50 = vmul.f32 %v5259_v53, %v6235_v32  ;;  %v7672_v6 = vld [vmem:[#allocation37_spill] sm:$0xff] }
 0x391   : > { %v1365_v9 = vpop.xlane.xlu1 %1364  ;;  %4714 = vmatprep.mubr.msk.f32.mxu0 %vm5426_vm1, %v7651_v60 }
 0x392   : > { %5266 = vrcp.f32 %v1365_v9  ;;  %2062 = vrot.lane.b32.xlu1 %v5628_v55, %s5428_s22  ;;  %v7675_v9 = vld [vmem:[#allocation30_spill] sm:$0xff] }
 0x393   : > { %v5261_v33 = vpop.eup %5260  ;;  %2499 = vrot.lane.b32.xlu0 %v5662_v1, %s5428_s22 }
 0x394   : > { %4715 = vmatmul.mubr.msk.f32.gmra.mxu0 %vm1167_vm3, %v1453_v50  ;;  %v1454_v61 = vmul.f32 %v5261_v33, %v6240_v40  ;;  %v7674_v50 = vld [vmem:[#allocation18_spill] sm:$0xff]  ;;  %v7676_v33 = vld [vmem:[#allocation9_spill] sm:$0xff] }
 0x395   : > { %v1368_v12 = vpop.xlane.xlu1 %1367  ;;  %4717 = vmatprep.mubr.msk.f32.mxu0 %vm5426_vm1, %v7651_v60 }
 0x396   : > { %5268 = vrcp.f32 %v1368_v12  ;;  %2064 = vrot.lane.b32.xlu1 %v7652_v41, %s5428_s22  ;;  %v7678_v12 = vld [vmem:[#allocation39_spill] sm:$0xff]  ;;  %v7679_v41 = vld [vmem:[#allocation13_spill] sm:$0xff] }
 0x397   : > { %v5263_v37 = vpop.eup %5262  ;;  %2501 = vrot.lane.b32.xlu0 %v5676_v8, %s5428_s22 }
 0x398   : > { %v1455_v55 = vmul.f32 %v5263_v37, %v6245_v46  ;;  %4718 = vmatmul.mubr.msk.f32.gmra.mxu0 %vm1167_vm3, %v1454_v61  ;;  %v7656_v46 = vld [vmem:[#allocation41_spill] sm:$0xff]  ;;  %v7677_v61 = vld [vmem:[#allocation15_spill] sm:$0xff]  ;;  %v7680_v37 = vld [vmem:[#allocation6_spill] sm:$0xff] }
 0x399   : > { %v1371_v1 = vpop.xlane.xlu1 %1370  ;;  %4769 = vmatprep.mubr.msk.f32.mxu0 %vm5426_vm1, %v7651_v60 }
 0x39a   : > { %5270 = vrcp.f32 %v1371_v1  ;;  %4735 = vmatmul.mubr.msk.f32.vlgmr.msra.gmra.mxu1 %vm1167_vm3, %v1455_v55  ;;  %2350 = vrot.lane.b32.xlu1 %v7653_v18, %s5428_s22  ;;  %v7681_v55 = vld [vmem:[#allocation11_spill] sm:$0xff]  ;;  %v6517_v1 = vpop.f32.mrf.mxu0  ;;  %v7682_v18 = vld [vmem:[#allocation5_spill] sm:$0xff] }
 0x39b   : > { %v5265_v27 = vpop.eup %5264  ;;  %4791 = vmatpush3.msra.mxu1 %v7654_v17  ;;  %2503 = vrot.lane.b32.xlu0 %v5694_v14, %s5428_s22  ;;  %v7657_v14 = vld [vmem:[#allocation22_spill] sm:$0xff]  ;;  %v7684_v17 = vld [vmem:[#allocation3_spill] sm:$0xff] }
 0x39c   : > { %4792 = vmatprep.subr.mxu1 %v7651_v60  ;;  %4737 = vmatprep.mubr.msk.f32.mxu1 %vm5426_vm1, %v7651_v60  ;;  %v1456_v8 = vmul.f32 %v5265_v27, %v6250_v21  ;;  %v7683_v27 = vld [vmem:[#allocation32_spill] sm:$0xff] }
 0x39d   : > { %4793 = vmatpush3.msra.mxu1 %v7655_v24  ;;  %v1374_v32 = vpop.xlane.xlu0 %1373  ;;  %v7686_v24 = vld [vmem:[#allocation16_spill] sm:$0xff] }
 0x39e   : > { %4794 = vmatprep.subr.mxu1 %v7651_v60  ;;  %5272 = vrcp.f32 %v1374_v32  ;;  %4738 = vmatmul.mubr.msk.f32.gmra.mxu1 %vm1167_vm3, %v1456_v8  ;;  %v7685_v8 = vld [vmem:[#allocation26_spill] sm:$0xff]  ;;  %v7687_v32 = vld [vmem:[#allocation20_spill] sm:$0xff] }
 0x39f   : > { %v5267_v40 = vpop.eup %5266  ;;  %4795 = vmatpush3.msra.mxu1 %v7656_v46  ;;  %2352 = vrot.lane.b32.xlu1 %v7657_v14, %s5428_s22  ;;  %v7689_v46 = vld [vmem:[#allocation38_spill] sm:$0xff] }
 0x3a0   : > { %4796 = vmatprep.subr.mxu1 %v7651_v60  ;;  %2505 = vrot.lane.b32.xlu0 %v7658_v20, %s5428_s22  ;;  %v1457_v21 = vmul.f32 %v5267_v40, %v6255_v15  ;;  %v7661_v15 = vld [vmem:[#allocation36_spill] sm:$0xff]  ;;  %v7690_v14 = vld [vmem:[#allocation10_spill] sm:$0xff] }
 0x3a1   : > { %4797 = vmatpush3.msra.mxu1 %v7659_v45  ;;  %4740 = vmatprep.mubr.msk.f32.mxu1 %vm5426_vm1, %v7651_v60  ;;  %v1377_v10 = vpop.xlane.xlu1 %1376  ;;  %v7688_v40 = vld [vmem:[#allocation12_spill] sm:$0xff]  ;;  %v7691_v45 = vld [vmem:[#allocation35_spill] sm:$0xff] }
 0x3a2   : > { %5274 = vrcp.f32 %v1377_v10  ;;  %4741 = vmatmul.mubr.msk.f32.gmra.mxu1 %vm1167_vm3, %v1457_v21  ;;  %4798 = vmatprep.subr.mxu1 %v7651_v60 }
 0x3a3   : > { %v5269_v4 = vpop.eup %5268  ;;  %2354 = vrot.lane.b32.xlu1 %v7660_v22, %s5428_s22  ;;  %4743 = vmatprep.mubr.msk.f32.mxu1 %vm5426_vm1, %v7651_v60  ;;  %v7692_v22 = vld [vmem:[#allocation29_spill] sm:$0xff] }
 0x3a4   : > { %2509 = vrot.lane.b32.xlu0 %v7661_v15, %s5428_s22  ;;  %v1458_v62 = vmul.f32 %v5269_v4, %v7662_v31 }
 0x3a5   : > { %v1380_v16 = vpop.xlane.xlu0 %1379  ;;  %v1905_v54 = vpop.permute.xlu1 %1904 }
 0x3a6   : > { %5276 = vrcp.f32 %v1380_v16  ;;  %4744 = vmatmul.mubr.msk.f32.gmra.mxu1 %vm1167_vm3, %v1458_v62  ;;  %v7693_v62 = vld [vmem:[#allocation23_spill] sm:$0xff] }
 0x3a7   : > { %v5271_v38 = vpop.eup %5270  ;;  %2356 = vrot.lane.b32.xlu1 %v7663_v42, %s5428_s22  ;;  %4746 = vmatprep.mubr.msk.f32.mxu1 %vm5426_vm1, %v7651_v60  ;;  %v7694_v42 = vld [vmem:[#allocation40_spill] sm:$0xff] }
 0x3a8   : > { %2966 = vrot.lane.b32.xlu0 %v7664_v58, %s5425_s30  ;;  %v1459_v3 = vmul.f32 %v5271_v38, %v7665_v30 }
 0x3a9   : > { %v1907_v43 = vpop.permute.xlu0 %1906  ;;  %v1903_v49 = vpop.permute.xlu1 %1902 }
 0x3aa   : > { %4747 = vmatmul.mubr.msk.f32.gmra.mxu1 %vm1167_vm3, %v1459_v3 }
 0x3ab   : > { %v5273_v26 = vpop.eup %5272  ;;  %2358 = vrot.lane.b32.xlu1 %v7666_v25, %s5428_s22  ;;  %4799 = vmatpush3.msra.mxu1 %v1907_v43 }
 0x3ac   : > { %2960 = vrot.lane.b32.xlu0 %v7667_v7, %s5425_s30  ;;  %4800 = vmatprep.subr.mxu1 %v7651_v60  ;;  %v1460_v56 = vmul.f32 %v5273_v26, %v7668_v47 }
 0x3ad   : > { %4801 = vmatpush3.msra.mxu1 %v1905_v54  ;;  %4749 = vmatprep.mubr.msk.f32.mxu1 %vm5426_vm1, %v7651_v60  ;;  %v6553_v20 = vpop.permute.xlu1 %2052 }
 0x3ae   : > { %4802 = vmatprep.subr.mxu1 %v7651_v60  ;;  %4750 = vmatmul.mubr.msk.f32.gmra.mxu1 %vm1167_vm3, %v1460_v56 }
 0x3af   : > { %v5275_v63 = vpop.eup %5274  ;;  %2360 = vrot.lane.b32.xlu1 %v7669_v13, %s5428_s22  ;;  %4803 = vmatpush3.msra.mxu1 %v1903_v49 }
 0x3b0   : > { %2956 = vrot.lane.b32.xlu0 %v7670_v51, %s5425_s30  ;;  %4752 = vmatprep.mubr.msk.f32.mxu1 %vm5426_vm1, %v7651_v60  ;;  %v1461_v44 = vmul.f32 %v5275_v63, %v7671_v2 }
 0x3b1   : > { %4860 = vmatprep.subr.mxu1 %v7651_v60 }
 0x3b2   : > { %4753 = vmatmul.mubr.msk.f32.gmra.mxu1 %vm1167_vm3, %v1461_v44 }
 0x3b3   : > { %v5277_v59 = vpop.eup %5276  ;;  %2362 = vrot.lane.b32.xlu1 %v7672_v6, %s5428_s22  ;;  %4804 = vmatprep.mubr.msk.f32.mxu1 %vm5426_vm1, %v7651_v60 }
 0x3b4   : > { %v1462_v53 = vmul.f32 %v5277_v59, %v7673_v36  ;;  %3110 = vrot.lane.b32.xlu0 %v7674_v50, %s5425_s30 }
 0x3b6   : > { %4770 = vmatmul.mubr.msk.f32.vlgmr.msra.gmra.mxu0 %vm1167_vm3, %v1462_v53 }
 0x3b7   : > { %2507 = vrot.lane.b32.xlu1 %v7675_v9, %s5428_s22  ;;  %4826 = vmatpush3.xpose.msk.msra.mxu0 %vm591_vm2, %v7676_v33 }
 0x3b8   : > { %3106 = vrot.lane.b32.xlu0 %v7677_v61, %s5425_s30  ;;  %4827 = vmatprep.subr.mxu0 %v7651_v60 }
 0x3b9   : > { %4772 = vmatprep.mubr.msk.f32.mxu0 %vm5426_vm1, %v7651_v60 }
 0x3bb   : > { %2511 = vrot.lane.b32.xlu1 %v7678_v12, %s5428_s22  ;;  %4828 = vmatpush3.xpose.msk.msra.mxu0 %vm591_vm2, %v7664_v58 }
 0x3bc   : > { %3104 = vrot.lane.b32.xlu0 %v7679_v41, %s5425_s30  ;;  %4829 = vmatprep.subr.mxu0 %v7651_v60 }
 0x3bf   : > { %2968 = vrot.lane.b32.xlu1 %v7676_v33, %s5425_s30  ;;  %4830 = vmatpush3.xpose.msk.msra.mxu0 %vm591_vm2, %v7680_v37 }
 0x3c0   : > { %3100 = vrot.lane.b32.xlu0 %v7681_v55, %s5425_s30  ;;  %4831 = vmatprep.subr.mxu0 %v7651_v60 }
 0x3c3   : > { %2964 = vrot.lane.b32.xlu1 %v7680_v37, %s5425_s30  ;;  %4832 = vmatpush3.xpose.msk.msra.mxu0 %vm591_vm2, %v7682_v18 }
 0x3c4   : > { %3252 = vrot.lane.b32.xlu0 %v6517_v1, %s5425_s30  ;;  %4833 = vmatprep.subr.mxu0 %v7651_v60 }
 0x3c7   : > { %2962 = vrot.lane.b32.xlu1 %v7682_v18, %s5425_s30  ;;  %4834 = vmatpush3.xpose.msk.msra.mxu0 %vm591_vm2, %v7667_v7 }
 0x3c8   : > { %3248 = vrot.lane.b32.xlu0 %v7683_v27, %s5425_s30  ;;  %4835 = vmatprep.subr.mxu0 %v7651_v60 }
 0x3cb   : > { %2958 = vrot.lane.b32.xlu1 %v7684_v17, %s5425_s30  ;;  %4836 = vmatpush3.xpose.msk.msra.mxu0 %vm591_vm2, %v7684_v17 }
 0x3cc   : > { %3244 = vrot.lane.b32.xlu0 %v7685_v8, %s5425_s30  ;;  %4837 = vmatprep.subr.mxu0 %v7651_v60 }
 0x3cf   : > { %3108 = vrot.lane.b32.xlu1 %v7686_v24, %s5425_s30  ;;  %4838 = vmatpush3.xpose.msk.msra.mxu0 %vm591_vm2, %v7670_v51 }
 0x3d0   : > { %3240 = vrot.lane.b32.xlu0 %v7687_v32, %s5425_s30  ;;  %4895 = vmatprep.subr.mxu0 %v7651_v60 }
 0x3d3   : > { %3102 = vrot.lane.b32.xlu1 %v7688_v40, %s5425_s30 }
 0x3d4   : > { %3392 = vrot.lane.b32.xlu0 %v7689_v46, %s5425_s30 }
 0x3d7   : > { %3098 = vrot.lane.b32.xlu1 %v7690_v14, %s5425_s30 }
 0x3da   : > { %v1389_v21 = vpop.xlane.xlu0 %1388 }
 0x3db   : > { %3250 = vrot.lane.b32.xlu1 %v7691_v45, %s5425_s30 }
 0x3de   : > { %v1383_v10 = vpop.xlane.xlu1 %1382  ;;  %v1392_v4 = vpop.xlane.xlu0 %1391 }
 0x3df   : > { %5278 = vrcp.f32 %v1383_v10  ;;  %3246 = vrot.lane.b32.xlu1 %v7692_v22, %s5425_s30 }
 0x3e2   : > { %v1386_v15 = vpop.xlane.xlu1 %1385  ;;  %v1398_v31 = vpop.xlane.xlu0 %1397 }
 0x3e3   : > { %5280 = vrcp.f32 %v1386_v15  ;;  %3242 = vrot.lane.b32.xlu1 %v7693_v62, %s5425_s30 }
 0x3e4   : > { %5282 = vrcp.f32 %v1389_v21 }
 0x3e5   : > { %5284 = vrcp.f32 %v1392_v4 }
 0x3e6   : > { %v1395_v16 = vpop.xlane.xlu1 %1394  ;;  %v1407_v38 = vpop.xlane.xlu0 %1406 }
 0x3e7   : > { %3394 = vrot.lane.b32.xlu1 %v7694_v42, %s5425_s30 }
 0x3ea   : > { %v1401_v54 = vpop.xlane.xlu1 %1400  ;;  %v1413_v58 = vpop.xlane.xlu0 %1412 }
 0x3eb   : > { %5286 = vrcp.f32 %v1401_v54 }
 0x3ec   : > { %v5279_v30 = vpop.eup %5278  ;;  %5288 = vrcp.f32 %v1395_v16 }
 0x3ed   : > { %v1463_v3 = vmul.f32 %v5279_v30, %v6301_v39 }
 0x3ee   : > { %v1404_v43 = vpop.xlane.xlu1 %1403  ;;  %v1419_v26 = vpop.xlane.xlu0 %1418 }
 0x3ef   : > { %5290 = vrcp.f32 %v1404_v43  ;;  %4773 = vmatmul.mubr.msk.f32.gmra.mxu0 %vm1167_vm3, %v1463_v3 }
 0x3f0   : > { %v5281_v25 = vpop.eup %5280  ;;  %5292 = vrcp.f32 %v1398_v31  ;;  %4775 = vmatprep.mubr.msk.f32.mxu0 %vm5426_vm1, %v7651_v60 }
 0x3f1   : > { %5294 = vrcp.f32 %v1407_v38  ;;  %v1464_v7 = vmul.f32 %v5281_v25, %v6310_v0  ;;  %v5283_v47 = vpop.eup %5282  ;;  %v7698_v38 = vld [vmem:[#allocation17_spill] sm:$0xff] }
 0x3f2   : > { %v1410_v56 = vpop.xlane.xlu1 %1409  ;;  %v6568_v49 = vpop.permute.xlu0 %2054  ;;  %v1465_v39 = vmul.f32 %v5283_v47, %v6299_v19 }
 0x3f3   : > { %4776 = vmatmul.mubr.msk.f32.gmra.mxu0 %vm1167_vm3, %v1464_v7  ;;  %5296 = vrcp.f32 %v1410_v56  ;;  %v5285_v63 = vpop.eup %5284 }
 0x3f4   : > { %4778 = vmatprep.mubr.msk.f32.mxu0 %vm5426_vm1, %v7651_v60  ;;  %5298 = vrcp.f32 %v1413_v58  ;;  %v1466_v44 = vmul.f32 %v5285_v63, %v6306_v23  ;;  %v7699_v58 = vld [vmem:[#allocation14_spill] sm:$0xff] }
 0x3f6   : > { %v1416_v13 = vpop.xlane.xlu1 %1415  ;;  %v6574_v51 = vpop.permute.xlu0 %2205 }
 0x3f7   : > { %4779 = vmatmul.mubr.msk.f32.gmra.mxu0 %vm1167_vm3, %v1465_v39  ;;  %5300 = vrcp.f32 %v1416_v13 }
 0x3f8   : > { %v5287_v2 = vpop.eup %5286  ;;  %4781 = vmatprep.mubr.msk.f32.mxu0 %vm5426_vm1, %v7651_v60  ;;  %5302 = vrcp.f32 %v1419_v26 }
 0x3f9   : > { %v1469_v0 = vmul.f32 %v5287_v2, %v6325_v5  ;;  %v5289_v59 = vpop.eup %5288 }
 0x3fa   : > { %v6581_v6 = vpop.permute.xlu1 %2056  ;;  %v6583_v36 = vpop.permute.xlu0 %2207  ;;  %v1467_v23 = vmul.f32 %v5289_v59, %v6317_v11 }
 0x3fb   : > { %4782 = vmatmul.mubr.msk.f32.gmra.mxu0 %vm1167_vm3, %v1466_v44  ;;  %4805 = vmatmul.mubr.msk.f32.vlgmr.msra.gmra.mxu1 %vm1167_vm3, %v1469_v0 }
 0x3fc   : > { %v5291_v19 = vpop.eup %5290  ;;  %4861 = vmatpush3.xpose.msk.msra.mxu1 %vm591_vm2, %v7674_v50  ;;  %4784 = vmatprep.mubr.msk.f32.mxu0 %vm5426_vm1, %v7651_v60 }
 0x3fd   : > { %v5293_v5 = vpop.eup %5292  ;;  %4807 = vmatprep.mubr.msk.f32.mxu1 %vm5426_vm1, %v7651_v60  ;;  %4862 = vmatprep.subr.mxu1 %v7651_v60  ;;  %v1470_v53 = vmul.f32 %v5291_v19, %v6333_v34 }
 0x3fe   : > { %v5295_v9 = vpop.eup %5294  ;;  %v2059_v33 = vpop.permute.xlu1 %2058  ;;  %v1468_v11 = vmul.f32 %v5293_v5, %v6315_v29 }
 0x3ff   : > { %v6596_v12 = vpop.permute.xlu0 %2209  ;;  %4785 = vmatmul.mubr.msk.f32.gmra.mxu0 %vm1167_vm3, %v1467_v23  ;;  %4808 = vmatmul.mubr.msk.f32.gmra.mxu1 %vm1167_vm3, %v1470_v53  ;;  %v1471_v34 = vmul.f32 %v5295_v9, %v6323_v48 }
 0x400   : > { %4863 = vmatpush3.xpose.msk.msra.mxu1 %vm591_vm2, %v7686_v24  ;;  %4787 = vmatprep.mubr.msk.f32.mxu0 %vm5426_vm1, %v7651_v60  ;;  %v5297_v50 = vpop.eup %5296 }
 0x401   : > { %4810 = vmatprep.mubr.msk.f32.mxu1 %vm5426_vm1, %v7651_v60  ;;  %4864 = vmatprep.subr.mxu1 %v7651_v60  ;;  %v1472_v29 = vmul.f32 %v5297_v50, %v6345_v52  ;;  %v5299_v48 = vpop.eup %5298 }
 0x402   : > { %v2202_v37 = vpop.permute.xlu1 %2201  ;;  %v1473_v52 = vmul.f32 %v5299_v48, %v6331_v28 }
 0x403   : > { %v6609_v18 = vpop.permute.xlu0 %2211  ;;  %4788 = vmatmul.mubr.msk.f32.gmra.mxu0 %vm1167_vm3, %v1468_v11  ;;  %4811 = vmatmul.mubr.msk.f32.gmra.mxu1 %vm1167_vm3, %v1471_v34 }
 0x404   : > { %4865 = vmatpush3.xpose.msk.msra.mxu1 %vm591_vm2, %v7677_v61  ;;  %4813 = vmatprep.mubr.msk.f32.mxu1 %vm5426_vm1, %v7651_v60  ;;  %v5301_v61 = vpop.eup %5300 }
 0x405   : > { %4839 = vmatprep.mubr.msk.f32.mxu0 %vm5426_vm1, %v7651_v60  ;;  %4866 = vmatprep.subr.mxu1 %v7651_v60  ;;  %v1474_v28 = vmul.f32 %v5301_v61, %v6349_v35 }
 0x406   : > { %v2061_v17 = vpop.permute.xlu1 %2060 }
 0x407   : > { %v6621_v24 = vpop.permute.xlu0 %2213  ;;  %4814 = vmatmul.mubr.msk.f32.gmra.mxu1 %vm1167_vm3, %v1472_v29  ;;  %4840 = vmatmul.mubr.msk.f32.vlgmr.msra.gmra.mxu0 %vm591_vm2, %v6553_v20 }
 0x408   : > { %4867 = vmatpush3.xpose.msk.msra.mxu1 %vm591_vm2, %v7679_v41  ;;  %4896 = vmatpush3.xpose.msk.msra.mxu0 %vm591_vm2, %v6517_v1  ;;  %v5303_v41 = vpop.eup %5302 }
 0x409   : > { %4816 = vmatprep.mubr.msk.f32.mxu1 %vm5426_vm1, %v7651_v60  ;;  %4842 = vmatprep.mubr.msk.f32.mxu0 %vm5426_vm1, %v7651_v60  ;;  %v1475_v35 = vmul.f32 %v5303_v41, %v6339_v57 }
 0x40a   : > { %v2204_v21 = vpop.permute.xlu1 %2203  ;;  %4868 = vmatprep.subr.mxu1 %v7651_v60  ;;  %4897 = vmatprep.subr.mxu0 %v7651_v60 }
 0x40b   : > { %v6636_v10 = vpop.permute.xlu0 %2499  ;;  %4817 = vmatmul.mubr.msk.f32.gmra.mxu1 %vm1167_vm3, %v1473_v52  ;;  %4843 = vmatmul.mubr.msk.f32.gmra.mxu0 %vm591_vm2, %v6568_v49 }
 0x40c   : > { %4869 = vmatpush3.xpose.msk.msra.mxu1 %vm591_vm2, %v7688_v40  ;;  %4898 = vmatpush3.xpose.msk.msra.mxu0 %vm591_vm2, %v7691_v45 }
 0x40d   : > { %4819 = vmatprep.mubr.msk.f32.mxu1 %vm5426_vm1, %v7651_v60  ;;  %4845 = vmatprep.mubr.msk.f32.mxu0 %vm5426_vm1, %v7651_v60 }
 0x40e   : > { %v2063_v1 = vpop.permute.xlu1 %2062  ;;  %4870 = vmatprep.subr.mxu1 %v7651_v60  ;;  %4899 = vmatprep.subr.mxu0 %v7651_v60 }
 0x40f   : > { %v6652_v20 = vpop.permute.xlu0 %2501  ;;  %4820 = vmatmul.mubr.msk.f32.gmra.mxu1 %vm1167_vm3, %v1474_v28  ;;  %4846 = vmatmul.mubr.msk.f32.gmra.mxu0 %vm591_vm2, %v6581_v6 }
 0x410   : > { %4871 = vmatpush3.xpose.msk.msra.mxu1 %vm591_vm2, %v7681_v55  ;;  %4900 = vmatpush3.xpose.msk.msra.mxu0 %vm591_vm2, %v7683_v27 }
 0x411   : > { %4822 = vmatprep.mubr.msk.f32.mxu1 %vm5426_vm1, %v7651_v60  ;;  %4848 = vmatprep.mubr.msk.f32.mxu0 %vm5426_vm1, %v7651_v60 }
 0x412   : > { %v2065_v40 = vpop.permute.xlu1 %2064  ;;  %4872 = vmatprep.subr.mxu1 %v7651_v60  ;;  %4901 = vmatprep.subr.mxu0 %v7651_v60 }
 0x413   : > { %v6668_v45 = vpop.permute.xlu0 %2503  ;;  %4823 = vmatmul.mubr.msk.f32.gmra.mxu1 %vm1167_vm3, %v1475_v35  ;;  %4849 = vmatmul.mubr.msk.f32.gmra.mxu0 %vm591_vm2, %v2059_v33 }
 0x414   : > { %4873 = vmatpush3.xpose.msk.msra.mxu1 %vm591_vm2, %v7690_v14  ;;  %4902 = vmatpush3.xpose.msk.msra.mxu0 %vm591_vm2, %v7692_v22 }
 0x415   : > { %4851 = vmatprep.mubr.msk.f32.mxu0 %vm5426_vm1, %v7651_v60  ;;  %4874 = vmatprep.mubr.msk.f32.mxu1 %vm5426_vm1, %v7651_v60 }
 0x416   : > { %v2351_v57 = vpop.permute.xlu1 %2350  ;;  %4930 = vmatprep.subr.mxu1 %v7651_v60  ;;  %4903 = vmatprep.subr.mxu0 %v7651_v60 }
 0x417   : > { %v6682_v55 = vpop.permute.xlu0 %2505  ;;  %4852 = vmatmul.mubr.msk.f32.gmra.mxu0 %vm591_vm2, %v2061_v17  ;;  %4875 = vmatmul.mubr.msk.f32.vlgmr.msra.gmra.mxu1 %vm591_vm2, %v2202_v37 }
 0x418   : > { %4904 = vmatpush3.xpose.msk.msra.mxu0 %vm591_vm2, %v7685_v8  ;;  %4931 = vmatpush3.xpose.msk.msra.mxu1 %vm591_vm2, %v7694_v42 }
 0x419   : > { %4854 = vmatprep.mubr.msk.f32.mxu0 %vm5426_vm1, %v7651_v60  ;;  %4877 = vmatprep.mubr.msk.f32.mxu1 %vm5426_vm1, %v7651_v60 }
 0x41a   : > { %v2353_v27 = vpop.permute.xlu1 %2352  ;;  %4932 = vmatprep.subr.mxu1 %v7651_v60  ;;  %4905 = vmatprep.subr.mxu0 %v7651_v60 }
 0x41b   : > { %v6697_v14 = vpop.permute.xlu0 %2509  ;;  %4855 = vmatmul.mubr.msk.f32.gmra.mxu0 %vm591_vm2, %v2063_v1  ;;  %4878 = vmatmul.mubr.msk.f32.gmra.mxu1 %vm591_vm2, %v2204_v21 }
 0x41c   : > { %4906 = vmatpush3.xpose.msk.msra.mxu0 %vm591_vm2, %v7693_v62  ;;  %4933 = vmatpush3.xpose.msk.msra.mxu1 %vm591_vm2, %v7689_v46  ;;  %v7695_v46 = vld [vmem:[#allocation33_spill] sm:$0xff] }
 0x41d   : > { %4857 = vmatprep.mubr.msk.f32.mxu0 %vm5426_vm1, %v7651_v60  ;;  %4880 = vmatprep.mubr.msk.f32.mxu1 %vm5426_vm1, %v7651_v60  ;;  %v7697_v62 = vld [vmem:[#allocation21_spill] sm:$0xff] }
 0x41e   : > { %v2355_v8 = vpop.permute.xlu1 %2354  ;;  %4934 = vmatprep.subr.mxu1 %v7651_v60  ;;  %4907 = vmatprep.subr.mxu0 %v7651_v60 }
 0x41f   : > { %4858 = vmatmul.mubr.msk.f32.gmra.mxu0 %vm591_vm2, %v2065_v40  ;;  %4881 = vmatmul.mubr.msk.f32.gmra.mxu1 %vm591_vm2, %v6574_v51  ;;  %v2967_v4 = vpop.permute.xlu0 %2966 }
 0x420   : > { %4908 = vmatpush3.xpose.msk.msra.mxu0 %vm591_vm2, %v7687_v32  ;;  %4935 = vmatpush3.xpose.msk.msra.mxu1 %vm591_vm2, %v7695_v46  ;;  %v7696_v32 = vld [vmem:[#allocation27_spill] sm:$0xff] }
 0x421   : > { %4883 = vmatprep.mubr.msk.f32.mxu1 %vm5426_vm1, %v7651_v60  ;;  %4909 = vmatprep.mubr.msk.f32.mxu0 %vm5426_vm1, %v7651_v60 }
 0x422   : > { %v2357_v22 = vpop.permute.xlu1 %2356  ;;  %4936 = vmatprep.subr.mxu1 %v7651_v60  ;;  %4965 = vmatprep.subr.mxu0 %v7651_v60 }
 0x423   : > { %4884 = vmatmul.mubr.msk.f32.gmra.mxu1 %vm591_vm2, %v6583_v36  ;;  %4910 = vmatmul.mubr.msk.f32.vlgmr.msra.gmra.mxu0 %vm591_vm2, %v2351_v57  ;;  %v2961_v31 = vpop.permute.xlu0 %2960 }
 0x424   : > { %4937 = vmatpush3.xpose.msk.msra.mxu1 %vm591_vm2, %v7696_v32  ;;  %4886 = vmatprep.mubr.msk.f32.mxu1 %vm5426_vm1, %v7651_v60 }
 0x425   : > { %4938 = vmatprep.subr.mxu1 %v7651_v60  ;;  %4912 = vmatprep.mubr.msk.f32.mxu0 %vm5426_vm1, %v7651_v60 }
 0x426   : > { %v2359_v15 = vpop.permute.xlu1 %2358 }
 0x427   : > { %4887 = vmatmul.mubr.msk.f32.gmra.mxu1 %vm591_vm2, %v6596_v12  ;;  %4913 = vmatmul.mubr.msk.f32.gmra.mxu0 %vm591_vm2, %v2353_v27  ;;  %v2957_v42 = vpop.permute.xlu0 %2956 }
 0x428   : > { %4939 = vmatpush3.xpose.msk.msra.mxu1 %vm591_vm2, %v7697_v62  ;;  %4889 = vmatprep.mubr.msk.f32.mxu1 %vm5426_vm1, %v7651_v60 }
 0x429   : > { %4940 = vmatprep.subr.mxu1 %v7651_v60  ;;  %4915 = vmatprep.mubr.msk.f32.mxu0 %vm5426_vm1, %v7651_v60 }
 0x42a   : > { %v2361_v16 = vpop.permute.xlu1 %2360 }
 0x42b   : > { %4890 = vmatmul.mubr.msk.f32.gmra.mxu1 %vm591_vm2, %v6609_v18  ;;  %4916 = vmatmul.mubr.msk.f32.gmra.mxu0 %vm591_vm2, %v2355_v8  ;;  %v3111_v3 = vpop.permute.xlu0 %3110 }
 0x42c   : > { %4941 = vmatpush3.xpose.msk.msra.mxu1 %vm591_vm2, %v7698_v38  ;;  %4892 = vmatprep.mubr.msk.f32.mxu1 %vm5426_vm1, %v7651_v60 }
 0x42d   : > { %4942 = vmatprep.subr.mxu1 %v7651_v60  ;;  %4918 = vmatprep.mubr.msk.f32.mxu0 %vm5426_vm1, %v7651_v60 }
 0x42e   : > { %v2363_v54 = vpop.permute.xlu1 %2362 }
 0x42f   : > { %4893 = vmatmul.mubr.msk.f32.gmra.mxu1 %vm591_vm2, %v6621_v24  ;;  %4919 = vmatmul.mubr.msk.f32.gmra.mxu0 %vm591_vm2, %v2357_v22  ;;  %v3107_v13 = vpop.permute.xlu0 %3106 }
 0x430   : > { %4943 = vmatpush3.xpose.msk.msra.mxu1 %vm591_vm2, %v7699_v58  ;;  %4944 = vmatprep.mubr.msk.f32.mxu1 %vm5426_vm1, %v7651_v60 }
 0x431   : > { %5000 = vmatprep.subr.mxu1 %v7651_v60  ;;  %4921 = vmatprep.mubr.msk.f32.mxu0 %vm5426_vm1, %v7651_v60 }
 0x432   : > { %v2508_v30 = vpop.permute.xlu1 %2507 }
 0x433   : > { %4922 = vmatmul.mubr.msk.f32.gmra.mxu0 %vm591_vm2, %v2359_v15  ;;  %4945 = vmatmul.mubr.msk.f32.vlgmr.msra.gmra.mxu1 %vm591_vm2, %v6636_v10  ;;  %v3105_v59 = vpop.permute.xlu0 %3104 }
 0x434   : > { %5001 = vmatpush3.msra.mxu1 %v3111_v3  ;;  %4947 = vmatprep.mubr.msk.f32.mxu1 %vm5426_vm1, %v7651_v60 }
 0x435   : > { %4924 = vmatprep.mubr.msk.f32.mxu0 %vm5426_vm1, %v7651_v60  ;;  %5002 = vmatprep.subr.mxu1 %v7651_v60 }
 0x436   : > { %v2512_v43 = vpop.permute.xlu1 %2511 }
 0x437   : > { %4925 = vmatmul.mubr.msk.f32.gmra.mxu0 %vm591_vm2, %v2361_v16  ;;  %4948 = vmatmul.mubr.msk.f32.gmra.mxu1 %vm591_vm2, %v6652_v20  ;;  %v3101_v23 = vpop.permute.xlu0 %3100 }
 0x438   : > { %4950 = vmatprep.mubr.msk.f32.mxu1 %vm5426_vm1, %v7651_v60  ;;  %4927 = vmatprep.mubr.msk.f32.mxu0 %vm5426_vm1, %v7651_v60 }
 0x43a   : > { %v2969_v26 = vpop.permute.xlu1 %2968 }
 0x43b   : > { %4928 = vmatmul.mubr.msk.f32.gmra.mxu0 %vm591_vm2, %v2363_v54  ;;  %4951 = vmatmul.mubr.msk.f32.gmra.mxu1 %vm591_vm2, %v6668_v45 }
 0x43c   : > { %4966 = vmatpush3.msra.mxu0 %v2969_v26  ;;  %4953 = vmatprep.mubr.msk.f32.mxu1 %vm5426_vm1, %v7651_v60  ;;  %v6864_v26 = vld [vmem:[%s7555_s3 + $0x38] sm:$0xff] }
 0x43d   : > { %4967 = vmatprep.subr.mxu0 %v7651_v60  ;;  %4979 = vmatprep.mubr.msk.f32.mxu0 %vm5426_vm1, %v7651_v60 }
 0x43e   : > { %4968 = vmatpush3.msra.mxu0 %v2967_v4  ;;  %v2965_v25 = vpop.permute.xlu1 %2964  ;;  %v6787_v7 = vpop.f32.mrf.mxu0 }
 0x43f   : > { %4969 = vmatprep.subr.mxu0 %v7651_v60  ;;  %4954 = vmatmul.mubr.msk.f32.gmra.mxu1 %vm591_vm2, %v6682_v55 }
 0x440   : > { %4970 = vmatpush3.msra.mxu0 %v2965_v25  ;;  %4956 = vmatprep.mubr.msk.f32.mxu1 %vm5426_vm1, %v7651_v60  ;;  %v4701_v47 = vpop.f32.mrf.mxu0 }
 0x441   : > { %4971 = vmatprep.subr.mxu0 %v7651_v60 }
 0x442   : > { %v2963_v56 = vpop.permute.xlu1 %2962 }
 0x443   : > { %4957 = vmatmul.mubr.msk.f32.gmra.mxu1 %vm591_vm2, %v2508_v30  ;;  %4972 = vmatpush3.msra.mxu0 %v2963_v56 }
 0x444   : > { %v6796_v49 = vpop.f32.mrf.mxu0  ;;  %4973 = vmatprep.subr.mxu0 %v7651_v60  ;;  %4959 = vmatprep.mubr.msk.f32.mxu1 %vm5426_vm1, %v7651_v60 }
 0x445   : > { %4974 = vmatpush3.msra.mxu0 %v2961_v31 }
 0x446   : > { %v4704_v39 = vpop.f32.mrf.mxu0  ;;  %v2959_v63 = vpop.permute.xlu1 %2958  ;;  %4975 = vmatprep.subr.mxu0 %v7651_v60 }
 0x447   : > { %4960 = vmatmul.mubr.msk.f32.gmra.mxu1 %vm591_vm2, %v6697_v14  ;;  %4976 = vmatpush3.msra.mxu0 %v2959_v63 }
 0x448   : > { %v6804_v51 = vpop.f32.mrf.mxu0  ;;  %4977 = vmatprep.subr.mxu0 %v7651_v60  ;;  %4962 = vmatprep.mubr.msk.f32.mxu1 %vm5426_vm1, %v7651_v60 }
 0x449   : > { %4978 = vmatpush3.msra.mxu0 %v2957_v42 }
 0x44a   : > { %v4707_v2 = vpop.f32.mrf.mxu0  ;;  %v3109_v0 = vpop.permute.xlu1 %3108  ;;  %5035 = vmatprep.subr.mxu0 %v7651_v60 }
 0x44b   : > { %4963 = vmatmul.mubr.msk.f32.gmra.mxu1 %vm591_vm2, %v2512_v43 }
 0x44c   : > { %v6811_v44 = vpop.f32.mrf.mxu0  ;;  %5003 = vmatpush3.msra.mxu1 %v3109_v0  ;;  %5014 = vmatprep.mubr.msk.f32.mxu1 %vm5426_vm1, %v7651_v60 }
 0x44d   : > { %5004 = vmatprep.subr.mxu1 %v7651_v60 }
 0x44e   : > { %v4710_v6 = vpop.f32.mrf.mxu0  ;;  %5005 = vmatpush3.msra.mxu1 %v3107_v13  ;;  %v3103_v36 = vpop.permute.xlu1 %3102  ;;  %v6874_v13 = vld [vmem:[%s7555_s3 + $0x40] sm:$0xff] }
 0x44f   : > { %5006 = vmatprep.subr.mxu1 %v7651_v60 }
 0x450   : > { %v6817_v19 = vpop.f32.mrf.mxu0  ;;  %5007 = vmatpush3.msra.mxu1 %v3105_v59 }
 0x451   : > { %5008 = vmatprep.subr.mxu1 %v7651_v60 }
 0x452   : > { %v4713_v5 = vpop.f32.mrf.mxu0  ;;  %5009 = vmatpush3.msra.mxu1 %v3103_v36  ;;  %v3099_v9 = vpop.permute.xlu1 %3098 }
 0x453   : > { %5010 = vmatprep.subr.mxu1 %v7651_v60 }
 0x454   : > { %v6821_v53 = vpop.f32.mrf.mxu0  ;;  %5011 = vmatpush3.msra.mxu1 %v3101_v23  ;;  %v6886_v23 = vld [vmem:[%s7555_s3 + $0x48] sm:$0xff] }
 0x455   : > { %5012 = vmatprep.subr.mxu1 %v7651_v60 }
 0x456   : > { %v4716_v33 = vpop.f32.mrf.mxu0  ;;  %5013 = vmatpush3.msra.mxu1 %v3099_v9 }
 0x457   : > { %5070 = vmatprep.subr.mxu1 %v7651_v60 }
 0x458   : > { %v6825_v12 = vpop.f32.mrf.mxu0 }
 0x45a   : > { %v4719_v11 = vpop.f32.mrf.mxu0  ;;  %v6827_v34 = vpop.f32.mrf.mxu1 }
 0x45c   : > { %v4736_v50 = vpop.f32.mrf.mxu1 }
 0x45e   : > { %v6829_v37 = vpop.f32.mrf.mxu1 }
 0x460   : > { %v4739_v18 = vpop.f32.mrf.mxu1 }
 0x462   : > { %v6831_v29 = vpop.f32.mrf.mxu1 }
 0x464   : > { %v4742_v48 = vpop.f32.mrf.mxu1 }
 0x466   : > { %v6833_v17 = vpop.f32.mrf.mxu1 }
 0x467   : > { %7700 = vst [vmem:[#allocation8_spill] sm:$0xff] %v6833_v17 }
 0x468   : > { %v4745_v24 = vpop.f32.mrf.mxu1 }
 0x469   : > { %v6898_v24 = vld [vmem:[%s7555_s3 + $0x50] sm:$0xff] }
 0x46a   : > { %v6835_v52 = vpop.f32.mrf.mxu1 }
 0x46b   : > { %7701 = vst [vmem:[#allocation19_spill] sm:$0xff] %v6835_v52 }
 0x46c   : > { %v4748_v61 = vpop.f32.mrf.mxu1 }
 0x46e   : > { %v6837_v21 = vpop.f32.mrf.mxu1 }
 0x46f   : > { %7702 = vst [vmem:[#allocation43_spill] sm:$0xff] %v6837_v21 }
 0x470   : > { %v4751_v10 = vpop.f32.mrf.mxu1 }
 0x472   : > { %v6839_v28 = vpop.f32.mrf.mxu1 }
 0x473   : > { %7703 = vst [vmem:[#allocation44_spill] sm:$0xff] %v6839_v28 }
 0x474   : > { %v4754_v41 = vpop.f32.mrf.mxu1 }
 0x476   : > { %v6841_v1 = vpop.f32.mrf.mxu0 }
 0x477   : > { %7704 = vst [vmem:[#allocation41_spill] sm:$0xff] %v6841_v1 }
 0x478   : > { %v4771_v20 = vpop.f32.mrf.mxu0 }
 0x4af   : > { %v6843_v35 = vpop.f32.mrf.mxu0 }
 0x4b0   : > { %7705 = vst [vmem:[#allocation22_spill] sm:$0xff] %v6843_v35 }
 0x4b1   : > { %v4774_v40 = vpop.f32.mrf.mxu0 }
 0x4b3   : > { %v6845_v45 = vpop.f32.mrf.mxu0 }
 0x4b4   : > { %7706 = vst [vmem:[#allocation24_spill] sm:$0xff] %v6845_v45 }
 0x4b5   : > { %v4777_v57 = vpop.f32.mrf.mxu0 }
 0x4b7   : > { %v6847_v55 = vpop.f32.mrf.mxu0 }
 0x4b8   : > { %7707 = vst [vmem:[#allocation42_spill] sm:$0xff] %v6847_v55 }
 0x4b9   : > { %v4780_v27 = vpop.f32.mrf.mxu0 }
 0x4ba   : > { %v6910_v27 = vld [vmem:[%s7555_s3 + $0x58] sm:$0xff] }
 0x4bb   : > { %v6849_v14 = vpop.f32.mrf.mxu0  ;;  %v6851_v8 = vpop.f32.mrf.mxu1 }
 0x4bc   : > { %7708 = vst [vmem:[#allocation25_spill] sm:$0xff] %v6849_v14  ;;  %7709 = vst [vmem:[#allocation36_spill] sm:$0xff] %v6851_v8 }
 0x4bd   : > { %v4783_v4 = vpop.f32.mrf.mxu0  ;;  %v4806_v22 = vpop.f32.mrf.mxu1 }
 0x4bf   : > { %v6853_v15 = vpop.f32.mrf.mxu0  ;;  %v6855_v31 = vpop.f32.mrf.mxu1 }
 0x4c0   : > { %7710 = vst [vmem:[#allocation45_spill] sm:$0xff] %v6853_v15  ;;  %7711 = vst [vmem:[#allocation28_spill] sm:$0xff] %v6855_v31 }
 0x4c1   : > { %v4786_v16 = vpop.f32.mrf.mxu0  ;;  %v4809_v42 = vpop.f32.mrf.mxu1 }
 0x4c3   : > { %v6857_v54 = vpop.f32.mrf.mxu0  ;;  %v6859_v30 = vpop.f32.mrf.mxu1 }
 0x4c4   : > { %7712 = vst [vmem:[#allocation7_spill] sm:$0xff] %v6857_v54  ;;  %7713 = vst [vmem:[#allocation46_spill] sm:$0xff] %v6859_v30 }
 0x4c5   : > { %v4789_v3 = vpop.f32.mrf.mxu0  ;;  %v4812_v43 = vpop.f32.mrf.mxu1 }
 0x4c7   : > { %v6866_v25 = vpop.f32.mrf.mxu1  ;;  %v2167_v47 = vpop.f32.mrf.mxu0 }
 0x4c8   : > { %7714 = vst [vmem:[#allocation31_spill] sm:$0xff] %v6866_v25  ;;  %v6869_v56 = vadd.f32 %v6864_v26, %v2167_v47 }
 0x4c9   : > { %v4815_v39 = vpop.f32.mrf.mxu1  ;;  %v4841_v63 = vpop.f32.mrf.mxu0 }
 0x4ca   : > { %v2648_v2 = vsel %vm1167_vm3, %v6869_v56, -inf  ;;  %v6923_v39 = vld [vmem:[%s7555_s3 + $0x60] sm:$0xff] }
 0x4cb   : > { %v6878_v0 = vpop.f32.mrf.mxu1  ;;  %2649 = vmax.xlane.f32.xlu0 %v2648_v2  ;;  %v2172_v59 = vpop.f32.mrf.mxu0 }
 0x4cc   : > { %7715 = vst [vmem:[#allocation4_spill] sm:$0xff] %v6878_v0  ;;  %v6881_v6 = vadd.f32 %v6874_v13, %v2172_v59 }
 0x4cd   : > { %v4818_v36 = vpop.f32.mrf.mxu1  ;;  %v4844_v5 = vpop.f32.mrf.mxu0 }
 0x4ce   : > { %v2651_v9 = vsel %vm1167_vm3, %v6881_v6, -inf }
 0x4cf   : > { %v6890_v33 = vpop.f32.mrf.mxu1  ;;  %2652 = vmax.xlane.f32.xlu1 %v2651_v9  ;;  %v2177_v11 = vpop.f32.mrf.mxu0 }
 0x4d0   : > { %7716 = vst [vmem:[#allocation47_spill] sm:$0xff] %v6890_v33  ;;  %v6893_v50 = vadd.f32 %v6886_v23, %v2177_v11 }
 0x4d1   : > { %v4821_v18 = vpop.f32.mrf.mxu1  ;;  %v4847_v48 = vpop.f32.mrf.mxu0 }
 0x4d2   : > { %v2654_v61 = vsel %vm1167_vm3, %v6893_v50, -inf  ;;  %v6938_v48 = vld [vmem:[%s7555_s3 + $0x68] sm:$0xff] }
 0x4d3   : > { %v6902_v10 = vpop.f32.mrf.mxu1  ;;  %2655 = vmax.xlane.f32.xlu0 %v2654_v61  ;;  %v2182_v41 = vpop.f32.mrf.mxu0 }
 0x4d4   : > { %7717 = vst [vmem:[#allocation34_spill] sm:$0xff] %v6902_v10  ;;  %v6905_v20 = vadd.f32 %v6898_v24, %v2182_v41 }
 0x4d5   : > { %v4824_v40 = vpop.f32.mrf.mxu1  ;;  %v4850_v57 = vpop.f32.mrf.mxu0 }
 0x4d6   : > { %v2657_v4 = vsel %vm1167_vm3, %v6905_v20, -inf }
 0x4d7   : > { %v2316_v22 = vpop.f32.mrf.mxu1  ;;  %2658 = vmax.xlane.f32.xlu0 %v2657_v4  ;;  %v2187_v16 = vpop.f32.mrf.mxu0 }
 0x4d8   : > { %v6915_v42 = vadd.f32 %v6864_v26, %v2316_v22  ;;  %v6918_v3 = vadd.f32 %v6910_v27, %v2187_v16 }
 0x4d9   : > { %v4853_v43 = vpop.f32.mrf.mxu0  ;;  %v4876_v47 = vpop.f32.mrf.mxu1 }
 0x4da   : > { %v2669_v63 = vsel %vm1167_vm3, %v6915_v42, -inf  ;;  %v2660_v2 = vsel %vm1167_vm3, %v6918_v3, -inf }
 0x4db   : > { %v2321_v59 = vpop.f32.mrf.mxu1  ;;  %2670 = vmax.xlane.f32.xlu0 %v2669_v63  ;;  %2661 = vmax.xlane.f32.xlu1 %v2660_v2  ;;  %v2192_v36 = vpop.f32.mrf.mxu0 }
 0x4dc   : > { %v6930_v5 = vadd.f32 %v6874_v13, %v2321_v59  ;;  %v6933_v9 = vadd.f32 %v6923_v39, %v2192_v36 }
 0x4dd   : > { %v4856_v11 = vpop.f32.mrf.mxu0  ;;  %v4879_v18 = vpop.f32.mrf.mxu1 }
 0x4de   : > { %v2672_v61 = vsel %vm1167_vm3, %v6930_v5, -inf  ;;  %v2663_v41 = vsel %vm1167_vm3, %v6933_v9, -inf }
 0x4df   : > { %v2326_v40 = vpop.f32.mrf.mxu1  ;;  %2673 = vmax.xlane.f32.xlu0 %v2672_v61  ;;  %2664 = vmax.xlane.f32.xlu1 %v2663_v41  ;;  %v2197_v57 = vpop.f32.mrf.mxu0 }
 0x4e0   : > { %v6945_v4 = vadd.f32 %v6886_v23, %v2326_v40  ;;  %v6948_v22 = vadd.f32 %v6938_v48, %v2197_v57 }
 0x4e1   : > { %v4859_v16 = vpop.f32.mrf.mxu0  ;;  %v4882_v43 = vpop.f32.mrf.mxu1 }
 0x4e2   : > { %v2675_v47 = vsel %vm1167_vm3, %v6945_v4, -inf  ;;  %v2666_v63 = vsel %vm1167_vm3, %v6948_v22, -inf }
 0x4e3   : > { %v2331_v2 = vpop.f32.mrf.mxu1  ;;  %2676 = vmax.xlane.f32.xlu0 %v2675_v47  ;;  %2667 = vmax.xlane.f32.xlu1 %v2666_v63  ;;  %v2465_v59 = vpop.f32.mrf.mxu0 }
 0x4e4   : > { %v6955_v36 = vadd.f32 %v6898_v24, %v2331_v2  ;;  %v6958_v11 = vadd.f32 %v6864_v26, %v2465_v59 }
 0x4e5   : > { %v4885_v18 = vpop.f32.mrf.mxu1  ;;  %v4911_v61 = vpop.f32.mrf.mxu0 }
 0x4e6   : > { %v2678_v41 = vsel %vm1167_vm3, %v6955_v36, -inf  ;;  %v2690_v40 = vsel %vm1167_vm3, %v6958_v11, -inf }
 0x4e7   : > { %v2336_v57 = vpop.f32.mrf.mxu1  ;;  %2679 = vmax.xlane.f32.xlu0 %v2678_v41  ;;  %2691 = vmax.xlane.f32.xlu1 %v2690_v40  ;;  %v2470_v16 = vpop.f32.mrf.mxu0 }
 0x4e8   : > { %v6965_v43 = vadd.f32 %v6910_v27, %v2336_v57  ;;  %v6968_v47 = vadd.f32 %v6874_v13, %v2470_v16 }
 0x4e9   : > { %v4888_v63 = vpop.f32.mrf.mxu1  ;;  %v4914_v2 = vpop.f32.mrf.mxu0 }
 0x4ea   : > { %v2681_v59 = vsel %vm1167_vm3, %v6965_v43, -inf  ;;  %v2693_v18 = vsel %vm1167_vm3, %v6968_v47, -inf }
 0x4eb   : > { %v2341_v61 = vpop.f32.mrf.mxu1  ;;  %2682 = vmax.xlane.f32.xlu0 %v2681_v59  ;;  %2694 = vmax.xlane.f32.xlu1 %v2693_v18  ;;  %v2475_v41 = vpop.f32.mrf.mxu0 }
 0x4ec   : > { %v6975_v40 = vadd.f32 %v6923_v39, %v2341_v61  ;;  %v6978_v57 = vadd.f32 %v6886_v23, %v2475_v41 }
 0x4ed   : > { %v4891_v16 = vpop.f32.mrf.mxu1  ;;  %v4917_v10 = vpop.f32.mrf.mxu0 }
 0x4ee   : > { %v2684_v63 = vsel %vm1167_vm3, %v6975_v40, -inf  ;;  %v2696_v2 = vsel %vm1167_vm3, %v6978_v57, -inf }
 0x4ef   : > { %v2346_v33 = vpop.f32.mrf.mxu1  ;;  %2685 = vmax.xlane.f32.xlu0 %v2684_v63  ;;  %2697 = vmax.xlane.f32.xlu1 %v2696_v2  ;;  %v2480_v59 = vpop.f32.mrf.mxu0 }
 0x4f0   : > { %v6985_v18 = vadd.f32 %v6938_v48, %v2346_v33  ;;  %v6988_v61 = vadd.f32 %v6898_v24, %v2480_v59 }
 0x4f1   : > { %v4894_v41 = vpop.f32.mrf.mxu1  ;;  %v4920_v0 = vpop.f32.mrf.mxu0 }
 0x4f2   : > { %v2687_v10 = vsel %vm1167_vm3, %v6985_v18, -inf  ;;  %v2699_v16 = vsel %vm1167_vm3, %v6988_v61, -inf }
 0x4f3   : > { %v2614_v25 = vpop.f32.mrf.mxu1  ;;  %2688 = vmax.xlane.f32.xlu0 %v2687_v10  ;;  %2700 = vmax.xlane.f32.xlu1 %v2699_v16  ;;  %v2485_v63 = vpop.f32.mrf.mxu0 }
 0x4f4   : > { %v6995_v2 = vadd.f32 %v6864_v26, %v2614_v25  ;;  %v6998_v33 = vadd.f32 %v6910_v27, %v2485_v63 }
 0x4f5   : > { %v4923_v59 = vpop.f32.mrf.mxu0  ;;  %v4946_v30 = vpop.f32.mrf.mxu1 }
 0x4f6   : > { %v2711_v0 = vsel %vm1167_vm3, %v6995_v2, -inf  ;;  %v2702_v41 = vsel %vm1167_vm3, %v6998_v33, -inf }
 0x4f7   : > { %v2619_v31 = vpop.f32.mrf.mxu1  ;;  %2712 = vmax.xlane.f32.xlu0 %v2711_v0  ;;  %2703 = vmax.xlane.f32.xlu1 %v2702_v41  ;;  %v2490_v10 = vpop.f32.mrf.mxu0 }
 0x4f8   : > { %v7005_v16 = vadd.f32 %v6874_v13, %v2619_v31  ;;  %v7008_v26 = vadd.f32 %v6923_v39, %v2490_v10 }
 0x4f9   : > { %v4926_v25 = vpop.f32.mrf.mxu0  ;;  %v4949_v63 = vpop.f32.mrf.mxu1 }
 0x4fa   : > { %v2714_v30 = vsel %vm1167_vm3, %v7005_v16, -inf  ;;  %v2705_v59 = vsel %vm1167_vm3, %v7008_v26, -inf }
 0x4fb   : > { %v2624_v8 = vpop.f32.mrf.mxu1  ;;  %2715 = vmax.xlane.f32.xlu0 %v2714_v30  ;;  %2706 = vmax.xlane.f32.xlu1 %v2705_v59  ;;  %v2495_v0 = vpop.f32.mrf.mxu0 }
 0x4fc   : > { %v7015_v41 = vadd.f32 %v6886_v23, %v2624_v8  ;;  %v7018_v31 = vadd.f32 %v6938_v48, %v2495_v0 }
 0x4fd   : > { %v4929_v13 = vpop.f32.mrf.mxu0  ;;  %v4952_v10 = vpop.f32.mrf.mxu1 }
 0x4fe   : > { %v2717_v25 = vsel %vm1167_vm3, %v7015_v41, -inf  ;;  %v2708_v63 = vsel %vm1167_vm3, %v7018_v31, -inf }
 0x4ff   : > { %v2629_v54 = vpop.f32.mrf.mxu1  ;;  %2718 = vmax.xlane.f32.xlu0 %v2717_v25  ;;  %2709 = vmax.xlane.f32.xlu1 %v2708_v63 }
 0x500   : > { %v7025_v30 = vadd.f32 %v6898_v24, %v2629_v54 }
 0x501   : > { %v4955_v59 = vpop.f32.mrf.mxu1 }
 0x502   : > { %v2720_v8 = vsel %vm1167_vm3, %v7025_v30, -inf }
 0x503   : > { %v2634_v23 = vpop.f32.mrf.mxu1  ;;  %2721 = vmax.xlane.f32.xlu0 %v2720_v8  ;;  %v7046_v8 = vpop.permute.xlu0 %3252 }
 0x504   : > { %v7030_v0 = vadd.f32 %v6910_v27, %v2634_v23  ;;  %v7052_v23 = vpop.permute.xlu1 %3250 }
 0x505   : > { %v4958_v13 = vpop.f32.mrf.mxu1 }
 0x506   : > { %v2723_v10 = vsel %vm1167_vm3, %v7030_v0, -inf }
 0x507   : > { %v2639_v15 = vpop.f32.mrf.mxu1  ;;  %2724 = vmax.xlane.f32.xlu1 %v2723_v10 }
 0x508   : > { %v7035_v25 = vadd.f32 %v6923_v39, %v2639_v15  ;;  %v7050_v39 = vpop.permute.xlu0 %3248  ;;  %v7056_v10 = vpop.permute.xlu1 %3246 }
 0x509   : > { %v4961_v54 = vpop.f32.mrf.mxu1 }
 0x50a   : > { %v2726_v24 = vsel %vm1167_vm3, %v7035_v25, -inf }
 0x50b   : > { %v2644_v63 = vpop.f32.mrf.mxu1  ;;  %2727 = vmax.xlane.f32.xlu0 %v2726_v24 }
 0x50c   : > { %v7044_v27 = vadd.f32 %v6938_v48, %v2644_v63  ;;  %v7054_v13 = vpop.permute.xlu0 %3244 }
 0x50d   : > { %v4964_v59 = vpop.f32.mrf.mxu1 }
 0x50e   : > { %v2729_v15 = vsel %vm1167_vm3, %v7044_v27, -inf }
 0x518   : > { %3388 = vrot.lane.b32.xlu1 %v7696_v32, %s5425_s30  ;;  %v7058_v32 = vpop.permute.xlu0 %3240 }
 0x51c   : > { %v7064_v48 = vpop.permute.xlu0 %3392 }
 0x521   : > { %3390 = vrot.lane.b32.xlu0 %v7695_v46, %s5425_s30  ;;  %v7062_v46 = vpop.permute.xlu1 %3242 }
 0x525   : > { %v7066_v54 = vpop.permute.xlu1 %3394 }
 0x53c   : > { %2730 = vmax.xlane.f32.xlu1 %v2729_v15 }
 0x54d   : > { %3386 = vrot.lane.b32.xlu1 %v7697_v62, %s5425_s30 }
 0x554   : > { %v2650_v24 = vpop.xlane.xlu0 %2649 }
 0x555   : > { %v2732_v63 = vsub.f32 %v6869_v56, %v2650_v24 }
 0x557   : > { %v2760_v59 = vmul.f32 1.442695, %v2732_v63 }
 0x558   : > { %v2653_v15 = vpop.xlane.xlu1 %2652 }
 0x559   : > { %5304 = vpow2.f32 %v2760_v59  ;;  %v2733_v14 = vsub.f32 %v6881_v6, %v2653_v15 }
 0x55b   : > { %v2762_v55 = vmul.f32 1.442695, %v2733_v14 }
 0x55c   : > { %v2656_v45 = vpop.xlane.xlu0 %2655 }
 0x55d   : > { %v2734_v35 = vsub.f32 %v6893_v50, %v2656_v45  ;;  %5306 = vpow2.f32 %v2762_v55 }
 0x55f   : > { %v2764_v1 = vmul.f32 1.442695, %v2734_v35 }
 0x560   : > { %v2659_v62 = vpop.xlane.xlu0 %2658 }
 0x561   : > { %5308 = vpow2.f32 %v2764_v1  ;;  %v2735_v28 = vsub.f32 %v6905_v20, %v2659_v62 }
 0x563   : > { %v2766_v21 = vmul.f32 1.442695, %v2735_v28 }
 0x564   : > { %v2671_v52 = vpop.xlane.xlu0 %2670  ;;  %v2662_v17 = vpop.xlane.xlu1 %2661 }
 0x565   : > { %5310 = vpow2.f32 %v2766_v21  ;;  %v2739_v56 = vsub.f32 %v6915_v42, %v2671_v52  ;;  %v2736_v24 = vsub.f32 %v6918_v3, %v2662_v17 }
 0x566   : > { %v7074_v63 = vpop.eup %5304 }
 0x567   : > { %v2768_v14 = vmul.f32 1.442695, %v2736_v24  ;;  %v2816_v45 = vsel %vm1167_vm3, %v7074_v63, 0.0  ;;  %v2774_v35 = vmul.f32 1.442695, %v2739_v56 }
 0x568   : > { %2817 = vadd.xlane.f32.xlu0 %v2816_v45  ;;  %v2674_v55 = vpop.xlane.xlu0 %2673  ;;  %v2665_v1 = vpop.xlane.xlu1 %2664 }
 0x569   : > { %v2740_v6 = vsub.f32 %v6930_v5, %v2674_v55  ;;  %v2737_v28 = vsub.f32 %v6933_v9, %v2665_v1  ;;  %5312 = vpow2.f32 %v2768_v14 }
 0x56a   : > { %5314 = vpow2.f32 %v2774_v35  ;;  %v7080_v20 = vpop.eup %5306 }
 0x56b   : > { %v2770_v21 = vmul.f32 1.442695, %v2737_v28  ;;  %v2776_v52 = vmul.f32 1.442695, %v2740_v6  ;;  %v2819_v62 = vsel %vm1167_vm3, %v7080_v20, 0.0 }
 0x56c   : > { %v2677_v50 = vpop.xlane.xlu0 %2676  ;;  %v2668_v17 = vpop.xlane.xlu1 %2667 }
 0x56d   : > { %v2738_v42 = vsub.f32 %v6948_v22, %v2668_v17  ;;  %5316 = vpow2.f32 %v2770_v21  ;;  %v2741_v45 = vsub.f32 %v6945_v4, %v2677_v50 }
 0x56e   : > { %v7083_v3 = vpop.eup %5308  ;;  %5318 = vpow2.f32 %v2776_v52 }
 0x56f   : > { %v2772_v59 = vmul.f32 1.442695, %v2738_v42  ;;  %v2822_v15 = vsel %vm1167_vm3, %v7083_v3, 0.0 }
 0x570   : > { %2823 = vadd.xlane.f32.xlu0 %v2822_v15  ;;  %v2680_v5 = vpop.xlane.xlu0 %2679  ;;  %v2692_v9 = vpop.xlane.xlu1 %2691 }
 0x571   : > { %v2746_v56 = vsub.f32 %v6958_v11, %v2692_v9  ;;  %2820 = vadd.xlane.f32.xlu1 %v2819_v62  ;;  %5320 = vpow2.f32 %v2772_v59  ;;  %v2778_v11 = vmul.f32 1.442695, %v2741_v45  ;;  %v2742_v50 = vsub.f32 %v6955_v36, %v2680_v5 }
 0x572   : > { %v7090_v24 = vpop.eup %5310 }
 0x573   : > { %v2788_v22 = vmul.f32 1.442695, %v2746_v56  ;;  %v2825_v14 = vsel %vm1167_vm3, %v7090_v24, 0.0  ;;  %v2780_v45 = vmul.f32 1.442695, %v2742_v50 }
 0x574   : > { %v2683_v35 = vpop.xlane.xlu0 %2682  ;;  %v2695_v55 = vpop.xlane.xlu1 %2694 }
 0x575   : > { %v2747_v1 = vsub.f32 %v6968_v47, %v2695_v55  ;;  %2826 = vadd.xlane.f32.xlu1 %v2825_v14  ;;  %5322 = vpow2.f32 %v2788_v22 }
 0x576   : > { %v7096_v6 = vpop.eup %5312 }
 0x577   : > { %v2790_v28 = vmul.f32 1.442695, %v2747_v1  ;;  %v2828_v52 = vsel %vm1167_vm3, %v7096_v6, 0.0  ;;  %v7100_v42 = vpop.eup %5314 }
 0x578   : > { %v2686_v21 = vpop.xlane.xlu0 %2685  ;;  %v2698_v17 = vpop.xlane.xlu1 %2697  ;;  %2829 = vadd.xlane.f32.xlu0 %v2828_v52  ;;  %v2837_v56 = vsel %vm1167_vm3, %v7100_v42, 0.0 }
 0x579   : > { %v2744_v59 = vsub.f32 %v6975_v40, %v2686_v21  ;;  %v2748_v4 = vsub.f32 %v6978_v57, %v2698_v17  ;;  %5324 = vpow2.f32 %v2790_v28  ;;  %v2743_v21 = vsub.f32 %v6965_v43, %v2683_v35 }
 0x57a   : > { %v7104_v47 = vpop.eup %5316  ;;  %5326 = vpow2.f32 %v2778_v11 }
 0x57b   : > { %v2784_v15 = vmul.f32 1.442695, %v2744_v59  ;;  %v2792_v9 = vmul.f32 1.442695, %v2748_v4  ;;  %v2831_v14 = vsel %vm1167_vm3, %v7104_v47, 0.0  ;;  %v7111_v40 = vpop.eup %5318 }
 0x57c   : > { %v2689_v62 = vpop.xlane.xlu0 %2688  ;;  %v2701_v22 = vpop.xlane.xlu1 %2700  ;;  %2838 = vadd.xlane.f32.xlu0 %v2837_v56  ;;  %2832 = vadd.xlane.f32.xlu1 %v2831_v14  ;;  %v2840_v55 = vsel %vm1167_vm3, %v7111_v40, 0.0 }
 0x57d   : > { %5328 = vpow2.f32 %v2784_v15  ;;  %v2749_v36 = vsub.f32 %v6988_v61, %v2701_v22  ;;  %v2745_v52 = vsub.f32 %v6985_v18, %v2689_v62 }
 0x57e   : > { %v7113_v57 = vpop.eup %5320  ;;  %5330 = vpow2.f32 %v2792_v9  ;;  %v2782_v9 = vmul.f32 1.442695, %v2743_v21 }
 0x57f   : > { %v2834_v28 = vsel %vm1167_vm3, %v7113_v57, 0.0  ;;  %5332 = vpow2.f32 %v2780_v45  ;;  %v2794_v17 = vmul.f32 1.442695, %v2749_v36  ;;  %v2786_v14 = vmul.f32 1.442695, %v2745_v52 }
 0x580   : > { %v2713_v5 = vpop.xlane.xlu0 %2712  ;;  %v2704_v1 = vpop.xlane.xlu1 %2703  ;;  %2841 = vadd.xlane.f32.xlu0 %v2840_v55  ;;  %2835 = vadd.xlane.f32.xlu1 %v2834_v28 }
 0x581   : > { %v2750_v56 = vsub.f32 %v6998_v33, %v2704_v1  ;;  %5334 = vpow2.f32 %v2794_v17  ;;  %v2753_v36 = vsub.f32 %v6995_v2, %v2713_v5 }
 0x582   : > { %v7120_v11 = vpop.eup %5322 }
 0x583   : > { %v2858_v4 = vsel %vm1167_vm3, %v7120_v11, 0.0  ;;  %v2796_v33 = vmul.f32 1.442695, %v2750_v56  ;;  %v2802_v17 = vmul.f32 1.442695, %v2753_v36 }
 0x584   : > { %v2716_v59 = vpop.xlane.xlu0 %2715  ;;  %v2707_v61 = vpop.xlane.xlu1 %2706  ;;  %2859 = vadd.xlane.f32.xlu1 %v2858_v4 }
 0x585   : > { %v2751_v50 = vsub.f32 %v7008_v26, %v2707_v61  ;;  %v2754_v2 = vsub.f32 %v7005_v16, %v2716_v59 }
 0x586   : > { %v7127_v15 = vpop.eup %5324 }
 0x587   : > { %v2798_v22 = vmul.f32 1.442695, %v2751_v50  ;;  %v2861_v18 = vsel %vm1167_vm3, %v7127_v15, 0.0  ;;  %v7132_v62 = vpop.eup %5326 }
 0x588   : > { %v2719_v43 = vpop.xlane.xlu0 %2718  ;;  %v2710_v35 = vpop.xlane.xlu1 %2709  ;;  %2862 = vadd.xlane.f32.xlu0 %v2861_v18  ;;  %v2843_v21 = vsel %vm1167_vm3, %v7132_v62, 0.0 }
 0x589   : > { %v2752_v45 = vsub.f32 %v7018_v31, %v2710_v35  ;;  %5336 = vpow2.f32 %v2798_v22  ;;  %v2755_v1 = vsub.f32 %v7015_v41, %v2719_v43 }
 0x58a   : > { %v7135_v26 = vpop.eup %5328  ;;  %5338 = vpow2.f32 %v2782_v9  ;;  %v2804_v9 = vmul.f32 1.442695, %v2754_v2 }
 0x58b   : > { %v2852_v55 = vsel %vm1167_vm3, %v7135_v26, 0.0  ;;  %5340 = vpow2.f32 %v2786_v14  ;;  %v2800_v28 = vmul.f32 1.442695, %v2752_v45  ;;  %v7143_v52 = vpop.eup %5330  ;;  %v2806_v5 = vmul.f32 1.442695, %v2755_v1 }
 0x58c   : > { %2853 = vadd.xlane.f32.xlu1 %v2852_v55  ;;  %v2722_v31 = vpop.xlane.xlu0 %2721  ;;  %2844 = vadd.xlane.f32.xlu0 %v2843_v21  ;;  %5342 = vpow2.f32 %v2796_v33  ;;  %v2864_v41 = vsel %vm1167_vm3, %v7143_v52, 0.0  ;;  %v7149_v50 = vpop.eup %5332 }
 0x58d   : > { %5344 = vpow2.f32 %v2800_v28  ;;  %v2756_v61 = vsub.f32 %v7025_v30, %v2722_v31  ;;  %v2846_v16 = vsel %vm1167_vm3, %v7149_v50, 0.0 }
 0x58e   : > { %5346 = vpow2.f32 %v2802_v17  ;;  %v7154_v59 = vpop.eup %5334 }
 0x58f   : > { %5348 = vpow2.f32 %v2806_v5  ;;  %v2808_v22 = vmul.f32 1.442695, %v2756_v61 }
 0x590   : > { %v2725_v4 = vpop.xlane.xlu1 %2724  ;;  %2865 = vadd.xlane.f32.xlu0 %v2864_v41  ;;  %5350 = vpow2.f32 %v2804_v9 }
 0x591   : > { %v2757_v56 = vsub.f32 %v7030_v0, %v2725_v4  ;;  %5352 = vpow2.f32 %v2808_v22  ;;  %v2867_v0 = vsel %vm1167_vm3, %v7154_v59, 0.0 }
 0x593   : > { %v2810_v18 = vmul.f32 1.442695, %v2757_v56 }
 0x594   : > { %v2728_v14 = vpop.xlane.xlu0 %2727  ;;  %2847 = vadd.xlane.f32.xlu0 %v2846_v16 }
 0x595   : > { %v2758_v30 = vsub.f32 %v7035_v25, %v2728_v14  ;;  %5354 = vpow2.f32 %v2810_v18  ;;  %v7205_v18 = vpop.permute.xlu1 %3388 }
 0x596   : > { %v7157_v43 = vpop.eup %5336 }
 0x597   : > { %v7159_v35 = vpop.eup %5338  ;;  %v2812_v45 = vmul.f32 1.442695, %v2758_v30  ;;  %v2873_v36 = vsel %vm1167_vm3, %v7157_v43, 0.0 }
 0x598   : > { %v7165_v33 = vpop.eup %5340  ;;  %2868 = vadd.xlane.f32.xlu0 %v2867_v0  ;;  %2874 = vadd.xlane.f32.xlu1 %v2873_v36  ;;  %v2849_v55 = vsel %vm1167_vm3, %v7159_v35, 0.0 }
 0x599   : > { %v7167_v25 = vpop.eup %5342  ;;  %5356 = vpow2.f32 %v2812_v45  ;;  %v2855_v1 = vsel %vm1167_vm3, %v7165_v33, 0.0 }
 0x59a   : > { %v7173_v28 = vpop.eup %5344  ;;  %v2870_v31 = vsel %vm1167_vm3, %v7167_v25, 0.0 }
 0x59b   : > { %v7175_v21 = vpop.eup %5346  ;;  %v2876_v17 = vsel %vm1167_vm3, %v7173_v28, 0.0 }
 0x59c   : > { %2850 = vadd.xlane.f32.xlu0 %v2849_v55  ;;  %2856 = vadd.xlane.f32.xlu1 %v2855_v1  ;;  %v7181_v2 = vpop.eup %5348  ;;  %v2879_v41 = vsel %vm1167_vm3, %v7175_v21, 0.0 }
 0x59d   : > { %v7183_v5 = vpop.eup %5350  ;;  %v2885_v61 = vsel %vm1167_vm3, %v7181_v2, 0.0 }
 0x59e   : > { %v7189_v4 = vpop.eup %5352  ;;  %v2882_v22 = vsel %vm1167_vm3, %v7183_v5, 0.0 }
 0x59f   : > { %v2888_v56 = vsel %vm1167_vm3, %v7189_v4, 0.0 }
 0x5a0   : > { %2871 = vadd.xlane.f32.xlu0 %v2870_v31  ;;  %2877 = vadd.xlane.f32.xlu1 %v2876_v17  ;;  %v7212_v31 = vpop.permute.xlu0 %3390 }
 0x5a2   : > { %v7191_v9 = vpop.eup %5354 }
 0x5a3   : > { %v2891_v30 = vsel %vm1167_vm3, %v7191_v9, 0.0 }
 0x5a4   : > { %2886 = vadd.xlane.f32.xlu0 %v2885_v61  ;;  %2880 = vadd.xlane.f32.xlu1 %v2879_v41 }
 0x5a6   : > { %v7197_v14 = vpop.eup %5356 }
 0x5a7   : > { %v2894_v16 = vsel %vm1167_vm3, %v7197_v14, 0.0 }
 0x5a8   : > { %2889 = vadd.xlane.f32.xlu0 %v2888_v56  ;;  %2883 = vadd.xlane.f32.xlu1 %v2882_v22 }
 0x5ac   : > { %2895 = vadd.xlane.f32.xlu0 %v2894_v16  ;;  %2892 = vadd.xlane.f32.xlu1 %v2891_v30 }
 0x5bd   : > { %3384 = vrot.lane.b32.xlu1 %v7698_v38, %s5425_s30 }
 0x5c5   : > { %v2731_v45 = vpop.xlane.xlu1 %2730 }
 0x5c6   : > { %v2759_v0 = vsub.f32 %v7044_v27, %v2731_v45 }
 0x5c8   : > { %v2814_v36 = vmul.f32 1.442695, %v2759_v0 }
 0x5c9   : > { %v7216_v38 = vpop.permute.xlu1 %3386 }
 0x5ca   : > { %5358 = vpow2.f32 %v2814_v36 }
 0x5d7   : > { %v7208_v55 = vpop.eup %5358 }
 0x5d8   : > { %v2897_v1 = vsel %vm1167_vm3, %v7208_v55, 0.0 }
 0x5d9   : > { %2898 = vadd.xlane.f32.xlu0 %v2897_v1 }
 0x5ef   : > { %3382 = vrot.lane.b32.xlu0 %v7699_v58, %s5425_s30 }
 0x5f1   : > { %v2818_v17 = vpop.xlane.xlu0 %2817 }
 0x5f2   : > { %5360 = vrcp.f32 %v2818_v17 }
 0x5f9   : > { %v2824_v41 = vpop.xlane.xlu0 %2823 }
 0x5fa   : > { %v2821_v61 = vpop.xlane.xlu1 %2820 }
 0x5fb   : > { %5362 = vrcp.f32 %v2821_v61 }
 0x5fc   : > { %5364 = vrcp.f32 %v2824_v41 }
 0x5fe   : > { %v2827_v56 = vpop.xlane.xlu1 %2826 }
 0x5ff   : > { %v5361_v27 = vpop.eup %5360  ;;  %5366 = vrcp.f32 %v2827_v56 }
 0x600   : > { %v2928_v22 = vmul.f32 %v5361_v27, %v7074_v63 }
 0x601   : > { %v2830_v16 = vpop.xlane.xlu0 %2829 }
 0x602   : > { %4980 = vmatmul.mubr.msk.f32.vlgmr.msra.gmra.mxu0 %vm1167_vm3, %v2928_v22  ;;  %5368 = vrcp.f32 %v2830_v16 }
 0x603   : > { %5036 = vmatpush3.msra.mxu0 %v7046_v8  ;;  %4982 = vmatprep.mubr.msk.f32.mxu0 %vm5426_vm1, %v7651_v60 }
 0x604   : > { %5037 = vmatprep.subr.mxu0 %v7651_v60 }
 0x605   : > { %5038 = vmatpush3.msra.mxu0 %v7052_v23  ;;  %v2839_v58 = vpop.xlane.xlu0 %2838  ;;  %v2833_v30 = vpop.xlane.xlu1 %2832 }
 0x606   : > { %5039 = vmatprep.subr.mxu0 %v7651_v60  ;;  %5370 = vrcp.f32 %v2839_v58 }
 0x607   : > { %5040 = vmatpush3.msra.mxu0 %v7050_v39  ;;  %5372 = vrcp.f32 %v2833_v30 }
 0x608   : > { %v5363_v63 = vpop.eup %5362  ;;  %5041 = vmatprep.subr.mxu0 %v7651_v60 }
 0x609   : > { %5042 = vmatpush3.msra.mxu0 %v7056_v10  ;;  %v2929_v8 = vmul.f32 %v5363_v63, %v7080_v20  ;;  %v2842_v45 = vpop.xlane.xlu0 %2841  ;;  %v2836_v23 = vpop.xlane.xlu1 %2835 }
 0x60a   : > { %5043 = vmatprep.subr.mxu0 %v7651_v60  ;;  %v5365_v0 = vpop.eup %5364  ;;  %5374 = vrcp.f32 %v2842_v45 }
 0x60b   : > { %5044 = vmatpush3.msra.mxu0 %v7054_v13  ;;  %5376 = vrcp.f32 %v2836_v23  ;;  %v2930_v39 = vmul.f32 %v5365_v0, %v7083_v3 }
 0x60c   : > { %4983 = vmatmul.mubr.msk.f32.gmra.mxu0 %vm1167_vm3, %v2929_v8  ;;  %5045 = vmatprep.subr.mxu0 %v7651_v60  ;;  %v5367_v10 = vpop.eup %5366 }
 0x60d   : > { %5046 = vmatpush3.msra.mxu0 %v7062_v46  ;;  %4985 = vmatprep.mubr.msk.f32.mxu0 %vm5426_vm1, %v7651_v60  ;;  %v2860_v20 = vpop.xlane.xlu1 %2859  ;;  %v2931_v46 = vmul.f32 %v5367_v10, %v7090_v24 }
 0x60e   : > { %5047 = vmatprep.subr.mxu0 %v7651_v60  ;;  %5378 = vrcp.f32 %v2860_v20 }
 0x60f   : > { %5048 = vmatpush3.msra.mxu0 %v7058_v32  ;;  %v5369_v36 = vpop.eup %5368 }
 0x610   : > { %4986 = vmatmul.mubr.msk.f32.gmra.mxu0 %vm1167_vm3, %v2930_v39  ;;  %v2932_v3 = vmul.f32 %v5369_v36, %v7096_v6 }
 0x611   : > { %4988 = vmatprep.mubr.msk.f32.mxu0 %vm5426_vm1, %v7651_v60  ;;  %v2863_v13 = vpop.xlane.xlu0 %2862 }
 0x612   : > { %5380 = vrcp.f32 %v2863_v13 }
 0x613   : > { %v5371_v1 = vpop.eup %5370 }
 0x614   : > { %4989 = vmatmul.mubr.msk.f32.gmra.mxu0 %vm1167_vm3, %v2931_v46  ;;  %v2935_v17 = vmul.f32 %v5371_v1, %v7100_v42  ;;  %v5373_v61 = vpop.eup %5372 }
 0x615   : > { %4991 = vmatprep.mubr.msk.f32.mxu0 %vm5426_vm1, %v7651_v60  ;;  %v2845_v32 = vpop.xlane.xlu0 %2844  ;;  %v2933_v6 = vmul.f32 %v5373_v61, %v7104_v47 }
 0x616   : > { %5382 = vrcp.f32 %v2845_v32  ;;  %5015 = vmatmul.mubr.msk.f32.vlgmr.msra.gmra.mxu1 %vm1167_vm3, %v2935_v17 }
 0x617   : > { %v5375_v41 = vpop.eup %5374  ;;  %5071 = vmatpush3.msra.mxu1 %v7066_v54  ;;  %5017 = vmatprep.mubr.msk.f32.mxu1 %vm5426_vm1, %v7651_v60 }
 0x618   : > { %4992 = vmatmul.mubr.msk.f32.gmra.mxu0 %vm1167_vm3, %v2932_v3  ;;  %5072 = vmatprep.subr.mxu1 %v7651_v60  ;;  %v2936_v24 = vmul.f32 %v5375_v41, %v7111_v40  ;;  %v5377_v27 = vpop.eup %5376 }
 0x619   : > { %5073 = vmatpush3.msra.mxu1 %v7064_v48  ;;  %v2866_v42 = vpop.xlane.xlu0 %2865  ;;  %4994 = vmatprep.mubr.msk.f32.mxu0 %vm5426_vm1, %v7651_v60  ;;  %v2854_v48 = vpop.xlane.xlu1 %2853  ;;  %v2934_v47 = vmul.f32 %v5377_v27, %v7113_v57 }
 0x61a   : > { %5074 = vmatprep.subr.mxu1 %v7651_v60  ;;  %5384 = vrcp.f32 %v2866_v42  ;;  %5018 = vmatmul.mubr.msk.f32.gmra.mxu1 %vm1167_vm3, %v2936_v24 }
 0x61b   : > { %5075 = vmatpush3.msra.mxu1 %v7212_v31  ;;  %5020 = vmatprep.mubr.msk.f32.mxu1 %vm5426_vm1, %v7651_v60  ;;  %v5379_v40 = vpop.eup %5378 }
 0x61c   : > { %4995 = vmatmul.mubr.msk.f32.gmra.mxu0 %vm1167_vm3, %v2933_v6  ;;  %5076 = vmatprep.subr.mxu1 %v7651_v60 }
 0x61d   : > { %4997 = vmatprep.mubr.msk.f32.mxu0 %vm5426_vm1, %v7651_v60  ;;  %5077 = vmatpush3.msra.mxu1 %v7205_v18  ;;  %v2848_v54 = vpop.xlane.xlu0 %2847  ;;  %v2942_v18 = vmul.f32 %v5379_v40, %v7120_v11 }
 0x61e   : > { %5386 = vrcp.f32 %v2848_v54  ;;  %5078 = vmatprep.subr.mxu1 %v7651_v60 }
 0x61f   : > { %5079 = vmatpush3.msra.mxu1 %v7216_v38  ;;  %v5381_v56 = vpop.eup %5380 }
 0x620   : > { %4998 = vmatmul.mubr.msk.f32.gmra.mxu0 %vm1167_vm3, %v2934_v47  ;;  %5080 = vmatprep.subr.mxu1 %v7651_v60  ;;  %v2943_v30 = vmul.f32 %v5381_v56, %v7127_v15  ;;  %v3666_v56 = vld [vmem:[%s7554_s2 + $0x10] sm:$0xff] }
 0x621   : > { %5049 = vmatprep.mubr.msk.f32.mxu0 %vm5426_vm1, %v7651_v60  ;;  %v2869_v31 = vpop.xlane.xlu0 %2868  ;;  %v2875_v57 = vpop.xlane.xlu1 %2874 }
 0x622   : > { %5388 = vrcp.f32 %v2869_v31 }
 0x623   : > { %v5383_v22 = vpop.eup %5382 }
 0x624   : > { %5050 = vmatmul.mubr.msk.f32.vlgmr.msra.gmra.mxu0 %vm1167_vm3, %v2942_v18  ;;  %v2937_v16 = vmul.f32 %v5383_v22, %v7132_v62  ;;  %v3665_v22 = vld [vmem:[%s7554_s2 + $0x8] sm:$0xff] }
 0x625   : > { %5052 = vmatprep.mubr.msk.f32.mxu0 %vm5426_vm1, %v7651_v60  ;;  %v2851_v38 = vpop.xlane.xlu0 %2850  ;;  %v2857_v58 = vpop.xlane.xlu1 %2856 }
 0x626   : > { %5390 = vrcp.f32 %v2851_v38  ;;  %5021 = vmatmul.mubr.msk.f32.gmra.mxu1 %vm1167_vm3, %v2937_v16  ;;  %v3664_v16 = vld [vmem:[%s7554_s2] sm:$0xff] }
 0x627   : > { %v5385_v11 = vpop.eup %5384  ;;  %5023 = vmatprep.mubr.msk.f32.mxu1 %vm5426_vm1, %v7651_v60  ;;  %5392 = vrcp.f32 %v2854_v48 }
 0x628   : > { %5053 = vmatmul.mubr.msk.f32.gmra.mxu0 %vm1167_vm3, %v2943_v30  ;;  %v2944_v62 = vmul.f32 %v5385_v11, %v7143_v52 }
 0x629   : > { %5055 = vmatprep.mubr.msk.f32.mxu0 %vm5426_vm1, %v7651_v60  ;;  %v2872_v63 = vpop.xlane.xlu0 %2871  ;;  %v2878_v8 = vpop.xlane.xlu1 %2877 }
 0x62a   : > { %5394 = vrcp.f32 %v2872_v63 }
 0x62b   : > { %v5387_v45 = vpop.eup %5386  ;;  %5396 = vrcp.f32 %v2875_v57  ;;  %v3667_v57 = vld [vmem:[%s7554_s2 + $0x18] sm:$0xff] }
 0x62c   : > { %5056 = vmatmul.mubr.msk.f32.gmra.mxu0 %vm1167_vm3, %v2944_v62  ;;  %5398 = vrcp.f32 %v2857_v58  ;;  %v2938_v15 = vmul.f32 %v5387_v45, %v7149_v50 }
 0x62d   : > { %5058 = vmatprep.mubr.msk.f32.mxu0 %vm5426_vm1, %v7651_v60  ;;  %v2881_v23 = vpop.xlane.xlu1 %2880  ;;  %5400 = vrcp.f32 %v2878_v8 }
 0x62e   : > { %5024 = vmatmul.mubr.msk.f32.gmra.mxu1 %vm1167_vm3, %v2938_v15  ;;  %5402 = vrcp.f32 %v2881_v23 }
 0x62f   : > { %v5389_v0 = vpop.eup %5388  ;;  %5026 = vmatprep.mubr.msk.f32.mxu1 %vm5426_vm1, %v7651_v60 }
 0x630   : > { %v2945_v52 = vmul.f32 %v5389_v0, %v7154_v59 }
 0x631   : > { %v2884_v39 = vpop.xlane.xlu1 %2883 }
 0x632   : > { %5059 = vmatmul.mubr.msk.f32.gmra.mxu0 %vm1167_vm3, %v2945_v52  ;;  %5404 = vrcp.f32 %v2884_v39 }
 0x633   : > { %v5391_v10 = vpop.eup %5390  ;;  %5061 = vmatprep.mubr.msk.f32.mxu0 %vm5426_vm1, %v7651_v60 }
 0x634   : > { %v2939_v50 = vmul.f32 %v5391_v10, %v7159_v35  ;;  %v5393_v20 = vpop.eup %5392 }
 0x635   : > { %v2893_v13 = vpop.xlane.xlu1 %2892  ;;  %v2940_v59 = vmul.f32 %v5393_v20, %v7135_v26 }
 0x636   : > { %5027 = vmatmul.mubr.msk.f32.gmra.mxu1 %vm1167_vm3, %v2939_v50 }
 0x637   : > { %v5395_v46 = vpop.eup %5394  ;;  %5029 = vmatprep.mubr.msk.f32.mxu1 %vm5426_vm1, %v7651_v60 }
 0x638   : > { %v5397_v36 = vpop.eup %5396  ;;  %v2946_v1 = vmul.f32 %v5395_v46, %v7167_v25 }
 0x639   : > { %v5399_v17 = vpop.eup %5398  ;;  %v3385_v32 = vpop.permute.xlu1 %3384  ;;  %v2947_v3 = vmul.f32 %v5397_v36, %v7157_v43 }
 0x63a   : > { %5030 = vmatmul.mubr.msk.f32.gmra.mxu1 %vm1167_vm3, %v2940_v59  ;;  %5062 = vmatmul.mubr.msk.f32.gmra.mxu0 %vm1167_vm3, %v2946_v1  ;;  %v2941_v35 = vmul.f32 %v5399_v17, %v7165_v33  ;;  %v5401_v26 = vpop.eup %5400  ;;  %v2887_v33 = vpop.xlane.xlu0 %2886 }
 0x63b   : > { %5081 = vmatpush3.msra.mxu1 %v3385_v32  ;;  %5032 = vmatprep.mubr.msk.f32.mxu1 %vm5426_vm1, %v7651_v60  ;;  %v2948_v25 = vmul.f32 %v5401_v26, %v7173_v28  ;;  %5406 = vrcp.f32 %v2887_v33  ;;  %v5403_v24 = vpop.eup %5402 }
 0x63c   : > { %5064 = vmatprep.mubr.msk.f32.mxu0 %vm5426_vm1, %v7651_v60  ;;  %5082 = vmatprep.subr.mxu1 %v7651_v60  ;;  %v2949_v42 = vmul.f32 %v5403_v24, %v7175_v21 }
 0x63e   : > { %5033 = vmatmul.mubr.msk.f32.gmra.mxu1 %vm1167_vm3, %v2941_v35  ;;  %5065 = vmatmul.mubr.msk.f32.gmra.mxu0 %vm1167_vm3, %v2947_v3  ;;  %v2890_v43 = vpop.xlane.xlu0 %2889 }
 0x63f   : > { %5067 = vmatprep.mubr.msk.f32.mxu0 %vm5426_vm1, %v7651_v60  ;;  %5084 = vmatprep.mubr.msk.f32.mxu1 %vm5426_vm1, %v7651_v60  ;;  %5408 = vrcp.f32 %v2890_v43  ;;  %v5405_v27 = vpop.eup %5404 }
 0x640   : > { %5410 = vrcp.f32 %v2893_v13  ;;  %v2950_v28 = vmul.f32 %v5405_v27, %v7183_v5 }
 0x642   : > { %5068 = vmatmul.mubr.msk.f32.gmra.mxu0 %vm1167_vm3, %v2948_v25  ;;  %v2896_v61 = vpop.xlane.xlu0 %2895 }
 0x643   : > { %5412 = vrcp.f32 %v2896_v61 }
 0x648   : > { %v5407_v48 = vpop.eup %5406 }
 0x649   : > { %v2951_v21 = vmul.f32 %v5407_v48, %v7181_v2 }
 0x64c   : > { %v5409_v54 = vpop.eup %5408 }
 0x64d   : > { %v2952_v47 = vmul.f32 %v5409_v54, %v7189_v4  ;;  %v5411_v40 = vpop.eup %5410 }
 0x64e   : > { %v2953_v5 = vmul.f32 %v5411_v40, %v7191_v9  ;;  %v3671_v9 = vld [vmem:[%s7554_s2 + $0x38] sm:$0xff] }
 0x64f   : > { %5105 = vmatprep.subr.mxu0 %v3671_v9 }
 0x650   : > { %v5413_v18 = vpop.eup %5412  ;;  %5106 = vmatpush3.msra.mxu0 %v3671_v9 }
 0x651   : > { %v2954_v2 = vmul.f32 %v5413_v18, %v7197_v14  ;;  %v3670_v14 = vld [vmem:[%s7554_s2 + $0x30] sm:$0xff] }
 0x652   : > { %5107 = vmatprep.subr.mxu0 %v3670_v14 }
 0x653   : > { %5108 = vmatpush3.msra.mxu0 %v3670_v14 }
 0x662   : > { %v2899_v41 = vpop.xlane.xlu0 %2898 }
 0x663   : > { %5414 = vrcp.f32 %v2899_v41 }
 0x666   : > { %v3383_v6 = vpop.permute.xlu0 %3382 }
 0x667   : > { %5083 = vmatpush3.msra.mxu1 %v3383_v6 }
 0x668   : > { %5085 = vmatmul.mubr.msk.f32.vlgmr.msra.gmra.mxu1 %vm1167_vm3, %v2949_v42 }
 0x669   : > { %5087 = vmatprep.mubr.msk.f32.mxu1 %vm5426_vm1, %v7651_v60 }
 0x66c   : > { %5088 = vmatmul.mubr.msk.f32.gmra.mxu1 %vm1167_vm3, %v2950_v28 }
 0x66d   : > { %5090 = vmatprep.mubr.msk.f32.mxu1 %vm5426_vm1, %v7651_v60 }
 0x670   : > { %5091 = vmatmul.mubr.msk.f32.gmra.mxu1 %vm1167_vm3, %v2951_v21  ;;  %v5415_v31 = vpop.eup %5414 }
 0x671   : > { %5093 = vmatprep.mubr.msk.f32.mxu1 %vm5426_vm1, %v7651_v60  ;;  %v2955_v4 = vmul.f32 %v5415_v31, %v7208_v55  ;;  %v3668_v55 = vld [vmem:[%s7554_s2 + $0x20] sm:$0xff] }
 0x674   : > { %5094 = vmatmul.mubr.msk.f32.gmra.mxu1 %vm1167_vm3, %v2952_v47 }
 0x675   : > { %5096 = vmatprep.mubr.msk.f32.mxu1 %vm5426_vm1, %v7651_v60 }
 0x678   : > { %5097 = vmatmul.mubr.msk.f32.gmra.mxu1 %vm1167_vm3, %v2953_v5 }
 0x679   : > { %5099 = vmatprep.mubr.msk.f32.mxu1 %vm5426_vm1, %v7651_v60 }
 0x67c   : > { %5100 = vmatmul.mubr.msk.f32.gmra.mxu1 %vm1167_vm3, %v2954_v2 }
 0x67d   : > { %5102 = vmatprep.mubr.msk.f32.mxu1 %vm5426_vm1, %v7651_v60  ;;  %v3669_v60 = vld [vmem:[%s7554_s2 + $0x28] sm:$0xff] }
 0x67e   : > { %5109 = vmatprep.subr.mxu0 %v3669_v60 }
 0x67f   : > { %5110 = vmatpush3.msra.mxu0 %v3669_v60 }
 0x680   : > { %5103 = vmatmul.mubr.msk.f32.gmra.mxu1 %vm1167_vm3, %v2955_v4  ;;  %5111 = vmatprep.subr.mxu0 %v3668_v55 }
 0x681   : > { %5112 = vmatpush3.msra.mxu0 %v3668_v55 }
 0x682   : > { %5113 = vmatprep.subr.mxu0 %v3667_v57 }
 0x683   : > { %5114 = vmatpush3.msra.mxu0 %v3667_v57 }
 0x684   : > { %5115 = vmatprep.subr.mxu0 %v3666_v56 }
 0x685   : > { %5116 = vmatpush3.msra.mxu0 %v3666_v56 }
 0x686   : > { %5117 = vmatprep.subr.mxu0 %v3665_v22 }
 0x687   : > { %5118 = vmatpush3.msra.mxu0 %v3665_v22 }
 0x688   : > { %5119 = vmatprep.subr.mxu0 %v3664_v16 }
 0x689   : > { %5120 = vmatpush3.msra.mxu0 %v3664_v16 }
 0x6c2   : > { %v3064_v38 = vpop.f32.mrf.mxu0 }
 0x6c3   : > { %3552 = vrot.lane.b32.xlu1 %v3064_v38, %s5428_s22 }
 0x6c4   : > { %v4981_v58 = vpop.f32.mrf.mxu0 }
 0x6cc   : > { %v3069_v30 = vpop.f32.mrf.mxu0 }
 0x6cd   : > { %3554 = vrot.lane.b32.xlu1 %v3069_v30, %s5428_s22 }
 0x6ce   : > { %v4984_v11 = vpop.f32.mrf.mxu0 }
 0x6d0   : > { %v3074_v62 = vpop.f32.mrf.mxu0 }
 0x6d1   : > { %3556 = vrot.lane.b32.xlu1 %v3074_v62, %s5428_s22 }
 0x6d2   : > { %v4987_v63 = vpop.f32.mrf.mxu0 }
 0x6d4   : > { %v3079_v8 = vpop.f32.mrf.mxu0 }
 0x6d5   : > { %3558 = vrot.lane.b32.xlu1 %v3079_v8, %s5428_s22 }
 0x6d6   : > { %v4990_v45 = vpop.f32.mrf.mxu0  ;;  %v3206_v15 = vpop.f32.mrf.mxu1 }
 0x6d8   : > { %v3084_v23 = vpop.f32.mrf.mxu0  ;;  %v5016_v0 = vpop.f32.mrf.mxu1 }
 0x6d9   : > { %3560 = vrot.lane.b32.xlu1 %v3084_v23, %s5428_s22 }
 0x6da   : > { %v4993_v52 = vpop.f32.mrf.mxu0  ;;  %v3211_v39 = vpop.f32.mrf.mxu1 }
 0x6dc   : > { %v3089_v10 = vpop.f32.mrf.mxu0  ;;  %v5019_v50 = vpop.f32.mrf.mxu1 }
 0x6dd   : > { %3562 = vrot.lane.b32.xlu1 %v3089_v10, %s5428_s22 }
 0x6de   : > { %v4996_v20 = vpop.f32.mrf.mxu0 }
 0x6e0   : > { %v3094_v13 = vpop.f32.mrf.mxu0 }
 0x6e1   : > { %3566 = vrot.lane.b32.xlu1 %v3206_v15, %s5428_s22  ;;  %3564 = vrot.lane.b32.xlu0 %v3094_v13, %s5428_s22  ;;  %v7718_v13 = vld [vmem:[#allocation8_spill] sm:$0xff] }
 0x6e2   : > { %v4999_v46 = vpop.f32.mrf.mxu0 }
 0x6e4   : > { %v3348_v36 = vpop.f32.mrf.mxu0 }
 0x6e5   : > { %3568 = vrot.lane.b32.xlu0 %v3211_v39, %s5428_s22 }
 0x6e6   : > { %v5051_v59 = vpop.f32.mrf.mxu0  ;;  %v3216_v1 = vpop.f32.mrf.mxu1 }
 0x6e7   : > { %3570 = vrot.lane.b32.xlu1 %v3216_v1, %s5428_s22  ;;  %v7720_v1 = vld [vmem:[#allocation43_spill] sm:$0xff] }
 0x6e8   : > { %v3353_v17 = vpop.f32.mrf.mxu0  ;;  %v5022_v32 = vpop.f32.mrf.mxu1 }
 0x6ea   : > { %v5054_v35 = vpop.f32.mrf.mxu0 }
 0x6eb   : > { %v7721_v35 = vld [vmem:[#allocation44_spill] sm:$0xff] }
 0x6ec   : > { %v3358_v3 = vpop.f32.mrf.mxu0 }
 0x6ee   : > { %v5057_v26 = vpop.f32.mrf.mxu0  ;;  %v3221_v25 = vpop.f32.mrf.mxu1 }
 0x6ef   : > { %3572 = vrot.lane.b32.xlu0 %v3221_v25, %s5428_s22  ;;  %v7722_v26 = vld [vmem:[#allocation41_spill] sm:$0xff] }
 0x6f0   : > { %v5025_v33 = vpop.f32.mrf.mxu1 }
 0x6f2   : > { %v3363_v43 = vpop.f32.mrf.mxu0 }
 0x6f4   : > { %v5060_v61 = vpop.f32.mrf.mxu0 }
 0x6f5   : > { %v7723_v61 = vld [vmem:[#allocation22_spill] sm:$0xff] }
 0x6f6   : > { %v3226_v41 = vpop.f32.mrf.mxu1 }
 0x6f7   : > { %3574 = vrot.lane.b32.xlu1 %v3226_v41, %s5428_s22 }
 0x6f8   : > { %v5028_v24 = vpop.f32.mrf.mxu1 }
 0x6f9   : > { %v7724_v24 = vld [vmem:[#allocation24_spill] sm:$0xff] }
 0x6fa   : > { %v3231_v42 = vpop.f32.mrf.mxu1  ;;  %v3368_v6 = vpop.f32.mrf.mxu0 }
 0x6fb   : > { %3576 = vrot.lane.b32.xlu0 %v3231_v42, %s5428_s22 }
 0x6fc   : > { %v5031_v27 = vpop.f32.mrf.mxu1  ;;  %v5063_v28 = vpop.f32.mrf.mxu0 }
 0x6fd   : > { %v7725_v28 = vld [vmem:[#allocation42_spill] sm:$0xff] }
 0x6fe   : > { %v3236_v48 = vpop.f32.mrf.mxu1  ;;  %v3373_v21 = vpop.f32.mrf.mxu0 }
 0x6ff   : > { %3578 = vrot.lane.b32.xlu1 %v3236_v48, %s5428_s22  ;;  %3580 = vrot.lane.b32.xlu0 %v3348_v36, %s5428_s22  ;;  %v7719_v36 = vld [vmem:[#allocation19_spill] sm:$0xff] }
 0x700   : > { %v5034_v54 = vpop.f32.mrf.mxu1  ;;  %v5066_v47 = vpop.f32.mrf.mxu0 }
 0x702   : > { %v3378_v40 = vpop.f32.mrf.mxu0 }
 0x703   : > { %3582 = vrot.lane.b32.xlu1 %v3353_v17, %s5428_s22  ;;  %3584 = vrot.lane.b32.xlu0 %v3358_v3, %s5428_s22 }
 0x704   : > { %v5069_v5 = vpop.f32.mrf.mxu0 }
 0x705   : > { %v7727_v5 = vld [vmem:[#allocation45_spill] sm:$0xff] }
 0x707   : > { %3586 = vrot.lane.b32.xlu1 %v3363_v43, %s5428_s22  ;;  %3588 = vrot.lane.b32.xlu0 %v3368_v6, %s5428_s22 }
 0x70b   : > { %3590 = vrot.lane.b32.xlu1 %v3373_v21, %s5428_s22  ;;  %3592 = vrot.lane.b32.xlu0 %v3378_v40, %s5428_s22  ;;  %v7726_v21 = vld [vmem:[#allocation25_spill] sm:$0xff] }
 0x728   : > { %v3490_v18 = vpop.f32.mrf.mxu1 }
 0x729   : > { %3594 = vrot.lane.b32.xlu1 %v3490_v18, %s5428_s22 }
 0x72a   : > { %v5086_v2 = vpop.f32.mrf.mxu1 }
 0x72b   : > { %v7728_v2 = vld [vmem:[#allocation7_spill] sm:$0xff] }
 0x72c   : > { %v3495_v31 = vpop.f32.mrf.mxu1 }
 0x72d   : > { %3596 = vrot.lane.b32.xlu0 %v3495_v31, %s5428_s22 }
 0x72e   : > { %v5089_v4 = vpop.f32.mrf.mxu1 }
 0x730   : > { %v3500_v9 = vpop.f32.mrf.mxu1 }
 0x731   : > { %3598 = vrot.lane.b32.xlu1 %v3500_v9, %s5428_s22  ;;  %v7729_v9 = vld [vmem:[#allocation36_spill] sm:$0xff] }
 0x732   : > { %v5092_v14 = vpop.f32.mrf.mxu1 }
 0x734   : > { %v3505_v60 = vpop.f32.mrf.mxu1 }
 0x735   : > { %v3553_v55 = vpop.permute.xlu1 %3552  ;;  %3600 = vrot.lane.b32.xlu0 %v3505_v60, %s5428_s22 }
 0x736   : > { %v3636_v57 = vsel %vm591_vm2, %v6787_v7, %v3553_v55  ;;  %v5095_v56 = vpop.f32.mrf.mxu1  ;;  %v7730_v55 = vld [vmem:[#allocation28_spill] sm:$0xff] }
 0x737   : > { %5121 = vmatprep.mubr.msk.f32.mxu0 %vm245_vm0, %v3636_v57 }
 0x738   : > { %v3510_v22 = vpop.f32.mrf.mxu1 }
 0x739   : > { %3602 = vrot.lane.b32.xlu1 %v3510_v22, %s5428_s22  ;;  %v7731_v22 = vld [vmem:[#allocation46_spill] sm:$0xff] }
 0x73a   : > { %v5098_v16 = vpop.f32.mrf.mxu1 }
 0x73c   : > { %v3515_v38 = vpop.f32.mrf.mxu1 }
 0x73d   : > { %3604 = vrot.lane.b32.xlu0 %v3515_v38, %s5428_s22 }
 0x73e   : > { %v5101_v58 = vpop.f32.mrf.mxu1 }
 0x73f   : > { %v3555_v30 = vpop.permute.xlu1 %3554  ;;  %v7732_v58 = vld [vmem:[#allocation31_spill] sm:$0xff] }
 0x740   : > { %v3637_v11 = vsel %vm591_vm2, %v6796_v49, %v3555_v30  ;;  %v3520_v62 = vpop.f32.mrf.mxu1 }
 0x741   : > { %5122 = vmatmul.mubr.msk.f32.vlgmr.msra.gmra.mxu0 %vm245_vm0, %v3637_v11  ;;  %3606 = vrot.lane.b32.xlu1 %v3520_v62, %s5428_s22  ;;  %v7733_v62 = vld [vmem:[#allocation4_spill] sm:$0xff] }
 0x742   : > { %v5104_v7 = vpop.f32.mrf.mxu1 }
 0x743   : > { %v3557_v63 = vpop.permute.xlu1 %3556 }
 0x744   : > { %v3638_v8 = vsel %vm591_vm2, %v6804_v51, %v3557_v63 }
 0x745   : > { %5124 = vmatprep.mubr.msk.f32.mxu0 %vm245_vm0, %v3638_v8  ;;  %v7734_v8 = vld [vmem:[#allocation47_spill] sm:$0xff] }
 0x747   : > { %v3559_v45 = vpop.permute.xlu1 %3558 }
 0x748   : > { %v3639_v15 = vsel %vm591_vm2, %v6811_v44, %v3559_v45 }
 0x749   : > { %5125 = vmatmul.mubr.msk.f32.gmra.mxu0 %vm245_vm0, %v3639_v15 }
 0x74b   : > { %v3561_v23 = vpop.permute.xlu1 %3560 }
 0x74c   : > { %v3640_v49 = vsel %vm591_vm2, %v6817_v19, %v3561_v23  ;;  %v7735_v23 = vld [vmem:[#allocation34_spill] sm:$0xff] }
 0x74d   : > { %5127 = vmatprep.mubr.msk.f32.mxu0 %vm245_vm0, %v3640_v49 }
 0x74f   : > { %v3563_v0 = vpop.permute.xlu1 %3562 }
 0x750   : > { %v3641_v52 = vsel %vm591_vm2, %v6821_v53, %v3563_v0 }
 0x751   : > { %5128 = vmatmul.mubr.msk.f32.gmra.mxu0 %vm245_vm0, %v3641_v52 }
 0x753   : > { %v3567_v51 = vpop.permute.xlu1 %3566  ;;  %v3565_v39 = vpop.permute.xlu0 %3564 }
 0x754   : > { %v3643_v10 = vsel %vm591_vm2, %v6827_v34, %v3567_v51  ;;  %v3642_v44 = vsel %vm591_vm2, %v6825_v12, %v3565_v39 }
 0x755   : > { %5130 = vmatprep.mubr.msk.f32.mxu0 %vm245_vm0, %v3642_v44 }
 0x756   : > { %5131 = vmatmul.mubr.msk.f32.gmra.mxu0 %vm245_vm0, %v3643_v10 }
 0x757   : > { %v3569_v19 = vpop.permute.xlu0 %3568 }
 0x758   : > { %v3644_v50 = vsel %vm591_vm2, %v6829_v37, %v3569_v19 }
 0x759   : > { %5133 = vmatprep.mubr.msk.f32.mxu0 %vm245_vm0, %v3644_v50  ;;  %v3571_v53 = vpop.permute.xlu1 %3570 }
 0x75a   : > { %v3645_v20 = vsel %vm591_vm2, %v6831_v29, %v3571_v53 }
 0x75b   : > { %5134 = vmatmul.mubr.msk.f32.gmra.mxu0 %vm245_vm0, %v3645_v20 }
 0x761   : > { %v3573_v34 = vpop.permute.xlu0 %3572 }
 0x762   : > { %v3646_v12 = vsel %vm591_vm2, %v7718_v13, %v3573_v34 }
 0x763   : > { %5136 = vmatprep.mubr.msk.f32.mxu0 %vm245_vm0, %v3646_v12 }
 0x769   : > { %v3575_v46 = vpop.permute.xlu1 %3574 }
 0x76a   : > { %v3647_v59 = vsel %vm591_vm2, %v7719_v36, %v3575_v46 }
 0x76b   : > { %5137 = vmatmul.mubr.msk.f32.gmra.mxu0 %vm245_vm0, %v3647_v59 }
 0x76d   : > { %v3577_v37 = vpop.permute.xlu0 %3576 }
 0x76e   : > { %v3648_v17 = vsel %vm591_vm2, %v7720_v1, %v3577_v37 }
 0x76f   : > { %5139 = vmatprep.mubr.msk.f32.mxu0 %vm245_vm0, %v3648_v17 }
 0x771   : > { %v3579_v29 = vpop.permute.xlu1 %3578  ;;  %v3581_v32 = vpop.permute.xlu0 %3580 }
 0x772   : > { %v3649_v3 = vsel %vm591_vm2, %v7721_v35, %v3579_v29  ;;  %v3650_v25 = vsel %vm591_vm2, %v7722_v26, %v3581_v32 }
 0x773   : > { %5140 = vmatmul.mubr.msk.f32.gmra.mxu0 %vm245_vm0, %v3649_v3 }
 0x774   : > { %5142 = vmatprep.mubr.msk.f32.mxu0 %vm245_vm0, %v3650_v25 }
 0x775   : > { %v3583_v33 = vpop.permute.xlu1 %3582  ;;  %v3585_v43 = vpop.permute.xlu0 %3584 }
 0x776   : > { %v3651_v41 = vsel %vm591_vm2, %v7723_v61, %v3583_v33  ;;  %v3652_v42 = vsel %vm591_vm2, %v7724_v24, %v3585_v43 }
 0x777   : > { %5143 = vmatmul.mubr.msk.f32.gmra.mxu0 %vm245_vm0, %v3651_v41 }
 0x778   : > { %5145 = vmatprep.mubr.msk.f32.mxu0 %vm245_vm0, %v3652_v42 }
 0x779   : > { %v3587_v6 = vpop.permute.xlu1 %3586  ;;  %v3589_v27 = vpop.permute.xlu0 %3588 }
 0x77a   : > { %v3653_v48 = vsel %vm591_vm2, %v7725_v28, %v3587_v6  ;;  %v3654_v54 = vsel %vm591_vm2, %v7726_v21, %v3589_v27 }
 0x77b   : > { %5146 = vmatmul.mubr.msk.f32.gmra.mxu0 %vm245_vm0, %v3653_v48 }
 0x77c   : > { %5148 = vmatprep.mubr.msk.f32.mxu0 %vm245_vm0, %v3654_v54 }
 0x77d   : > { %v3591_v47 = vpop.permute.xlu1 %3590  ;;  %v3593_v40 = vpop.permute.xlu0 %3592 }
 0x77e   : > { %v3655_v18 = vsel %vm591_vm2, %v7727_v5, %v3591_v47  ;;  %v3656_v31 = vsel %vm591_vm2, %v7728_v2, %v3593_v40 }
 0x77f   : > { %5149 = vmatmul.mubr.msk.f32.gmra.mxu0 %vm245_vm0, %v3655_v18 }
 0x780   : > { %5151 = vmatprep.mubr.msk.f32.mxu0 %vm245_vm0, %v3656_v31 }
 0x79b   : > { %v3595_v4 = vpop.permute.xlu1 %3594 }
 0x79c   : > { %v3657_v14 = vsel %vm591_vm2, %v7729_v9, %v3595_v4 }
 0x79d   : > { %5152 = vmatmul.mubr.msk.f32.gmra.mxu0 %vm245_vm0, %v3657_v14 }
 0x79f   : > { %v3597_v60 = vpop.permute.xlu0 %3596 }
 0x7a0   : > { %v3658_v57 = vsel %vm591_vm2, %v7730_v55, %v3597_v60 }
 0x7a1   : > { %5154 = vmatprep.mubr.msk.f32.mxu0 %vm245_vm0, %v3658_v57 }
 0x7a3   : > { %v3599_v56 = vpop.permute.xlu1 %3598 }
 0x7a4   : > { %v3659_v16 = vsel %vm591_vm2, %v7731_v22, %v3599_v56 }
 0x7a5   : > { %5155 = vmatmul.mubr.msk.f32.gmra.mxu0 %vm245_vm0, %v3659_v16 }
 0x7a7   : > { %v3601_v38 = vpop.permute.xlu0 %3600 }
 0x7a8   : > { %v3660_v30 = vsel %vm591_vm2, %v7732_v58, %v3601_v38 }
 0x7a9   : > { %5157 = vmatprep.mubr.msk.f32.mxu0 %vm245_vm0, %v3660_v30 }
 0x7ab   : > { %v3603_v11 = vpop.permute.xlu1 %3602 }
 0x7ac   : > { %v3661_v7 = vsel %vm591_vm2, %v7733_v62, %v3603_v11 }
 0x7ad   : > { %5158 = vmatmul.mubr.msk.f32.gmra.mxu0 %vm245_vm0, %v3661_v7 }
 0x7af   : > { %v3605_v63 = vpop.permute.xlu0 %3604 }
 0x7b0   : > { %v3662_v45 = vsel %vm591_vm2, %v7734_v8, %v3605_v63 }
 0x7b1   : > { %5160 = vmatprep.mubr.msk.f32.mxu0 %vm245_vm0, %v3662_v45 }
 0x7b3   : > { %v3607_v15 = vpop.permute.xlu1 %3606 }
 0x7b4   : > { %v3663_v49 = vsel %vm591_vm2, %v7735_v23, %v3607_v15 }
 0x7b5   : > { %5161 = vmatmul.mubr.msk.f32.gmra.mxu0 %vm245_vm0, %v3663_v49 }
 0x801   : > { %v5123_v0 = vpop.f32.mrf.mxu0 }
 0x802   : > { %3962 = vst.msk [vmem:[%s7491_s8 + $0x8] sm:$0xff] %vm245_vm0, %v5123_v0 }
 0x803   : > { %v3822_v52 = vpop.f32.mrf.mxu0 }
 0x804   : > { %3961 = vst.msk [vmem:[%s7491_s8] sm:$0xff] %vm245_vm0, %v3822_v52 }
 0x809   : > { %v5126_v51 = vpop.f32.mrf.mxu0 }
 0x80a   : > { %3964 = vst.msk [vmem:[%s7491_s8 + $0x18] sm:$0xff] %vm245_vm0, %v5126_v51 }
 0x80b   : > { %v3832_v39 = vpop.f32.mrf.mxu0 }
 0x80c   : > { %3963 = vst.msk [vmem:[%s7491_s8 + $0x10] sm:$0xff] %vm245_vm0, %v3832_v39 }
 0x811   : > { %v5129_v10 = vpop.f32.mrf.mxu0 }
 0x812   : > { %3966 = vst.msk [vmem:[%s7491_s8 + $0x28] sm:$0xff] %vm245_vm0, %v5129_v10 }
 0x813   : > { %v3842_v44 = vpop.f32.mrf.mxu0 }
 0x814   : > { %3965 = vst.msk [vmem:[%s7491_s8 + $0x20] sm:$0xff] %vm245_vm0, %v3842_v44 }
 0x816   : > { %v5132_v19 = vpop.f32.mrf.mxu0 }
 0x817   : > { %3968 = vst.msk [vmem:[%s7491_s8 + $0x38] sm:$0xff] %vm245_vm0, %v5132_v19 }
 0x818   : > { %v3852_v50 = vpop.f32.mrf.mxu0 }
 0x819   : > { %3967 = vst.msk [vmem:[%s7491_s8 + $0x30] sm:$0xff] %vm245_vm0, %v3852_v50 }
 0x81b   : > { %v5135_v53 = vpop.f32.mrf.mxu0 }
 0x81c   : > { %3970 = vst.msk [vmem:[%s7491_s8 + $0x48] sm:$0xff] %vm245_vm0, %v5135_v53 }
 0x81d   : > { %v3862_v20 = vpop.f32.mrf.mxu0 }
 0x81e   : > { %3969 = vst.msk [vmem:[%s7491_s8 + $0x40] sm:$0xff] %vm245_vm0, %v3862_v20 }
 0x82b   : > { %v5138_v34 = vpop.f32.mrf.mxu0 }
 0x82c   : > { %3972 = vst.msk [vmem:[%s7491_s8 + $0x58] sm:$0xff] %vm245_vm0, %v5138_v34 }
 0x82d   : > { %v3872_v13 = vpop.f32.mrf.mxu0 }
 0x82e   : > { %3971 = vst.msk [vmem:[%s7491_s8 + $0x50] sm:$0xff] %vm245_vm0, %v3872_v13 }
 0x833   : > { %v5141_v12 = vpop.f32.mrf.mxu0 }
 0x834   : > { %3974 = vst.msk [vmem:[%s7491_s8 + $0x68] sm:$0xff] %vm245_vm0, %v5141_v12 }
 0x835   : > { %v3882_v46 = vpop.f32.mrf.mxu0 }
 0x836   : > { %3973 = vst.msk [vmem:[%s7491_s8 + $0x60] sm:$0xff] %vm245_vm0, %v3882_v46 }
 0x837   : > { %v5144_v36 = vpop.f32.mrf.mxu0 }
 0x838   : > { %3976 = vst.msk [vmem:[%s7491_s8 + $0x78] sm:$0xff] %vm245_vm0, %v5144_v36 }
 0x839   : > { %v3892_v59 = vpop.f32.mrf.mxu0 }
 0x83a   : > { %3975 = vst.msk [vmem:[%s7491_s8 + $0x70] sm:$0xff] %vm245_vm0, %v3892_v59 }
 0x83b   : > { %v5147_v37 = vpop.f32.mrf.mxu0 }
 0x83c   : > { %3978 = vst.msk [vmem:[%s7491_s8 + $0x88] sm:$0xff] %vm245_vm0, %v5147_v37 }
 0x83d   : > { %v3902_v1 = vpop.f32.mrf.mxu0 }
 0x83e   : > { %3977 = vst.msk [vmem:[%s7491_s8 + $0x80] sm:$0xff] %vm245_vm0, %v3902_v1 }
 0x83f   : > { %v5150_v17 = vpop.f32.mrf.mxu0 }
 0x840   : > { %3980 = vst.msk [vmem:[%s7491_s8 + $0x98] sm:$0xff] %vm245_vm0, %v5150_v17 }
 0x841   : > { %v3912_v29 = vpop.f32.mrf.mxu0 }
 0x842   : > { %3979 = vst.msk [vmem:[%s7491_s8 + $0x90] sm:$0xff] %vm245_vm0, %v3912_v29 }
 0x85d   : > { %v5153_v32 = vpop.f32.mrf.mxu0 }
 0x85e   : > { %3982 = vst.msk [vmem:[%s7491_s8 + $0xa8] sm:$0xff] %vm245_vm0, %v5153_v32 }
 0x85f   : > { %v3922_v35 = vpop.f32.mrf.mxu0 }
 0x860   : > { %3981 = vst.msk [vmem:[%s7491_s8 + $0xa0] sm:$0xff] %vm245_vm0, %v3922_v35 }
 0x865   : > { %v5156_v3 = vpop.f32.mrf.mxu0 }
 0x866   : > { %3984 = vst.msk [vmem:[%s7491_s8 + $0xb8] sm:$0xff] %vm245_vm0, %v5156_v3 }
 0x867   : > { %v3932_v26 = vpop.f32.mrf.mxu0 }
 0x868   : > { %3983 = vst.msk [vmem:[%s7491_s8 + $0xb0] sm:$0xff] %vm245_vm0, %v3932_v26 }
 0x86d   : > { %v5159_v25 = vpop.f32.mrf.mxu0 }
 0x86e   : > { %3986 = vst.msk [vmem:[%s7491_s8 + $0xc8] sm:$0xff] %vm245_vm0, %v5159_v25 }
 0x86f   : > { %v3942_v33 = vpop.f32.mrf.mxu0 }
 0x870   : > { %3985 = vst.msk [vmem:[%s7491_s8 + $0xc0] sm:$0xff] %vm245_vm0, %v3942_v33 }
 0x875   : > { %v5162_v43 = vpop.f32.mrf.mxu0 }
 0x876   : > { %3988 = vst.msk [vmem:[%s7491_s8 + $0xd8] sm:$0xff] %vm245_vm0, %v5162_v43 }
 0x877   : > { %v3952_v61 = vpop.f32.mrf.mxu0 }
 0x878   : > { %3987 = vst.msk [vmem:[%s7491_s8 + $0xd0] sm:$0xff] %vm245_vm0, %v3952_v61 }
 0x879 PF: > { %s14_s15 = sadd.s32 1, %s5422_s15  }
 0x87a   : > { %p11_p4 = scmp.ge.s32.totalorder %s14_s15, 4  }
 0x87c   :  { %13 = sbr.rel (!%p11_p4) target bundleno = 1 (0x1), region = 67 }

</bundles_post_ra>
